<compile_context>
chip_gen: v7x
topology: tpu7x:2x2x1
jax: 0.10.0
libtpu: 0.0.40
codegen_flags: <defaults>
</compile_context>

<pallas_src>
import numpy as np

import jax
import jax.numpy as jnp
from jax.experimental import pallas as pl
from jax.experimental.pallas import tpu as pltpu


# ----------------------------------------------------------------------------
# Init-time helpers (numpy).
# ----------------------------------------------------------------------------
def _band(wgt, win, out_ws):
    """Band matrix folding the 3 horizontal taps + padding=1 + column select.

    wgt: (3, 3, Cin, Cout) f32.  Returns (3, win*Cin, len(out_ws)*Cout) with
    band[dy, u*Cin+ci, k*Cout+co] = wgt[dy, u-out_ws[k]+1, ci, co].
    """
    cin, cout = wgt.shape[2], wgt.shape[3]
    out_ws = list(out_ws)
    band = np.zeros((3, win * cin, len(out_ws) * cout), np.float32)
    for dy in range(3):
        for k, w in enumerate(out_ws):
            for dx in range(3):
                u = w + dx - 1                     # input column (padding=1)
                if 0 <= u < win:
                    band[dy, u * cin:(u + 1) * cin,
                         k * cout:(k + 1) * cout] = wgt[dy, dx]
    return band


def init_params(key):
    # (Cin, Cout, input width, pooled?)
    conv_cfg = [(3, 8, 32, True), (8, 16, 16, True), (16, 32, 8, False),
                (32, 48, 8, True), (48, 80, 4, False)]
    keys = jax.random.split(key, 2 * len(conv_cfg) + 4)
    params = {}
    k = 0
    for idx, (cin, cout, win, pool) in enumerate(conv_cfg, start=1):
        scale = 1.0 / np.sqrt(9.0 * cin)
        wgt = np.asarray(jax.random.normal(keys[k], (3, 3, cin, cout),
                                           jnp.float32)) * scale
        bias = np.asarray(jax.random.normal(keys[k + 1], (cout,),
                                            jnp.float32)) * scale
        k += 2
        if pool:
            # Even/odd output columns as separate bands -> pool = elementwise max.
            params[f"w{idx}e"] = jnp.asarray(
                _band(wgt, win, range(0, win, 2)), jnp.bfloat16)
            params[f"w{idx}o"] = jnp.asarray(
                _band(wgt, win, range(1, win, 2)), jnp.bfloat16)
            reps = win // 2
        else:
            params[f"w{idx}"] = jnp.asarray(
                _band(wgt, win, range(win)), jnp.bfloat16)
            reps = win
        params[f"b{idx}"] = jnp.asarray(np.tile(bias, reps)[None, :],
                                        jnp.float32)

    # fc1 (1280 -> 300): generated in PyTorch CHW flatten order, then the
    # CHW -> HWC permutation is folded into the weight so the kernel consumes
    # conv5's (h, w*80+c) layout directly (no runtime transpose/reshape).
    fw1_t = np.asarray(jax.random.normal(keys[k], (1280, 300),
                                         jnp.float32)) / np.sqrt(1280.0)
    fb1 = np.asarray(jax.random.normal(keys[k + 1], (300,),
                                       jnp.float32)) * 0.01
    fw2 = np.asarray(jax.random.normal(keys[k + 2], (300, 10),
                                       jnp.float32)) / np.sqrt(300.0)
    fb2 = np.asarray(jax.random.normal(keys[k + 3], (10,),
                                       jnp.float32)) * 0.01
    h_i, w_i, c_i = np.meshgrid(np.arange(4), np.arange(4), np.arange(80),
                                indexing="ij")
    hwc_idx = (h_i * 320 + w_i * 80 + c_i).ravel()   # kernel flatten order
    chw_idx = (c_i * 16 + h_i * 4 + w_i).ravel()     # torch x.view(-1,1280) order
    fw1_k = np.zeros_like(fw1_t)
    fw1_k[hwc_idx] = fw1_t[chw_idx]
    params["fw1"] = jnp.asarray(fw1_k.reshape(4, 320, 300), jnp.bfloat16)
    params["fb1"] = jnp.asarray(fb1[None, :], jnp.float32)

    # fc2 (300 -> 10): pad the output lane width 10 -> 128 (lane-dense store).
    fw2_p = np.zeros((300, 128), np.float32)
    fw2_p[:, :10] = fw2
    fb2_p = np.zeros((1, 128), np.float32)
    fb2_p[0, :10] = fb2
    params["fw2"] = jnp.asarray(fw2_p, jnp.bfloat16)
    params["fb2"] = jnp.asarray(fb2_p, jnp.float32)
    return params


# ----------------------------------------------------------------------------
# In-kernel building blocks.
# ----------------------------------------------------------------------------
def _fill_padded(pad_ref, y, hin):
    """Write y (hin, L) into rows [1, hin+1) of pad_ref; zero the border rows."""
    zrow = jnp.zeros((1, y.shape[1]), jnp.float32)
    pad_ref[0:1, :] = zrow
    pad_ref[hin + 1:hin + 2, :] = zrow
    pad_ref[1:hin + 1, :] = y


def _slabs(pad_ref, hin):
    # Three sublane-offset row slabs (dy = 0, 1, 2), cast to bf16 for the MXU.
    return [pad_ref[dy:dy + hin, :].astype(jnp.bfloat16) for dy in range(3)]


def _band_dot(slabs, w_ref):
    acc = jnp.dot(slabs[0], w_ref[0], preferred_element_type=jnp.float32)
    acc = acc + jnp.dot(slabs[1], w_ref[1], preferred_element_type=jnp.float32)
    acc = acc + jnp.dot(slabs[2], w_ref[2], preferred_element_type=jnp.float32)
    return acc


def _conv_relu(pad_ref, w_ref, b_ref, hin):
    s = _slabs(pad_ref, hin)
    return jnp.maximum(_band_dot(s, w_ref) + b_ref[...], 0.0)


def _conv_relu_pool(pad_ref, we_ref, wo_ref, b_ref, hin):
    s = _slabs(pad_ref, hin)
    b = b_ref[...]
    even = jnp.maximum(_band_dot(s, we_ref) + b, 0.0)   # even output columns
    odd = jnp.maximum(_band_dot(s, wo_ref) + b, 0.0)    # odd output columns
    col = jnp.maximum(even, odd)                        # horizontal 2-max
    col = col.reshape(hin // 2, 2, col.shape[1])
    return jnp.max(col, axis=1)                         # vertical 2-max


def _net_kernel(x_ref,
                w1e, w1o, b1, w2e, w2o, b2, w3, b3,
                w4e, w4o, b4, w5, b5,
                fw1, fb1, fw2, fb2,
                o_ref,
                pad1, pad2, pad3, pad4, pad5):
    _fill_padded(pad1, x_ref[0], 32)                    # (32, 96)   W=32 C=3
    y = _conv_relu_pool(pad1, w1e, w1o, b1, 32)         # (16, 128)  W=16 C=8
    _fill_padded(pad2, y, 16)
    y = _conv_relu_pool(pad2, w2e, w2o, b2, 16)         # (8, 128)   W=8  C=16
    _fill_padded(pad3, y, 8)
    y = _conv_relu(pad3, w3, b3, 8)                     # (8, 256)   W=8  C=32
    _fill_padded(pad4, y, 8)
    y = _conv_relu_pool(pad4, w4e, w4o, b4, 8)          # (4, 192)   W=4  C=48
    _fill_padded(pad5, y, 4)
    y = _conv_relu(pad5, w5, b5, 4)                     # (4, 320)   W=4  C=80

    # TODO(synk): nn.Dropout(0.25) == identity in eval mode.

    # fc1: contract over (h, w, c); CHW->HWC permutation already baked in fw1.
    h = jnp.zeros((1, 300), jnp.float32)
    for r in range(4):
        h = h + jnp.dot(y[r:r + 1, :].astype(jnp.bfloat16), fw1[r],
                        preferred_element_type=jnp.float32)
    h = jnp.maximum(h + fb1[...], 0.0)

    # fc2 (output lanes padded 10 -> 128 at init for a lane-dense store).
    out = jnp.dot(h.astype(jnp.bfloat16), fw2[...],
                  preferred_element_type=jnp.float32) + fb2[...]
    o_ref[0] = out


# ----------------------------------------------------------------------------
# Wrapper (accepts PyTorch-style NCHW input).
# ----------------------------------------------------------------------------
def _const_spec(shape):
    nd = len(shape)
    return pl.BlockSpec(shape, lambda i: (0,) * nd)


@jax.jit
def net_forward(params, x_nchw):
    n = x_nchw.shape[0]
    # NCHW -> lane-dense (N, H, W*C) layout (one tiny XLA op on the raw input).
    x = jnp.transpose(x_nchw, (0, 2, 3, 1)).reshape(n, 32, 32 * 3)

    weight_args = [
        params["w1e"], params["w1o"], params["b1"],
        params["w2e"], params["w2o"], params["b2"],
        params["w3"], params["b3"],
        params["w4e"], params["w4o"], params["b4"],
        params["w5"], params["b5"],
        params["fw1"], params["fb1"], params["fw2"], params["fb2"],
    ]
    in_specs = ([pl.BlockSpec((1, 32, 96), lambda i: (i, 0, 0))] +
                [_const_spec(a.shape) for a in weight_args])

    out = pl.pallas_call(
        _net_kernel,
        out_shape=jax.ShapeDtypeStruct((n, 1, 128), jnp.float32),
        grid=(n,),
        in_specs=in_specs,
        out_specs=pl.BlockSpec((1, 1, 128), lambda i: (i, 0, 0)),
        scratch_shapes=[
            pltpu.VMEM((34, 96), jnp.float32),    # conv1 padded input
            pltpu.VMEM((18, 128), jnp.float32),   # conv2 padded input
            pltpu.VMEM((10, 128), jnp.float32),   # conv3 padded input
            pltpu.VMEM((10, 256), jnp.float32),   # conv4 padded input
            pltpu.VMEM((6, 192), jnp.float32),    # conv5 padded input
        ],
        compiler_params=pltpu.CompilerParams(
            dimension_semantics=("parallel",)),
    )(x, *weight_args)
    return out[:, 0, :10]


if __name__ == "__main__":
    key = jax.random.PRNGKey(0)
    k_x, k_p = jax.random.split(key)
    # Spatial size is forced to 32x32 by fc1's 80*4*4 input and the 3 pools.
    x = jax.random.normal(k_x, (2, 3, 32, 32), jnp.float32)   # NCHW input
    params = init_params(k_p)

    out = net_forward(params, x)
    out = jax.block_until_ready(out)
    assert out.shape == (2, 10), out.shape
    assert bool(jnp.all(jnp.isfinite(out)))
    print("KERNEL_OK")
</pallas_src>

<mosaic_0001>
module attributes {stable_mosaic.version = 11 : i64} {
  func.func @_net_kernel(%arg0: i32, %arg1: memref<1x32x96xf32, #tpu.memory_space<vmem>>, %arg2: memref<3x96x128xbf16, #tpu.memory_space<vmem>>, %arg3: memref<3x96x128xbf16, #tpu.memory_space<vmem>>, %arg4: memref<1x128xf32, #tpu.memory_space<vmem>>, %arg5: memref<3x128x128xbf16, #tpu.memory_space<vmem>>, %arg6: memref<3x128x128xbf16, #tpu.memory_space<vmem>>, %arg7: memref<1x128xf32, #tpu.memory_space<vmem>>, %arg8: memref<3x128x256xbf16, #tpu.memory_space<vmem>>, %arg9: memref<1x256xf32, #tpu.memory_space<vmem>>, %arg10: memref<3x256x192xbf16, #tpu.memory_space<vmem>>, %arg11: memref<3x256x192xbf16, #tpu.memory_space<vmem>>, %arg12: memref<1x192xf32, #tpu.memory_space<vmem>>, %arg13: memref<3x192x320xbf16, #tpu.memory_space<vmem>>, %arg14: memref<1x320xf32, #tpu.memory_space<vmem>>, %arg15: memref<4x320x300xbf16, #tpu.memory_space<vmem>>, %arg16: memref<1x300xf32, #tpu.memory_space<vmem>>, %arg17: memref<300x128xbf16, #tpu.memory_space<vmem>>, %arg18: memref<1x128xf32, #tpu.memory_space<vmem>>, %arg19: memref<1x1x128xf32, #tpu.memory_space<vmem>>, %arg20: memref<34x96xf32, #tpu.memory_space<vmem>>, %arg21: memref<18x128xf32, #tpu.memory_space<vmem>>, %arg22: memref<10x128xf32, #tpu.memory_space<vmem>>, %arg23: memref<10x256xf32, #tpu.memory_space<vmem>>, %arg24: memref<6x192xf32, #tpu.memory_space<vmem>>) attributes {dimension_semantics = [#tpu.dimension_semantics<parallel>], iteration_bounds = array<i64: 2>, scalar_prefetch = 0 : i64, scratch_operands = 5 : i64, tpu.core_type = #tpu.core_type<tc>, window_params = [{transform_indices = @transform_0, window_bounds = array<i64: 1, 32, 96>}, {pipeline_mode = #tpu.pipeline_mode<synchronous>, transform_indices = @transform_1, window_bounds = array<i64: 3, 96, 128>}, {pipeline_mode = #tpu.pipeline_mode<synchronous>, transform_indices = @transform_2, window_bounds = array<i64: 3, 96, 128>}, {pipeline_mode = #tpu.pipeline_mode<synchronous>, transform_indices = @transform_3, window_bounds = array<i64: 1, 128>}, {pipeline_mode = #tpu.pipeline_mode<synchronous>, transform_indices = @transform_4, window_bounds = array<i64: 3, 128, 128>}, {pipeline_mode = #tpu.pipeline_mode<synchronous>, transform_indices = @transform_5, window_bounds = array<i64: 3, 128, 128>}, {pipeline_mode = #tpu.pipeline_mode<synchronous>, transform_indices = @transform_6, window_bounds = array<i64: 1, 128>}, {pipeline_mode = #tpu.pipeline_mode<synchronous>, transform_indices = @transform_7, window_bounds = array<i64: 3, 128, 256>}, {pipeline_mode = #tpu.pipeline_mode<synchronous>, transform_indices = @transform_8, window_bounds = array<i64: 1, 256>}, {pipeline_mode = #tpu.pipeline_mode<synchronous>, transform_indices = @transform_9, window_bounds = array<i64: 3, 256, 192>}, {pipeline_mode = #tpu.pipeline_mode<synchronous>, transform_indices = @transform_10, window_bounds = array<i64: 3, 256, 192>}, {pipeline_mode = #tpu.pipeline_mode<synchronous>, transform_indices = @transform_11, window_bounds = array<i64: 1, 192>}, {pipeline_mode = #tpu.pipeline_mode<synchronous>, transform_indices = @transform_12, window_bounds = array<i64: 3, 192, 320>}, {pipeline_mode = #tpu.pipeline_mode<synchronous>, transform_indices = @transform_13, window_bounds = array<i64: 1, 320>}, {pipeline_mode = #tpu.pipeline_mode<synchronous>, transform_indices = @transform_14, window_bounds = array<i64: 4, 320, 300>}, {pipeline_mode = #tpu.pipeline_mode<synchronous>, transform_indices = @transform_15, window_bounds = array<i64: 1, 300>}, {pipeline_mode = #tpu.pipeline_mode<synchronous>, transform_indices = @transform_16, window_bounds = array<i64: 300, 128>}, {pipeline_mode = #tpu.pipeline_mode<synchronous>, transform_indices = @transform_17, window_bounds = array<i64: 1, 128>}, {transform_indices = @transform_18, window_bounds = array<i64: 1, 1, 128>}]} {
    %c0 = arith.constant 0 : index
    %c0_0 = arith.constant 0 : index
    %c0_1 = arith.constant 0 : index
    %0 = vector.load %arg1[%c0, %c0_0, %c0_1] : memref<1x32x96xf32, #tpu.memory_space<vmem>>, vector<1x32x96xf32>
    %1 = vector.shape_cast %0 : vector<1x32x96xf32> to vector<32x96xf32>
    %cst = arith.constant 0.000000e+00 : f32
    %2 = vector.broadcast %cst : f32 to vector<1x96xf32>
    %c0_2 = arith.constant 0 : index
    %c0_3 = arith.constant 0 : index
    %3 = vector.load %arg20[%c0_2, %c0_3] : memref<34x96xf32, #tpu.memory_space<vmem>>, vector<1x96xf32>
    tpu.vector_store %arg20[%c0_2, %c0_3], %2 {strides = array<i32>} : memref<34x96xf32, #tpu.memory_space<vmem>>, vector<1x96xf32>,
    %c33 = arith.constant 33 : index
    %c0_4 = arith.constant 0 : index
    %4 = vector.load %arg20[%c33, %c0_4] : memref<34x96xf32, #tpu.memory_space<vmem>>, vector<1x96xf32>
    tpu.vector_store %arg20[%c33, %c0_4], %2 {strides = array<i32>} : memref<34x96xf32, #tpu.memory_space<vmem>>, vector<1x96xf32>,
    %c1 = arith.constant 1 : index
    %c0_5 = arith.constant 0 : index
    %5 = vector.load %arg20[%c1, %c0_5] : memref<34x96xf32, #tpu.memory_space<vmem>>, vector<32x96xf32>
    tpu.vector_store %arg20[%c1, %c0_5], %1 {strides = array<i32>} : memref<34x96xf32, #tpu.memory_space<vmem>>, vector<32x96xf32>,
    %c0_6 = arith.constant 0 : index
    %c0_7 = arith.constant 0 : index
    %6 = vector.load %arg20[%c0_6, %c0_7] : memref<34x96xf32, #tpu.memory_space<vmem>>, vector<32x96xf32>
    %7 = arith.truncf %6 : vector<32x96xf32> to vector<32x96xbf16>
    %c1_8 = arith.constant 1 : index
    %c0_9 = arith.constant 0 : index
    %8 = vector.load %arg20[%c1_8, %c0_9] : memref<34x96xf32, #tpu.memory_space<vmem>>, vector<32x96xf32>
    %9 = arith.truncf %8 : vector<32x96xf32> to vector<32x96xbf16>
    %c2 = arith.constant 2 : index
    %c0_10 = arith.constant 0 : index
    %10 = vector.load %arg20[%c2, %c0_10] : memref<34x96xf32, #tpu.memory_space<vmem>>, vector<32x96xf32>
    %11 = arith.truncf %10 : vector<32x96xf32> to vector<32x96xbf16>
    %c0_11 = arith.constant 0 : index
    %c0_12 = arith.constant 0 : index
    %12 = vector.load %arg4[%c0_11, %c0_12] : memref<1x128xf32, #tpu.memory_space<vmem>>, vector<1x128xf32>
    %c0_13 = arith.constant 0 : index
    %c0_14 = arith.constant 0 : index
    %c0_15 = arith.constant 0 : index
    %13 = vector.load %arg2[%c0_13, %c0_14, %c0_15] : memref<3x96x128xbf16, #tpu.memory_space<vmem>>, vector<1x96x128xbf16>
    %14 = vector.shape_cast %13 : vector<1x96x128xbf16> to vector<96x128xbf16>
    %cst_16 = arith.constant dense<0.000000e+00> : vector<32x128xf32>
    %15 = tpu.matmul %7, %14, %cst_16 {dimension_numbers = #tpu.dot_dimension_numbers<[1], [0], [0], [1], [0, 0, 1, 1], [], []>} : vector<32x96xbf16>, vector<96x128xbf16>, vector<32x128xf32> -> vector<32x128xf32>
    %c1_17 = arith.constant 1 : index
    %c0_18 = arith.constant 0 : index
    %c0_19 = arith.constant 0 : index
    %16 = vector.load %arg2[%c1_17, %c0_18, %c0_19] : memref<3x96x128xbf16, #tpu.memory_space<vmem>>, vector<1x96x128xbf16>
    %17 = vector.shape_cast %16 : vector<1x96x128xbf16> to vector<96x128xbf16>
    %cst_20 = arith.constant dense<0.000000e+00> : vector<32x128xf32>
    %18 = tpu.matmul %9, %17, %cst_20 {dimension_numbers = #tpu.dot_dimension_numbers<[1], [0], [0], [1], [0, 0, 1, 1], [], []>} : vector<32x96xbf16>, vector<96x128xbf16>, vector<32x128xf32> -> vector<32x128xf32>
    %19 = arith.addf %15, %18 : vector<32x128xf32>
    %c2_21 = arith.constant 2 : index
    %c0_22 = arith.constant 0 : index
    %c0_23 = arith.constant 0 : index
    %20 = vector.load %arg2[%c2_21, %c0_22, %c0_23] : memref<3x96x128xbf16, #tpu.memory_space<vmem>>, vector<1x96x128xbf16>
    %21 = vector.shape_cast %20 : vector<1x96x128xbf16> to vector<96x128xbf16>
    %cst_24 = arith.constant dense<0.000000e+00> : vector<32x128xf32>
    %22 = tpu.matmul %11, %21, %cst_24 {dimension_numbers = #tpu.dot_dimension_numbers<[1], [0], [0], [1], [0, 0, 1, 1], [], []>} : vector<32x96xbf16>, vector<96x128xbf16>, vector<32x128xf32> -> vector<32x128xf32>
    %23 = arith.addf %19, %22 : vector<32x128xf32>
    %24 = vector.broadcast %12 : vector<1x128xf32> to vector<32x128xf32>
    %25 = arith.addf %23, %24 : vector<32x128xf32>
    %cst_25 = arith.constant 0.000000e+00 : f32
    %26 = vector.broadcast %cst_25 : f32 to vector<32x128xf32>
    %27 = arith.maximumf %25, %26 : vector<32x128xf32>
    %c0_26 = arith.constant 0 : index
    %c0_27 = arith.constant 0 : index
    %c0_28 = arith.constant 0 : index
    %28 = vector.load %arg3[%c0_26, %c0_27, %c0_28] : memref<3x96x128xbf16, #tpu.memory_space<vmem>>, vector<1x96x128xbf16>
    %29 = vector.shape_cast %28 : vector<1x96x128xbf16> to vector<96x128xbf16>
    %cst_29 = arith.constant dense<0.000000e+00> : vector<32x128xf32>
    %30 = tpu.matmul %7, %29, %cst_29 {dimension_numbers = #tpu.dot_dimension_numbers<[1], [0], [0], [1], [0, 0, 1, 1], [], []>} : vector<32x96xbf16>, vector<96x128xbf16>, vector<32x128xf32> -> vector<32x128xf32>
    %c1_30 = arith.constant 1 : index
    %c0_31 = arith.constant 0 : index
    %c0_32 = arith.constant 0 : index
    %31 = vector.load %arg3[%c1_30, %c0_31, %c0_32] : memref<3x96x128xbf16, #tpu.memory_space<vmem>>, vector<1x96x128xbf16>
    %32 = vector.shape_cast %31 : vector<1x96x128xbf16> to vector<96x128xbf16>
    %cst_33 = arith.constant dense<0.000000e+00> : vector<32x128xf32>
    %33 = tpu.matmul %9, %32, %cst_33 {dimension_numbers = #tpu.dot_dimension_numbers<[1], [0], [0], [1], [0, 0, 1, 1], [], []>} : vector<32x96xbf16>, vector<96x128xbf16>, vector<32x128xf32> -> vector<32x128xf32>
    %34 = arith.addf %30, %33 : vector<32x128xf32>
    %c2_34 = arith.constant 2 : index
    %c0_35 = arith.constant 0 : index
    %c0_36 = arith.constant 0 : index
    %35 = vector.load %arg3[%c2_34, %c0_35, %c0_36] : memref<3x96x128xbf16, #tpu.memory_space<vmem>>, vector<1x96x128xbf16>
    %36 = vector.shape_cast %35 : vector<1x96x128xbf16> to vector<96x128xbf16>
    %cst_37 = arith.constant dense<0.000000e+00> : vector<32x128xf32>
    %37 = tpu.matmul %11, %36, %cst_37 {dimension_numbers = #tpu.dot_dimension_numbers<[1], [0], [0], [1], [0, 0, 1, 1], [], []>} : vector<32x96xbf16>, vector<96x128xbf16>, vector<32x128xf32> -> vector<32x128xf32>
    %38 = arith.addf %34, %37 : vector<32x128xf32>
    %39 = vector.broadcast %12 : vector<1x128xf32> to vector<32x128xf32>
    %40 = arith.addf %38, %39 : vector<32x128xf32>
    %cst_38 = arith.constant 0.000000e+00 : f32
    %41 = vector.broadcast %cst_38 : f32 to vector<32x128xf32>
    %42 = arith.maximumf %40, %41 : vector<32x128xf32>
    %43 = arith.maximumf %27, %42 : vector<32x128xf32>
    %44 = vector.shape_cast %43 : vector<32x128xf32> to vector<16x2x128xf32>
    %cst_39 = arith.constant dense<0xFF800000> : vector<16x128xf32>
    %45 = vector.multi_reduction <maximumf>, %44, %cst_39 [1] : vector<16x2x128xf32> to vector<16x128xf32>
    %cst_40 = arith.constant 0.000000e+00 : f32
    %46 = vector.broadcast %cst_40 : f32 to vector<1x128xf32>
    %c0_41 = arith.constant 0 : index
    %c0_42 = arith.constant 0 : index
    %47 = vector.load %arg21[%c0_41, %c0_42] : memref<18x128xf32, #tpu.memory_space<vmem>>, vector<1x128xf32>
    tpu.vector_store %arg21[%c0_41, %c0_42], %46 {strides = array<i32>} : memref<18x128xf32, #tpu.memory_space<vmem>>, vector<1x128xf32>,
    %c17 = arith.constant 17 : index
    %c0_43 = arith.constant 0 : index
    %48 = vector.load %arg21[%c17, %c0_43] : memref<18x128xf32, #tpu.memory_space<vmem>>, vector<1x128xf32>
    tpu.vector_store %arg21[%c17, %c0_43], %46 {strides = array<i32>} : memref<18x128xf32, #tpu.memory_space<vmem>>, vector<1x128xf32>,
    %c1_44 = arith.constant 1 : index
    %c0_45 = arith.constant 0 : index
    %49 = vector.load %arg21[%c1_44, %c0_45] : memref<18x128xf32, #tpu.memory_space<vmem>>, vector<16x128xf32>
    tpu.vector_store %arg21[%c1_44, %c0_45], %45 {strides = array<i32>} : memref<18x128xf32, #tpu.memory_space<vmem>>, vector<16x128xf32>,
    %c0_46 = arith.constant 0 : index
    %c0_47 = arith.constant 0 : index
    %50 = vector.load %arg21[%c0_46, %c0_47] : memref<18x128xf32, #tpu.memory_space<vmem>>, vector<16x128xf32>
    %51 = arith.truncf %50 : vector<16x128xf32> to vector<16x128xbf16>
    %c1_48 = arith.constant 1 : index
    %c0_49 = arith.constant 0 : index
    %52 = vector.load %arg21[%c1_48, %c0_49] : memref<18x128xf32, #tpu.memory_space<vmem>>, vector<16x128xf32>
    %53 = arith.truncf %52 : vector<16x128xf32> to vector<16x128xbf16>
    %c2_50 = arith.constant 2 : index
    %c0_51 = arith.constant 0 : index
    %54 = vector.load %arg21[%c2_50, %c0_51] : memref<18x128xf32, #tpu.memory_space<vmem>>, vector<16x128xf32>
    %55 = arith.truncf %54 : vector<16x128xf32> to vector<16x128xbf16>
    %c0_52 = arith.constant 0 : index
    %c0_53 = arith.constant 0 : index
    %56 = vector.load %arg7[%c0_52, %c0_53] : memref<1x128xf32, #tpu.memory_space<vmem>>, vector<1x128xf32>
    %c0_54 = arith.constant 0 : index
    %c0_55 = arith.constant 0 : index
    %c0_56 = arith.constant 0 : index
    %57 = vector.load %arg5[%c0_54, %c0_55, %c0_56] : memref<3x128x128xbf16, #tpu.memory_space<vmem>>, vector<1x128x128xbf16>
    %58 = vector.shape_cast %57 : vector<1x128x128xbf16> to vector<128x128xbf16>
    %cst_57 = arith.constant dense<0.000000e+00> : vector<16x128xf32>
    %59 = tpu.matmul %51, %58, %cst_57 {dimension_numbers = #tpu.dot_dimension_numbers<[1], [0], [0], [1], [0, 0, 1, 1], [], []>} : vector<16x128xbf16>, vector<128x128xbf16>, vector<16x128xf32> -> vector<16x128xf32>
    %c1_58 = arith.constant 1 : index
    %c0_59 = arith.constant 0 : index
    %c0_60 = arith.constant 0 : index
    %60 = vector.load %arg5[%c1_58, %c0_59, %c0_60] : memref<3x128x128xbf16, #tpu.memory_space<vmem>>, vector<1x128x128xbf16>
    %61 = vector.shape_cast %60 : vector<1x128x128xbf16> to vector<128x128xbf16>
    %cst_61 = arith.constant dense<0.000000e+00> : vector<16x128xf32>
    %62 = tpu.matmul %53, %61, %cst_61 {dimension_numbers = #tpu.dot_dimension_numbers<[1], [0], [0], [1], [0, 0, 1, 1], [], []>} : vector<16x128xbf16>, vector<128x128xbf16>, vector<16x128xf32> -> vector<16x128xf32>
    %63 = arith.addf %59, %62 : vector<16x128xf32>
    %c2_62 = arith.constant 2 : index
    %c0_63 = arith.constant 0 : index
    %c0_64 = arith.constant 0 : index
    %64 = vector.load %arg5[%c2_62, %c0_63, %c0_64] : memref<3x128x128xbf16, #tpu.memory_space<vmem>>, vector<1x128x128xbf16>
    %65 = vector.shape_cast %64 : vector<1x128x128xbf16> to vector<128x128xbf16>
    %cst_65 = arith.constant dense<0.000000e+00> : vector<16x128xf32>
    %66 = tpu.matmul %55, %65, %cst_65 {dimension_numbers = #tpu.dot_dimension_numbers<[1], [0], [0], [1], [0, 0, 1, 1], [], []>} : vector<16x128xbf16>, vector<128x128xbf16>, vector<16x128xf32> -> vector<16x128xf32>
    %67 = arith.addf %63, %66 : vector<16x128xf32>
    %68 = vector.broadcast %56 : vector<1x128xf32> to vector<16x128xf32>
    %69 = arith.addf %67, %68 : vector<16x128xf32>
    %cst_66 = arith.constant 0.000000e+00 : f32
    %70 = vector.broadcast %cst_66 : f32 to vector<16x128xf32>
    %71 = arith.maximumf %69, %70 : vector<16x128xf32>
    %c0_67 = arith.constant 0 : index
    %c0_68 = arith.constant 0 : index
    %c0_69 = arith.constant 0 : index
    %72 = vector.load %arg6[%c0_67, %c0_68, %c0_69] : memref<3x128x128xbf16, #tpu.memory_space<vmem>>, vector<1x128x128xbf16>
    %73 = vector.shape_cast %72 : vector<1x128x128xbf16> to vector<128x128xbf16>
    %cst_70 = arith.constant dense<0.000000e+00> : vector<16x128xf32>
    %74 = tpu.matmul %51, %73, %cst_70 {dimension_numbers = #tpu.dot_dimension_numbers<[1], [0], [0], [1], [0, 0, 1, 1], [], []>} : vector<16x128xbf16>, vector<128x128xbf16>, vector<16x128xf32> -> vector<16x128xf32>
    %c1_71 = arith.constant 1 : index
    %c0_72 = arith.constant 0 : index
    %c0_73 = arith.constant 0 : index
    %75 = vector.load %arg6[%c1_71, %c0_72, %c0_73] : memref<3x128x128xbf16, #tpu.memory_space<vmem>>, vector<1x128x128xbf16>
    %76 = vector.shape_cast %75 : vector<1x128x128xbf16> to vector<128x128xbf16>
    %cst_74 = arith.constant dense<0.000000e+00> : vector<16x128xf32>
    %77 = tpu.matmul %53, %76, %cst_74 {dimension_numbers = #tpu.dot_dimension_numbers<[1], [0], [0], [1], [0, 0, 1, 1], [], []>} : vector<16x128xbf16>, vector<128x128xbf16>, vector<16x128xf32> -> vector<16x128xf32>
    %78 = arith.addf %74, %77 : vector<16x128xf32>
    %c2_75 = arith.constant 2 : index
    %c0_76 = arith.constant 0 : index
    %c0_77 = arith.constant 0 : index
    %79 = vector.load %arg6[%c2_75, %c0_76, %c0_77] : memref<3x128x128xbf16, #tpu.memory_space<vmem>>, vector<1x128x128xbf16>
    %80 = vector.shape_cast %79 : vector<1x128x128xbf16> to vector<128x128xbf16>
    %cst_78 = arith.constant dense<0.000000e+00> : vector<16x128xf32>
    %81 = tpu.matmul %55, %80, %cst_78 {dimension_numbers = #tpu.dot_dimension_numbers<[1], [0], [0], [1], [0, 0, 1, 1], [], []>} : vector<16x128xbf16>, vector<128x128xbf16>, vector<16x128xf32> -> vector<16x128xf32>
    %82 = arith.addf %78, %81 : vector<16x128xf32>
    %83 = vector.broadcast %56 : vector<1x128xf32> to vector<16x128xf32>
    %84 = arith.addf %82, %83 : vector<16x128xf32>
    %cst_79 = arith.constant 0.000000e+00 : f32
    %85 = vector.broadcast %cst_79 : f32 to vector<16x128xf32>
    %86 = arith.maximumf %84, %85 : vector<16x128xf32>
    %87 = arith.maximumf %71, %86 : vector<16x128xf32>
    %88 = vector.shape_cast %87 : vector<16x128xf32> to vector<8x2x128xf32>
    %cst_80 = arith.constant dense<0xFF800000> : vector<8x128xf32>
    %89 = vector.multi_reduction <maximumf>, %88, %cst_80 [1] : vector<8x2x128xf32> to vector<8x128xf32>
    %cst_81 = arith.constant 0.000000e+00 : f32
    %90 = vector.broadcast %cst_81 : f32 to vector<1x128xf32>
    %c0_82 = arith.constant 0 : index
    %c0_83 = arith.constant 0 : index
    %91 = vector.load %arg22[%c0_82, %c0_83] : memref<10x128xf32, #tpu.memory_space<vmem>>, vector<1x128xf32>
    tpu.vector_store %arg22[%c0_82, %c0_83], %90 {strides = array<i32>} : memref<10x128xf32, #tpu.memory_space<vmem>>, vector<1x128xf32>,
    %c9 = arith.constant 9 : index
    %c0_84 = arith.constant 0 : index
    %92 = vector.load %arg22[%c9, %c0_84] : memref<10x128xf32, #tpu.memory_space<vmem>>, vector<1x128xf32>
    tpu.vector_store %arg22[%c9, %c0_84], %90 {strides = array<i32>} : memref<10x128xf32, #tpu.memory_space<vmem>>, vector<1x128xf32>,
    %c1_85 = arith.constant 1 : index
    %c0_86 = arith.constant 0 : index
    %93 = vector.load %arg22[%c1_85, %c0_86] : memref<10x128xf32, #tpu.memory_space<vmem>>, vector<8x128xf32>
    tpu.vector_store %arg22[%c1_85, %c0_86], %89 {strides = array<i32>} : memref<10x128xf32, #tpu.memory_space<vmem>>, vector<8x128xf32>,
    %c0_87 = arith.constant 0 : index
    %c0_88 = arith.constant 0 : index
    %94 = vector.load %arg22[%c0_87, %c0_88] : memref<10x128xf32, #tpu.memory_space<vmem>>, vector<8x128xf32>
    %95 = arith.truncf %94 : vector<8x128xf32> to vector<8x128xbf16>
    %c1_89 = arith.constant 1 : index
    %c0_90 = arith.constant 0 : index
    %96 = vector.load %arg22[%c1_89, %c0_90] : memref<10x128xf32, #tpu.memory_space<vmem>>, vector<8x128xf32>
    %97 = arith.truncf %96 : vector<8x128xf32> to vector<8x128xbf16>
    %c2_91 = arith.constant 2 : index
    %c0_92 = arith.constant 0 : index
    %98 = vector.load %arg22[%c2_91, %c0_92] : memref<10x128xf32, #tpu.memory_space<vmem>>, vector<8x128xf32>
    %99 = arith.truncf %98 : vector<8x128xf32> to vector<8x128xbf16>
    %c0_93 = arith.constant 0 : index
    %c0_94 = arith.constant 0 : index
    %c0_95 = arith.constant 0 : index
    %100 = vector.load %arg8[%c0_93, %c0_94, %c0_95] : memref<3x128x256xbf16, #tpu.memory_space<vmem>>, vector<1x128x256xbf16>
    %101 = vector.shape_cast %100 : vector<1x128x256xbf16> to vector<128x256xbf16>
    %cst_96 = arith.constant dense<0.000000e+00> : vector<8x256xf32>
    %102 = tpu.matmul %95, %101, %cst_96 {dimension_numbers = #tpu.dot_dimension_numbers<[1], [0], [0], [1], [0, 0, 1, 1], [], []>} : vector<8x128xbf16>, vector<128x256xbf16>, vector<8x256xf32> -> vector<8x256xf32>
    %c1_97 = arith.constant 1 : index
    %c0_98 = arith.constant 0 : index
    %c0_99 = arith.constant 0 : index
    %103 = vector.load %arg8[%c1_97, %c0_98, %c0_99] : memref<3x128x256xbf16, #tpu.memory_space<vmem>>, vector<1x128x256xbf16>
    %104 = vector.shape_cast %103 : vector<1x128x256xbf16> to vector<128x256xbf16>
    %cst_100 = arith.constant dense<0.000000e+00> : vector<8x256xf32>
    %105 = tpu.matmul %97, %104, %cst_100 {dimension_numbers = #tpu.dot_dimension_numbers<[1], [0], [0], [1], [0, 0, 1, 1], [], []>} : vector<8x128xbf16>, vector<128x256xbf16>, vector<8x256xf32> -> vector<8x256xf32>
    %106 = arith.addf %102, %105 : vector<8x256xf32>
    %c2_101 = arith.constant 2 : index
    %c0_102 = arith.constant 0 : index
    %c0_103 = arith.constant 0 : index
    %107 = vector.load %arg8[%c2_101, %c0_102, %c0_103] : memref<3x128x256xbf16, #tpu.memory_space<vmem>>, vector<1x128x256xbf16>
    %108 = vector.shape_cast %107 : vector<1x128x256xbf16> to vector<128x256xbf16>
    %cst_104 = arith.constant dense<0.000000e+00> : vector<8x256xf32>
    %109 = tpu.matmul %99, %108, %cst_104 {dimension_numbers = #tpu.dot_dimension_numbers<[1], [0], [0], [1], [0, 0, 1, 1], [], []>} : vector<8x128xbf16>, vector<128x256xbf16>, vector<8x256xf32> -> vector<8x256xf32>
    %110 = arith.addf %106, %109 : vector<8x256xf32>
    %c0_105 = arith.constant 0 : index
    %c0_106 = arith.constant 0 : index
    %111 = vector.load %arg9[%c0_105, %c0_106] : memref<1x256xf32, #tpu.memory_space<vmem>>, vector<1x256xf32>
    %112 = vector.broadcast %111 : vector<1x256xf32> to vector<8x256xf32>
    %113 = arith.addf %110, %112 : vector<8x256xf32>
    %cst_107 = arith.constant 0.000000e+00 : f32
    %114 = vector.broadcast %cst_107 : f32 to vector<8x256xf32>
    %115 = arith.maximumf %113, %114 : vector<8x256xf32>
    %cst_108 = arith.constant 0.000000e+00 : f32
    %116 = vector.broadcast %cst_108 : f32 to vector<1x256xf32>
    %c0_109 = arith.constant 0 : index
    %c0_110 = arith.constant 0 : index
    %117 = vector.load %arg23[%c0_109, %c0_110] : memref<10x256xf32, #tpu.memory_space<vmem>>, vector<1x256xf32>
    tpu.vector_store %arg23[%c0_109, %c0_110], %116 {strides = array<i32>} : memref<10x256xf32, #tpu.memory_space<vmem>>, vector<1x256xf32>,
    %c9_111 = arith.constant 9 : index
    %c0_112 = arith.constant 0 : index
    %118 = vector.load %arg23[%c9_111, %c0_112] : memref<10x256xf32, #tpu.memory_space<vmem>>, vector<1x256xf32>
    tpu.vector_store %arg23[%c9_111, %c0_112], %116 {strides = array<i32>} : memref<10x256xf32, #tpu.memory_space<vmem>>, vector<1x256xf32>,
    %c1_113 = arith.constant 1 : index
    %c0_114 = arith.constant 0 : index
    %119 = vector.load %arg23[%c1_113, %c0_114] : memref<10x256xf32, #tpu.memory_space<vmem>>, vector<8x256xf32>
    tpu.vector_store %arg23[%c1_113, %c0_114], %115 {strides = array<i32>} : memref<10x256xf32, #tpu.memory_space<vmem>>, vector<8x256xf32>,
    %c0_115 = arith.constant 0 : index
    %c0_116 = arith.constant 0 : index
    %120 = vector.load %arg23[%c0_115, %c0_116] : memref<10x256xf32, #tpu.memory_space<vmem>>, vector<8x256xf32>
    %121 = arith.truncf %120 : vector<8x256xf32> to vector<8x256xbf16>
    %c1_117 = arith.constant 1 : index
    %c0_118 = arith.constant 0 : index
    %122 = vector.load %arg23[%c1_117, %c0_118] : memref<10x256xf32, #tpu.memory_space<vmem>>, vector<8x256xf32>
    %123 = arith.truncf %122 : vector<8x256xf32> to vector<8x256xbf16>
    %c2_119 = arith.constant 2 : index
    %c0_120 = arith.constant 0 : index
    %124 = vector.load %arg23[%c2_119, %c0_120] : memref<10x256xf32, #tpu.memory_space<vmem>>, vector<8x256xf32>
    %125 = arith.truncf %124 : vector<8x256xf32> to vector<8x256xbf16>
    %c0_121 = arith.constant 0 : index
    %c0_122 = arith.constant 0 : index
    %126 = vector.load %arg12[%c0_121, %c0_122] : memref<1x192xf32, #tpu.memory_space<vmem>>, vector<1x192xf32>
    %c0_123 = arith.constant 0 : index
    %c0_124 = arith.constant 0 : index
    %c0_125 = arith.constant 0 : index
    %127 = vector.load %arg10[%c0_123, %c0_124, %c0_125] : memref<3x256x192xbf16, #tpu.memory_space<vmem>>, vector<1x256x192xbf16>
    %128 = vector.shape_cast %127 : vector<1x256x192xbf16> to vector<256x192xbf16>
    %cst_126 = arith.constant dense<0.000000e+00> : vector<8x192xf32>
    %129 = tpu.matmul %121, %128, %cst_126 {dimension_numbers = #tpu.dot_dimension_numbers<[1], [0], [0], [1], [0, 0, 1, 1], [], []>} : vector<8x256xbf16>, vector<256x192xbf16>, vector<8x192xf32> -> vector<8x192xf32>
    %c1_127 = arith.constant 1 : index
    %c0_128 = arith.constant 0 : index
    %c0_129 = arith.constant 0 : index
    %130 = vector.load %arg10[%c1_127, %c0_128, %c0_129] : memref<3x256x192xbf16, #tpu.memory_space<vmem>>, vector<1x256x192xbf16>
    %131 = vector.shape_cast %130 : vector<1x256x192xbf16> to vector<256x192xbf16>
    %cst_130 = arith.constant dense<0.000000e+00> : vector<8x192xf32>
    %132 = tpu.matmul %123, %131, %cst_130 {dimension_numbers = #tpu.dot_dimension_numbers<[1], [0], [0], [1], [0, 0, 1, 1], [], []>} : vector<8x256xbf16>, vector<256x192xbf16>, vector<8x192xf32> -> vector<8x192xf32>
    %133 = arith.addf %129, %132 : vector<8x192xf32>
    %c2_131 = arith.constant 2 : index
    %c0_132 = arith.constant 0 : index
    %c0_133 = arith.constant 0 : index
    %134 = vector.load %arg10[%c2_131, %c0_132, %c0_133] : memref<3x256x192xbf16, #tpu.memory_space<vmem>>, vector<1x256x192xbf16>
    %135 = vector.shape_cast %134 : vector<1x256x192xbf16> to vector<256x192xbf16>
    %cst_134 = arith.constant dense<0.000000e+00> : vector<8x192xf32>
    %136 = tpu.matmul %125, %135, %cst_134 {dimension_numbers = #tpu.dot_dimension_numbers<[1], [0], [0], [1], [0, 0, 1, 1], [], []>} : vector<8x256xbf16>, vector<256x192xbf16>, vector<8x192xf32> -> vector<8x192xf32>
    %137 = arith.addf %133, %136 : vector<8x192xf32>
    %138 = vector.broadcast %126 : vector<1x192xf32> to vector<8x192xf32>
    %139 = arith.addf %137, %138 : vector<8x192xf32>
    %cst_135 = arith.constant 0.000000e+00 : f32
    %140 = vector.broadcast %cst_135 : f32 to vector<8x192xf32>
    %141 = arith.maximumf %139, %140 : vector<8x192xf32>
    %c0_136 = arith.constant 0 : index
    %c0_137 = arith.constant 0 : index
    %c0_138 = arith.constant 0 : index
    %142 = vector.load %arg11[%c0_136, %c0_137, %c0_138] : memref<3x256x192xbf16, #tpu.memory_space<vmem>>, vector<1x256x192xbf16>
    %143 = vector.shape_cast %142 : vector<1x256x192xbf16> to vector<256x192xbf16>
    %cst_139 = arith.constant dense<0.000000e+00> : vector<8x192xf32>
    %144 = tpu.matmul %121, %143, %cst_139 {dimension_numbers = #tpu.dot_dimension_numbers<[1], [0], [0], [1], [0, 0, 1, 1], [], []>} : vector<8x256xbf16>, vector<256x192xbf16>, vector<8x192xf32> -> vector<8x192xf32>
    %c1_140 = arith.constant 1 : index
    %c0_141 = arith.constant 0 : index
    %c0_142 = arith.constant 0 : index
    %145 = vector.load %arg11[%c1_140, %c0_141, %c0_142] : memref<3x256x192xbf16, #tpu.memory_space<vmem>>, vector<1x256x192xbf16>
    %146 = vector.shape_cast %145 : vector<1x256x192xbf16> to vector<256x192xbf16>
    %cst_143 = arith.constant dense<0.000000e+00> : vector<8x192xf32>
    %147 = tpu.matmul %123, %146, %cst_143 {dimension_numbers = #tpu.dot_dimension_numbers<[1], [0], [0], [1], [0, 0, 1, 1], [], []>} : vector<8x256xbf16>, vector<256x192xbf16>, vector<8x192xf32> -> vector<8x192xf32>
    %148 = arith.addf %144, %147 : vector<8x192xf32>
    %c2_144 = arith.constant 2 : index
    %c0_145 = arith.constant 0 : index
    %c0_146 = arith.constant 0 : index
    %149 = vector.load %arg11[%c2_144, %c0_145, %c0_146] : memref<3x256x192xbf16, #tpu.memory_space<vmem>>, vector<1x256x192xbf16>
    %150 = vector.shape_cast %149 : vector<1x256x192xbf16> to vector<256x192xbf16>
    %cst_147 = arith.constant dense<0.000000e+00> : vector<8x192xf32>
    %151 = tpu.matmul %125, %150, %cst_147 {dimension_numbers = #tpu.dot_dimension_numbers<[1], [0], [0], [1], [0, 0, 1, 1], [], []>} : vector<8x256xbf16>, vector<256x192xbf16>, vector<8x192xf32> -> vector<8x192xf32>
    %152 = arith.addf %148, %151 : vector<8x192xf32>
    %153 = vector.broadcast %126 : vector<1x192xf32> to vector<8x192xf32>
    %154 = arith.addf %152, %153 : vector<8x192xf32>
    %cst_148 = arith.constant 0.000000e+00 : f32
    %155 = vector.broadcast %cst_148 : f32 to vector<8x192xf32>
    %156 = arith.maximumf %154, %155 : vector<8x192xf32>
    %157 = arith.maximumf %141, %156 : vector<8x192xf32>
    %158 = vector.shape_cast %157 : vector<8x192xf32> to vector<4x2x192xf32>
    %cst_149 = arith.constant dense<0xFF800000> : vector<4x192xf32>
    %159 = vector.multi_reduction <maximumf>, %158, %cst_149 [1] : vector<4x2x192xf32> to vector<4x192xf32>
    %cst_150 = arith.constant 0.000000e+00 : f32
    %160 = vector.broadcast %cst_150 : f32 to vector<1x192xf32>
    %c0_151 = arith.constant 0 : index
    %c0_152 = arith.constant 0 : index
    %161 = vector.load %arg24[%c0_151, %c0_152] : memref<6x192xf32, #tpu.memory_space<vmem>>, vector<1x192xf32>
    tpu.vector_store %arg24[%c0_151, %c0_152], %160 {strides = array<i32>} : memref<6x192xf32, #tpu.memory_space<vmem>>, vector<1x192xf32>,
    %c5 = arith.constant 5 : index
    %c0_153 = arith.constant 0 : index
    %162 = vector.load %arg24[%c5, %c0_153] : memref<6x192xf32, #tpu.memory_space<vmem>>, vector<1x192xf32>
    tpu.vector_store %arg24[%c5, %c0_153], %160 {strides = array<i32>} : memref<6x192xf32, #tpu.memory_space<vmem>>, vector<1x192xf32>,
    %c1_154 = arith.constant 1 : index
    %c0_155 = arith.constant 0 : index
    %163 = vector.load %arg24[%c1_154, %c0_155] : memref<6x192xf32, #tpu.memory_space<vmem>>, vector<4x192xf32>
    tpu.vector_store %arg24[%c1_154, %c0_155], %159 {strides = array<i32>} : memref<6x192xf32, #tpu.memory_space<vmem>>, vector<4x192xf32>,
    %c0_156 = arith.constant 0 : index
    %c0_157 = arith.constant 0 : index
    %164 = vector.load %arg24[%c0_156, %c0_157] : memref<6x192xf32, #tpu.memory_space<vmem>>, vector<4x192xf32>
    %165 = arith.truncf %164 : vector<4x192xf32> to vector<4x192xbf16>
    %c1_158 = arith.constant 1 : index
    %c0_159 = arith.constant 0 : index
    %166 = vector.load %arg24[%c1_158, %c0_159] : memref<6x192xf32, #tpu.memory_space<vmem>>, vector<4x192xf32>
    %167 = arith.truncf %166 : vector<4x192xf32> to vector<4x192xbf16>
    %c2_160 = arith.constant 2 : index
    %c0_161 = arith.constant 0 : index
    %168 = vector.load %arg24[%c2_160, %c0_161] : memref<6x192xf32, #tpu.memory_space<vmem>>, vector<4x192xf32>
    %169 = arith.truncf %168 : vector<4x192xf32> to vector<4x192xbf16>
    %c0_162 = arith.constant 0 : index
    %c0_163 = arith.constant 0 : index
    %c0_164 = arith.constant 0 : index
    %170 = vector.load %arg13[%c0_162, %c0_163, %c0_164] : memref<3x192x320xbf16, #tpu.memory_space<vmem>>, vector<1x192x320xbf16>
    %171 = vector.shape_cast %170 : vector<1x192x320xbf16> to vector<192x320xbf16>
    %cst_165 = arith.constant dense<0.000000e+00> : vector<4x320xf32>
    %172 = tpu.matmul %165, %171, %cst_165 {dimension_numbers = #tpu.dot_dimension_numbers<[1], [0], [0], [1], [0, 0, 1, 1], [], []>} : vector<4x192xbf16>, vector<192x320xbf16>, vector<4x320xf32> -> vector<4x320xf32>
    %c1_166 = arith.constant 1 : index
    %c0_167 = arith.constant 0 : index
    %c0_168 = arith.constant 0 : index
    %173 = vector.load %arg13[%c1_166, %c0_167, %c0_168] : memref<3x192x320xbf16, #tpu.memory_space<vmem>>, vector<1x192x320xbf16>
    %174 = vector.shape_cast %173 : vector<1x192x320xbf16> to vector<192x320xbf16>
    %cst_169 = arith.constant dense<0.000000e+00> : vector<4x320xf32>
    %175 = tpu.matmul %167, %174, %cst_169 {dimension_numbers = #tpu.dot_dimension_numbers<[1], [0], [0], [1], [0, 0, 1, 1], [], []>} : vector<4x192xbf16>, vector<192x320xbf16>, vector<4x320xf32> -> vector<4x320xf32>
    %176 = arith.addf %172, %175 : vector<4x320xf32>
    %c2_170 = arith.constant 2 : index
    %c0_171 = arith.constant 0 : index
    %c0_172 = arith.constant 0 : index
    %177 = vector.load %arg13[%c2_170, %c0_171, %c0_172] : memref<3x192x320xbf16, #tpu.memory_space<vmem>>, vector<1x192x320xbf16>
    %178 = vector.shape_cast %177 : vector<1x192x320xbf16> to vector<192x320xbf16>
    %cst_173 = arith.constant dense<0.000000e+00> : vector<4x320xf32>
    %179 = tpu.matmul %169, %178, %cst_173 {dimension_numbers = #tpu.dot_dimension_numbers<[1], [0], [0], [1], [0, 0, 1, 1], [], []>} : vector<4x192xbf16>, vector<192x320xbf16>, vector<4x320xf32> -> vector<4x320xf32>
    %180 = arith.addf %176, %179 : vector<4x320xf32>
    %c0_174 = arith.constant 0 : index
    %c0_175 = arith.constant 0 : index
    %181 = vector.load %arg14[%c0_174, %c0_175] : memref<1x320xf32, #tpu.memory_space<vmem>>, vector<1x320xf32>
    %182 = vector.broadcast %181 : vector<1x320xf32> to vector<4x320xf32>
    %183 = arith.addf %180, %182 : vector<4x320xf32>
    %cst_176 = arith.constant 0.000000e+00 : f32
    %184 = vector.broadcast %cst_176 : f32 to vector<4x320xf32>
    %185 = arith.maximumf %183, %184 : vector<4x320xf32>
    %cst_177 = arith.constant 0.000000e+00 : f32
    %186 = vector.broadcast %cst_177 : f32 to vector<1x300xf32>
    %187 = vector.extract_strided_slice %185 {offsets = [0, 0], sizes = [1, 320], strides = [1, 1]} : vector<4x320xf32> to vector<1x320xf32>
    %188 = arith.truncf %187 : vector<1x320xf32> to vector<1x320xbf16>
    %c0_178 = arith.constant 0 : index
    %c0_179 = arith.constant 0 : index
    %c0_180 = arith.constant 0 : index
    %189 = vector.load %arg15[%c0_178, %c0_179, %c0_180] : memref<4x320x300xbf16, #tpu.memory_space<vmem>>, vector<1x320x300xbf16>
    %190 = vector.shape_cast %189 : vector<1x320x300xbf16> to vector<320x300xbf16>
    %cst_181 = arith.constant dense<0.000000e+00> : vector<1x300xf32>
    %191 = tpu.matmul %188, %190, %cst_181 {dimension_numbers = #tpu.dot_dimension_numbers<[1], [0], [0], [1], [0, 0, 1, 1], [], []>} : vector<1x320xbf16>, vector<320x300xbf16>, vector<1x300xf32> -> vector<1x300xf32>
    %192 = arith.addf %186, %191 : vector<1x300xf32>
    %193 = vector.extract_strided_slice %185 {offsets = [1, 0], sizes = [1, 320], strides = [1, 1]} : vector<4x320xf32> to vector<1x320xf32>
    %194 = arith.truncf %193 : vector<1x320xf32> to vector<1x320xbf16>
    %c1_182 = arith.constant 1 : index
    %c0_183 = arith.constant 0 : index
    %c0_184 = arith.constant 0 : index
    %195 = vector.load %arg15[%c1_182, %c0_183, %c0_184] : memref<4x320x300xbf16, #tpu.memory_space<vmem>>, vector<1x320x300xbf16>
    %196 = vector.shape_cast %195 : vector<1x320x300xbf16> to vector<320x300xbf16>
    %cst_185 = arith.constant dense<0.000000e+00> : vector<1x300xf32>
    %197 = tpu.matmul %194, %196, %cst_185 {dimension_numbers = #tpu.dot_dimension_numbers<[1], [0], [0], [1], [0, 0, 1, 1], [], []>} : vector<1x320xbf16>, vector<320x300xbf16>, vector<1x300xf32> -> vector<1x300xf32>
    %198 = arith.addf %192, %197 : vector<1x300xf32>
    %199 = vector.extract_strided_slice %185 {offsets = [2, 0], sizes = [1, 320], strides = [1, 1]} : vector<4x320xf32> to vector<1x320xf32>
    %200 = arith.truncf %199 : vector<1x320xf32> to vector<1x320xbf16>
    %c2_186 = arith.constant 2 : index
    %c0_187 = arith.constant 0 : index
    %c0_188 = arith.constant 0 : index
    %201 = vector.load %arg15[%c2_186, %c0_187, %c0_188] : memref<4x320x300xbf16, #tpu.memory_space<vmem>>, vector<1x320x300xbf16>
    %202 = vector.shape_cast %201 : vector<1x320x300xbf16> to vector<320x300xbf16>
    %cst_189 = arith.constant dense<0.000000e+00> : vector<1x300xf32>
    %203 = tpu.matmul %200, %202, %cst_189 {dimension_numbers = #tpu.dot_dimension_numbers<[1], [0], [0], [1], [0, 0, 1, 1], [], []>} : vector<1x320xbf16>, vector<320x300xbf16>, vector<1x300xf32> -> vector<1x300xf32>
    %204 = arith.addf %198, %203 : vector<1x300xf32>
    %205 = vector.extract_strided_slice %185 {offsets = [3, 0], sizes = [1, 320], strides = [1, 1]} : vector<4x320xf32> to vector<1x320xf32>
    %206 = arith.truncf %205 : vector<1x320xf32> to vector<1x320xbf16>
    %c3 = arith.constant 3 : index
    %c0_190 = arith.constant 0 : index
    %c0_191 = arith.constant 0 : index
    %207 = vector.load %arg15[%c3, %c0_190, %c0_191] : memref<4x320x300xbf16, #tpu.memory_space<vmem>>, vector<1x320x300xbf16>
    %208 = vector.shape_cast %207 : vector<1x320x300xbf16> to vector<320x300xbf16>
    %cst_192 = arith.constant dense<0.000000e+00> : vector<1x300xf32>
    %209 = tpu.matmul %206, %208, %cst_192 {dimension_numbers = #tpu.dot_dimension_numbers<[1], [0], [0], [1], [0, 0, 1, 1], [], []>} : vector<1x320xbf16>, vector<320x300xbf16>, vector<1x300xf32> -> vector<1x300xf32>
    %210 = arith.addf %204, %209 : vector<1x300xf32>
    %c0_193 = arith.constant 0 : index
    %c0_194 = arith.constant 0 : index
    %211 = vector.load %arg16[%c0_193, %c0_194] : memref<1x300xf32, #tpu.memory_space<vmem>>, vector<1x300xf32>
    %212 = arith.addf %210, %211 : vector<1x300xf32>
    %cst_195 = arith.constant 0.000000e+00 : f32
    %213 = vector.broadcast %cst_195 : f32 to vector<1x300xf32>
    %214 = arith.maximumf %212, %213 : vector<1x300xf32>
    %215 = arith.truncf %214 : vector<1x300xf32> to vector<1x300xbf16>
    %c0_196 = arith.constant 0 : index
    %c0_197 = arith.constant 0 : index
    %216 = vector.load %arg17[%c0_196, %c0_197] : memref<300x128xbf16, #tpu.memory_space<vmem>>, vector<300x128xbf16>
    %cst_198 = arith.constant dense<0.000000e+00> : vector<1x128xf32>
    %217 = tpu.matmul %215, %216, %cst_198 {dimension_numbers = #tpu.dot_dimension_numbers<[1], [0], [0], [1], [0, 0, 1, 1], [], []>} : vector<1x300xbf16>, vector<300x128xbf16>, vector<1x128xf32> -> vector<1x128xf32>
    %c0_199 = arith.constant 0 : index
    %c0_200 = arith.constant 0 : index
    %218 = vector.load %arg18[%c0_199, %c0_200] : memref<1x128xf32, #tpu.memory_space<vmem>>, vector<1x128xf32>
    %219 = arith.addf %217, %218 : vector<1x128xf32>
    %c0_201 = arith.constant 0 : index
    %c0_202 = arith.constant 0 : index
    %c0_203 = arith.constant 0 : index
    %220 = vector.load %arg19[%c0_201, %c0_202, %c0_203] : memref<1x1x128xf32, #tpu.memory_space<vmem>>, vector<1x1x128xf32>
    %221 = vector.shape_cast %220 : vector<1x1x128xf32> to vector<1x128xf32>
    %222 = vector.shape_cast %219 : vector<1x128xf32> to vector<1x1x128xf32>
    tpu.vector_store %arg19[%c0_201, %c0_202, %c0_203], %222 {strides = array<i32>} : memref<1x1x128xf32, #tpu.memory_space<vmem>>, vector<1x1x128xf32>,
    return
  }
  func.func @transform_0(%arg0: i32) -> (i32, i32, i32) {
    %c0_i32 = arith.constant 0 : i32
    %c0_i32_0 = arith.constant 0 : i32
    %c0_i32_1 = arith.constant 0 : i32
    return %arg0, %c0_i32, %c0_i32_0 : i32, i32, i32
  }
  func.func @transform_1(%arg0: i32) -> (i32, i32, i32) {
    %c0_i32 = arith.constant 0 : i32
    %c0_i32_0 = arith.constant 0 : i32
    %c0_i32_1 = arith.constant 0 : i32
    %c0_i32_2 = arith.constant 0 : i32
    return %c0_i32, %c0_i32_0, %c0_i32_1 : i32, i32, i32
  }
  func.func @transform_2(%arg0: i32) -> (i32, i32, i32) {
    %c0_i32 = arith.constant 0 : i32
    %c0_i32_0 = arith.constant 0 : i32
    %c0_i32_1 = arith.constant 0 : i32
    %c0_i32_2 = arith.constant 0 : i32
    return %c0_i32, %c0_i32_0, %c0_i32_1 : i32, i32, i32
  }
  func.func @transform_3(%arg0: i32) -> (i32, i32) {
    %c0_i32 = arith.constant 0 : i32
    %c0_i32_0 = arith.constant 0 : i32
    %c0_i32_1 = arith.constant 0 : i32
    return %c0_i32, %c0_i32_0 : i32, i32
  }
  func.func @transform_4(%arg0: i32) -> (i32, i32, i32) {
    %c0_i32 = arith.constant 0 : i32
    %c0_i32_0 = arith.constant 0 : i32
    %c0_i32_1 = arith.constant 0 : i32
    %c0_i32_2 = arith.constant 0 : i32
    return %c0_i32, %c0_i32_0, %c0_i32_1 : i32, i32, i32
  }
  func.func @transform_5(%arg0: i32) -> (i32, i32, i32) {
    %c0_i32 = arith.constant 0 : i32
    %c0_i32_0 = arith.constant 0 : i32
    %c0_i32_1 = arith.constant 0 : i32
    %c0_i32_2 = arith.constant 0 : i32
    return %c0_i32, %c0_i32_0, %c0_i32_1 : i32, i32, i32
  }
  func.func @transform_6(%arg0: i32) -> (i32, i32) {
    %c0_i32 = arith.constant 0 : i32
    %c0_i32_0 = arith.constant 0 : i32
    %c0_i32_1 = arith.constant 0 : i32
    return %c0_i32, %c0_i32_0 : i32, i32
  }
  func.func @transform_7(%arg0: i32) -> (i32, i32, i32) {
    %c0_i32 = arith.constant 0 : i32
    %c0_i32_0 = arith.constant 0 : i32
    %c0_i32_1 = arith.constant 0 : i32
    %c0_i32_2 = arith.constant 0 : i32
    return %c0_i32, %c0_i32_0, %c0_i32_1 : i32, i32, i32
  }
  func.func @transform_8(%arg0: i32) -> (i32, i32) {
    %c0_i32 = arith.constant 0 : i32
    %c0_i32_0 = arith.constant 0 : i32
    %c0_i32_1 = arith.constant 0 : i32
    return %c0_i32, %c0_i32_0 : i32, i32
  }
  func.func @transform_9(%arg0: i32) -> (i32, i32, i32) {
    %c0_i32 = arith.constant 0 : i32
    %c0_i32_0 = arith.constant 0 : i32
    %c0_i32_1 = arith.constant 0 : i32
    %c0_i32_2 = arith.constant 0 : i32
    return %c0_i32, %c0_i32_0, %c0_i32_1 : i32, i32, i32
  }
  func.func @transform_10(%arg0: i32) -> (i32, i32, i32) {
    %c0_i32 = arith.constant 0 : i32
    %c0_i32_0 = arith.constant 0 : i32
    %c0_i32_1 = arith.constant 0 : i32
    %c0_i32_2 = arith.constant 0 : i32
    return %c0_i32, %c0_i32_0, %c0_i32_1 : i32, i32, i32
  }
  func.func @transform_11(%arg0: i32) -> (i32, i32) {
    %c0_i32 = arith.constant 0 : i32
    %c0_i32_0 = arith.constant 0 : i32
    %c0_i32_1 = arith.constant 0 : i32
    return %c0_i32, %c0_i32_0 : i32, i32
  }
  func.func @transform_12(%arg0: i32) -> (i32, i32, i32) {
    %c0_i32 = arith.constant 0 : i32
    %c0_i32_0 = arith.constant 0 : i32
    %c0_i32_1 = arith.constant 0 : i32
    %c0_i32_2 = arith.constant 0 : i32
    return %c0_i32, %c0_i32_0, %c0_i32_1 : i32, i32, i32
  }
  func.func @transform_13(%arg0: i32) -> (i32, i32) {
    %c0_i32 = arith.constant 0 : i32
    %c0_i32_0 = arith.constant 0 : i32
    %c0_i32_1 = arith.constant 0 : i32
    return %c0_i32, %c0_i32_0 : i32, i32
  }
  func.func @transform_14(%arg0: i32) -> (i32, i32, i32) {
    %c0_i32 = arith.constant 0 : i32
    %c0_i32_0 = arith.constant 0 : i32
    %c0_i32_1 = arith.constant 0 : i32
    %c0_i32_2 = arith.constant 0 : i32
    return %c0_i32, %c0_i32_0, %c0_i32_1 : i32, i32, i32
  }
  func.func @transform_15(%arg0: i32) -> (i32, i32) {
    %c0_i32 = arith.constant 0 : i32
    %c0_i32_0 = arith.constant 0 : i32
    %c0_i32_1 = arith.constant 0 : i32
    return %c0_i32, %c0_i32_0 : i32, i32
  }
  func.func @transform_16(%arg0: i32) -> (i32, i32) {
    %c0_i32 = arith.constant 0 : i32
    %c0_i32_0 = arith.constant 0 : i32
    %c0_i32_1 = arith.constant 0 : i32
    return %c0_i32, %c0_i32_0 : i32, i32
  }
  func.func @transform_17(%arg0: i32) -> (i32, i32) {
    %c0_i32 = arith.constant 0 : i32
    %c0_i32_0 = arith.constant 0 : i32
    %c0_i32_1 = arith.constant 0 : i32
    return %c0_i32, %c0_i32_0 : i32, i32
  }
  func.func @transform_18(%arg0: i32) -> (i32, i32, i32) {
    %c0_i32 = arith.constant 0 : i32
    %c0_i32_0 = arith.constant 0 : i32
    %c0_i32_1 = arith.constant 0 : i32
    return %arg0, %c0_i32, %c0_i32_0 : i32, i32, i32
  }
}

</mosaic_0001>

<bundles_post_ra>
// kernel: net_forward.1
= control target key start
LH: loop header
LB: loop body
LE: loop exit
PB: predicated region body
PF: predicated region fallthrough
CT: control target
= control target key end

     0   :  { %s13559_s0 = inlined_call_operand.vmem [shape: f32[2,32,96], index: 0, kind: input, shape index: {}]   ;;  %s13560_s1 = inlined_call_operand.vmem [shape: bf16[3,96,128], index: 1, kind: input, shape index: {}]   ;;  %s13561_s2 = inlined_call_operand.vmem [shape: bf16[3,96,128], index: 2, kind: input, shape index: {}]   ;;  %s13562_s3 = inlined_call_operand.vmem [shape: f32[1,128], index: 3, kind: input, shape index: {}]   ;;  %s13563_s4 = inlined_call_operand.vmem [shape: bf16[3,128,128], index: 4, kind: input, shape index: {}]   ;;  %s13564_s5 = inlined_call_operand.vmem [shape: bf16[3,128,128], index: 5, kind: input, shape index: {}]   ;;  %s13565_s6 = inlined_call_operand.vmem [shape: f32[1,128], index: 6, kind: input, shape index: {}]   ;;  %s13566_s7 = inlined_call_operand.vmem [shape: bf16[3,128,256], index: 7, kind: input, shape index: {}]   ;;  %s13567_s8 = inlined_call_operand.vmem [shape: f32[1,256], index: 8, kind: input, shape index: {}]   ;;  %s13568_s9 = inlined_call_operand.vmem [shape: bf16[3,256,192], index: 9, kind: input, shape index: {}]   ;;  %s13569_s10 = inlined_call_operand.vmem [shape: bf16[3,256,192], index: 10, kind: input, shape index: {}]   ;;  %s13570_s11 = inlined_call_operand.vmem [shape: f32[1,192], index: 11, kind: input, shape index: {}]   ;;  %s13571_s12 = inlined_call_operand.vmem [shape: bf16[3,192,320], index: 12, kind: input, shape index: {}]   ;;  %s13572_s13 = inlined_call_operand.vmem [shape: f32[1,320], index: 13, kind: input, shape index: {}]   ;;  %s13573_s14 = inlined_call_operand.vmem [shape: bf16[4,320,300], index: 14, kind: input, shape index: {}]   ;;  %s13574_s15 = inlined_call_operand.vmem [shape: f32[1,300], index: 15, kind: input, shape index: {}]   ;;  %s13575_s16 = inlined_call_operand.vmem [shape: bf16[300,128], index: 16, kind: input, shape index: {}]   ;;  %s13576_s17 = inlined_call_operand.vmem [shape: f32[1,128], index: 17, kind: input, shape index: {}]   ;;  %s13577_s18 = inlined_call_operand.hbm [shape: f32[2,1,128], index: 18, kind: output, shape index: {}]  }
   0x1   :  { %13587 = sst [smem:[#allocation16_spill]] %s13559_s0 }
   0x2   :  { %13588 = sst [smem:[#allocation17_spill]] %s13560_s1 }
   0x3   :  { %13589 = sst [smem:[#allocation18_spill]] %s13561_s2 }
   0x4   :  { %13590 = sst [smem:[#allocation19_spill]] %s13577_s18 }
   0x5   :  { %23 = vsyncpa [#allocation8], 0 }
   0x6   :  { %25 = vsyncpa [#allocation8 + $0x1], 0  ;;  %s10996_s27 = smov 0   ;;  %s10998_s28 = smov 0  }
   0x7   :  { %s11000_s29 = smov 0   ;;  %s11002_s30 = smov 0  }
   0x8 LB: > { %13591 = sst [smem:[#allocation10_spill]] %s10882_s27  ;;  %s11017_s0 = sadd.s32 4294967295, %s10894_s30   ;;  %s10894_s30 = sphi %s11002_s30, %s13606_s30   ;;  %s10890_s29 = sphi %s11000_s29, %s13608_s29   ;;  %s10886_s28 = sphi %s10998_s28, %s13610_s28   ;;  %s10882_s27 = sphi %s10996_s27, %s13609_s27  }
   0x9   : > { %13592 = sst [smem:[#allocation11_spill]] %s10890_s29  ;;  %s7998_s19 = sadd.s32 4294967294, %s10894_s30  }
   0xa   : > { %13593 = sst [smem:[#allocation12_spill]] %s10894_s30  ;;  %s11021_s1 = sadd.s32 1, %s10894_s30  }
   0xb   : > { %13594 = sst [smem:[#allocation13_spill]] %s11021_s1  ;;  %s421_s20 = sadd.s32 1, %s10890_s29 }
   0xc   : > { %s418_s21 = ssub.s32 %s10894_s30, %s11021_s1  ;;  %p431_p0 = scmp.ne.s32.totalorder %s10890_s29, %s10886_s28 }
   0xd   : > { %p419_p1 = scmp.eq.s32.totalorder %s418_s21, 0  ;;  %p432_p2 = scmp.eq.s32.totalorder %s11017_s0, 1 }
   0xe   : > { %p437_p3 = scmp.ne.s32.totalorder %s10886_s28, %s10882_s27  ;;  %p438_p4 = scmp.eq.s32.totalorder %s7998_s19, 1 }
   0xf   : > { %s11032_s22 = scalar_select %p419_p1, %s10890_s29, %s421_s20  }
  0x10   : > { %p11034_p5 = por %p432_p2, %p431_p0  ;;  %p11038_p6 = por %p438_p4, %p437_p3 }
  0x11   : > { %13595 = sst [smem:[#allocation14_spill]] %s11032_s22  ;;  %p8001_p7 = scmp.ge.s32.totalorder %s10894_s30, 1 }
  0x12   : > { %s13597_s23 = scalar_select %p11038_p6, 1, 0 }
  0x13   : > { %p515_p8 = scmp.lt.s32.totalorder %s10894_s30, 3 }
  0x14   : > { %13598 = sst [smem:[#allocation15_spill]] %s13597_s23 }
  0x15   : > { %p516_p9 = pnand %p8001_p7, %p515_p8 }
  0x16   : > { %s13599_s26 = sld [smem:[#allocation17_spill]] (!%p516_p9)  ;;  %p568_p10 = scmp.lt.s32.totalorder (!%p516_p9), %s11017_s0, 1  ;;  %vm578_vm0 = vcmask (!%p516_p9), 778240   ;;  %v10896_v6 = vmov (!%p516_p9), 0.0   ;;  %vm581_vm1 = vcmask (!%p516_p9), 785408   ;;  %v9941_v59 = vld [vmem:[%s13563_s4 + $0x40] sm:$0xff] (!%p516_p9)  }
  0x17   : > { %519 = sbr.rel (%p516_p9) target bundleno = 2345 (0x929), region = 92  ;;  %s13600_s21 = sld [smem:[#allocation18_spill]] (!%p516_p9)  ;;  %579 = vst.msk [vmem:[#allocation2] sm:$0x1] (!%p516_p9), %vm578_vm0, %v10896_v6  ;;  %580 = vst.msk [vmem:[#allocation2 + $0x21] sm:$0x1] (!%p516_p9), %vm578_vm0, %v10896_v6 }
  0x18   : > { %1444 = vst [vmem:[#allocation3] sm:$0x1] (!%p516_p9), %v10896_v6  ;;  %1445 = vst [vmem:[#allocation3 + $0x11] sm:$0x1] (!%p516_p9), %v10896_v6  ;;  %s13601_s19 = sld [smem:[#allocation16_spill]] (!%p516_p9)  ;;  %v9943_v60 = vld [vmem:[%s13563_s4 + $0x48] sm:$0xff] (!%p516_p9)  }
  0x19   : > { %2251 = vst [vmem:[#allocation4] sm:$0x1] (!%p516_p9), %v10896_v6  ;;  %2252 = vst [vmem:[#allocation4 + $0x9] sm:$0x1] (!%p516_p9), %v10896_v6  ;;  %v9942_v61 = vld [vmem:[%s13563_s4] sm:$0xff] (!%p516_p9)   ;;  %v9945_v62 = vld [vmem:[%s13563_s4 + $0x50] sm:$0xff] (!%p516_p9)  }
  0x1a   : > { %v9944_v63 = vld [vmem:[%s13563_s4 + $0x8] sm:$0xff] (!%p516_p9)   ;;  %vm10897_vm2 = vmmov (!%p516_p9), 0   ;;  %vm1331_vm3 = vcmask (!%p516_p9), 1041408   ;;  %vm1462_vm4 = vcmask (!%p516_p9), 1041409   ;;  %vm1464_vm5 = vcmask (!%p516_p9), 1042434   ;;  %s566_s22 = sand.u32 (!%p516_p9), 1, %s10886_s28  }
  0x1b   : > { %vm1466_vm6 = vcmask (!%p516_p9), 1043459   ;;  %vm1468_vm7 = vcmask (!%p516_p9), 1044484   ;;  %vm1470_vm8 = vcmask (!%p516_p9), 1045509   ;;  %vm1472_vm9 = vcmask (!%p516_p9), 1046534   ;;  %s10900_s18 = smov (!%p516_p9), [#allocation7]  }
  0x1c   : > { %v9905_v0 = vld [vmem:[%s13599_s26 + $0x30] sm:$0xff] (!%p516_p9)   ;;  %v9907_v2 = vld [vmem:[%s13599_s26 + $0x38] sm:$0xff] (!%p516_p9)   ;;  %v9909_v4 = vld [vmem:[%s13599_s26 + $0x40] sm:$0xff] (!%p516_p9)   ;;  %vm1474_vm10 = vcmask (!%p516_p9), 1047559   ;;  %vm4259_vm13 = vcmask (!%p516_p9), 517120   ;;  %vm4333_vm14 = vcmask (!%p516_p9), 520193  }
  0x1d   : > { %v9906_v1 = vld [vmem:[%s13600_s21 + $0x30] sm:$0xff] (!%p516_p9)   ;;  %9572 = vmatprep.subr.bf16.mxu0 (!%p516_p9), %v9905_v0  ;;  %v9908_v3 = vld [vmem:[%s13600_s21 + $0x38] sm:$0xff] (!%p516_p9)   ;;  %v9910_v5 = vld [vmem:[%s13600_s21 + $0x40] sm:$0xff] (!%p516_p9)   ;;  %vm4651_vm15 = vcmask (!%p516_p9), 523264   ;;  %vm7845_vm0 = vcmask (!%p516_p9), 1045504   ;;  %s10836_s30 = sshll.u32 (!%p516_p9), %s10900_s18, 4  ;;  %s10837_s30 = int_to_ptr.vmem [resolvable:$false] %s10836_s30 }
  0x1e   : > { %s569_s1 = scalar_select %p568_p10, %s11017_s0, 1  ;;  %9620 = vmatprep.subr.bf16.mxu1 %v9906_v1  ;;  %9573 = vmatpush3.bf16.msra.mxu0 %v9905_v0  ;;  %v9911_v7 = vld [vmem:[%s13599_s26 + $0x48] sm:$0xff]   ;;  %v9913_v9 = vld [vmem:[%s13599_s26 + $0x50] sm:$0xff]   ;;  %v9915_v15 = vld [vmem:[%s13599_s26 + $0x58] sm:$0xff]  }
  0x1f   : > { %9621 = vmatpush3.bf16.msra.mxu1 %v9906_v1  ;;  %9574 = vmatprep.subr.bf16.mxu0 %v9907_v2  ;;  %v9912_v8 = vld [vmem:[%s13600_s21 + $0x48] sm:$0xff]   ;;  %v9914_v12 = vld [vmem:[%s13600_s21 + $0x50] sm:$0xff]   ;;  %v9916_v16 = vld [vmem:[%s13600_s21 + $0x58] sm:$0xff]   ;;  %s10838_s24 = scalar_lea.vmem %s10837_s30, 32 }
  0x20   : > { %9622 = vmatprep.subr.bf16.mxu1 %v9908_v3  ;;  %s9335_s29 = sshll.u32 %s569_s1, 5  ;;  %v9917_v19 = vld [vmem:[%s13599_s26] sm:$0xff]   ;;  %v9919_v25 = vld [vmem:[%s13599_s26 + $0x8] sm:$0xff]   ;;  %v9921_v29 = vld [vmem:[%s13599_s26 + $0x10] sm:$0xff]   ;;  %s567_s1 = scalar_lea.vmem [#allocation7], %s566_s22 }
  0x21   : > { %s572_s20 = scalar_lea.vmem %s13601_s19, %s9335_s29  ;;  %v9918_v21 = vld [vmem:[%s13600_s21] sm:$0xff]   ;;  %v9920_v26 = vld [vmem:[%s13600_s21 + $0x8] sm:$0xff]   ;;  %v9922_v31 = vld [vmem:[%s13600_s21 + $0x10] sm:$0xff]   ;;  %s9332_s29 = sshll.u32 %s11017_s0, 4 }
  0x22   : > { %9575 = vmatpush3.bf16.msra.mxu0 %v9907_v2  ;;  %v574_v10 = vld [vmem:[%s572_s20] sm:$0xff]  ;;  %v575_v11 = vld [vmem:[%s572_s20 + $0x8] sm:$0xff]  ;;  %v576_v13 = vld [vmem:[%s572_s20 + $0x10] sm:$0xff]  ;;  %s7943_s23 = sshll.u32 %s567_s1, 4  ;;  %s13602_s19 = sld [smem:[#allocation19_spill]]  ;;  %s13519_s23 = int_to_ptr.vmem [resolvable:$true] %s7943_s23 }
  0x23   : > { %9623 = vmatpush3.bf16.msra.mxu1 %v9908_v3  ;;  %9576 = vmatprep.subr.bf16.mxu0 %v9909_v4  ;;  %582 = vst.msk [vmem:[#allocation2 + $0x1] sm:$0xff] %vm581_vm1, %v574_v10  ;;  %583 = vst.msk [vmem:[#allocation2 + $0x9] sm:$0xff] %vm581_vm1, %v575_v11  ;;  %v577_v14 = vld [vmem:[%s572_s20 + $0x18] sm:$0xff]  ;;  %v9925_v34 = vld [vmem:[%s13599_s26 + $0x20] sm:$0xff]   ;;  %s7931_s0 = scalar_lea.sflag [#allocation8], %s566_s22  ;;  %s10832_s27 = scalar_lea.vmem %s13519_s23, 16 }
  0x24   : > { %9624 = vmatprep.subr.bf16.mxu1 %v9910_v5  ;;  %584 = vst.msk [vmem:[#allocation2 + $0x11] sm:$0xff] %vm581_vm1, %v576_v13  ;;  %585 = vst.msk [vmem:[#allocation2 + $0x19] sm:$0xff] %vm581_vm1, %v577_v14  ;;  %v9923_v32 = vld [vmem:[%s13599_s26 + $0x18] sm:$0xff]   ;;  %v9926_v35 = vld [vmem:[%s13600_s21 + $0x20] sm:$0xff]   ;;  %v1251_v14 = vlaneseq  ;;  %p10833_p11 = scmp.ne.s32.totalorder %s13519_s23, %s10832_s27  ;;  %p10839_p0 = scmp.lt.s32.totalorder %s13519_s23, %s10837_s30 }
  0x25   : > { %v9924_v33 = vld [vmem:[%s13600_s21 + $0x18] sm:$0xff]   ;;  %v9927_v36 = vld [vmem:[%s13599_s26 + $0x28] sm:$0xff]   ;;  %v9929_v40 = vld [vmem:[%s13599_s26 + $0x60] sm:$0xff]   ;;  %p10840_p1 = scmp.lt.s32.totalorder %s10838_s24, %s10832_s27 }
  0x26   : > { %9577 = vmatpush3.bf16.msra.mxu0 %v9909_v4  ;;  %v9928_v37 = vld [vmem:[%s13600_s21 + $0x28] sm:$0xff]   ;;  %v9930_v41 = vld [vmem:[%s13600_s21 + $0x60] sm:$0xff]   ;;  %v9933_v48 = vld [vmem:[%s13599_s26 + $0x70] sm:$0xff]   ;;  %vm2709_vm11 = vcmp.lt.s32.totalorder %v1251_v14, 256  ;;  %vm4309_vm12 = vcmp.lt.s32.totalorder %v1251_v14, 192  ;;  %p10834_p12 = pnand %p10833_p11, %p11034_p5 }
  0x27   : > { %9625 = vmatpush3.bf16.msra.mxu1 %v9910_v5  ;;  %9578 = vmatprep.subr.bf16.mxu0 %v9911_v7  ;;  %v9931_v45 = vld [vmem:[%s13599_s26 + $0x68] sm:$0xff]   ;;  %v9934_v49 = vld [vmem:[%s13600_s21 + $0x70] sm:$0xff]   ;;  %v9935_v50 = vld [vmem:[%s13599_s26 + $0x78] sm:$0xff]   ;;  %2711 = vst.msk [vmem:[#allocation5] ss:$8 sm:$0x3] %vm2709_vm11, %v10896_v6  ;;  %p10841_p2 = por %p10840_p1, %p10839_p0 }
  0x28   : > { %9626 = vmatprep.subr.bf16.mxu1 %v9912_v8  ;;  %v9932_v46 = vld [vmem:[%s13600_s21 + $0x68] sm:$0xff]   ;;  %v9936_v51 = vld [vmem:[%s13600_s21 + $0x78] sm:$0xff]   ;;  %v9937_v52 = vld [vmem:[%s13599_s26 + $0x80] sm:$0xff]   ;;  %2714 = vst.msk [vmem:[#allocation5 + $0x11] ss:$8 sm:$0x3] %vm2709_vm11, %v10896_v6  ;;  %s13517_s20 = scalar_lea.hbm %s13602_s19, %s9332_s29  ;;  %p10835_p13 = pneg %p10834_p12 }
  0x29   : > { %v9938_v53 = vld [vmem:[%s13600_s21 + $0x80] sm:$0xff]   ;;  %v9939_v54 = vld [vmem:[%s13599_s26 + $0x88] sm:$0xff]   ;;  %v9947_v0 = vld [vmem:[%s13563_s4 + $0x58] sm:$0xff]   ;;  %4311 = vst.msk [vmem:[#allocation6] ss:$8 sm:$0x3] %vm4309_vm12, %v10896_v6 }
  0x2a   : > { %9579 = vmatpush3.bf16.msra.mxu0 %v9911_v7  ;;  %v592_v17 = vld [vmem:[#allocation2 + $0x1] sm:$0xff]  ;;  %v593_v18 = vld [vmem:[#allocation2 + $0x9] sm:$0xff]  ;;  %v9948_v3 = vld [vmem:[%s13563_s4 + $0x18] sm:$0xff]   ;;  %4314 = vst.msk [vmem:[#allocation6 + $0x5] ss:$8 sm:$0x3] %vm4309_vm12, %v10896_v6  ;;  %p10842_p3 = pnand %p10841_p2, %p10835_p13 }
  0x2b   : > { %9627 = vmatpush3.bf16.msra.mxu1 %v9912_v8  ;;  %9580 = vmatprep.subr.bf16.mxu0 %v9913_v9  ;;  %v596_v20 = vpack.c.bf16 %v593_v18, %v592_v17  ;;  %v594_v22 = vld [vmem:[#allocation2 + $0x11] sm:$0xff]  ;;  %v595_v23 = vld [vmem:[#allocation2 + $0x19] sm:$0xff]  ;;  %v587_v28 = vld [vmem:[#allocation2 + $0x8] sm:$0xff]  ;;  %v11253_v17 = vshrl.u32 %v1251_v14, 7 }
  0x2c   : > { %9628 = vmatprep.subr.bf16.mxu1 %v9914_v12  ;;  %v597_v24 = vpack.c.bf16 %v595_v23, %v594_v22  ;;  %v586_v27 = vld [vmem:[#allocation2] sm:$0xff]  ;;  %v588_v38 = vld [vmem:[#allocation2 + $0x10] sm:$0xff]  ;;  %v589_v39 = vld [vmem:[#allocation2 + $0x18] sm:$0xff] }
  0x2d   : > { %9584 = vmatprep.mubr.msk.bf16.mxu0 %vm581_vm1, %v596_v20  ;;  %9632 = vmatprep.mubr.msk.bf16.mxu1 %vm581_vm1, %v596_v20  ;;  %v590_v30 = vpack.c.bf16 %v587_v28, %v586_v27  ;;  %v598_v42 = vld [vmem:[#allocation2 + $0x2] sm:$0xff]  ;;  %v599_v43 = vld [vmem:[#allocation2 + $0xa] sm:$0xff]  ;;  %v591_v44 = vpack.c.bf16 %v589_v39, %v588_v38  ;;  %v600_v56 = vld [vmem:[#allocation2 + $0x12] sm:$0xff] }
  0x2e   : > { %9581 = vmatpush3.bf16.msra.mxu0 %v9913_v9  ;;  %v602_v47 = vpack.c.bf16 %v599_v43, %v598_v42  ;;  %v9940_v55 = vld [vmem:[%s13600_s21 + $0x88] sm:$0xff]   ;;  %v601_v57 = vld [vmem:[#allocation2 + $0x1a] sm:$0xff]  ;;  %v9946_v1 = vld [vmem:[%s13563_s4 + $0x10] sm:$0xff]  }
  0x2f   : > { %9629 = vmatpush3.bf16.msra.mxu1 %v9914_v12  ;;  %9582 = vmatprep.subr.bf16.mxu0 %v9915_v15  ;;  %v603_v58 = vpack.c.bf16 %v601_v57, %v600_v56  ;;  %v9949_v2 = vld [vmem:[%s13563_s4 + $0x60] sm:$0xff]   ;;  %v9951_v4 = vld [vmem:[%s13563_s4 + $0x68] sm:$0xff]   ;;  %v9953_v7 = vld [vmem:[%s13563_s4 + $0x70] sm:$0xff]   ;;  %v10898_v12 = vmov 1983009808  }
  0x30   : > { %9630 = vmatprep.subr.bf16.mxu1 %v9916_v16  ;;  %v9950_v5 = vld [vmem:[%s13563_s4 + $0x20] sm:$0xff]   ;;  %v9952_v8 = vld [vmem:[%s13563_s4 + $0x28] sm:$0xff]   ;;  %v9955_v9 = vld [vmem:[%s13563_s4 + $0x78] sm:$0xff]   ;;  %v1249_v13 = vunpack.c.l.s4 %v10898_v12 }
  0x31   : > { %v9954_v10 = vld [vmem:[%s13563_s4 + $0x30] sm:$0xff]   ;;  %v9956_v11 = vld [vmem:[%s13563_s4 + $0x38] sm:$0xff]  }
  0x32   : > { %9583 = vmatpush3.bf16.msra.mxu0 %v9915_v15  ;;  %v8052_v15 = vld [vmem:[%s13562_s3] ss:$0 sm:$0xff]  ;;  %v10387_v14 = vld [vmem:[%s13571_s12 + $0x1fc] ss:$12 sps:$4 sm:$0xff]  }
  0x33   : > { %9631 = vmatpush3.bf16.msra.mxu1 %v9916_v16  ;;  %9588 = vmatprep.subr.bf16.mxu0 %v9917_v19  ;;  %v1250_v16 = vunpack.c.0.s8 %v1249_v13 }
  0x34   : > { %9636 = vmatprep.subr.bf16.mxu1 %v9918_v21 }
  0x35   : > { %9585 = vmatmul.mubr.msk.bf16.vlgmr.msra.gmra.mrb[0].mxu0 %vm581_vm1, %v597_v24  ;;  %v11256_v27 = vsub.s32 %v1250_v16, %v11253_v17 }
  0x36   : > { %9589 = vmatpush3.bf16.msra.mxu0 %v9917_v19  ;;  %9633 = vmatmul.mubr.msk.bf16.vlgmr.msra.gmra.mrb[0].mxu1 %vm581_vm1, %v597_v24 }
  0x37   : > { %9637 = vmatpush3.bf16.msra.mxu1 %v9918_v21  ;;  %9590 = vmatprep.subr.bf16.mxu0 %v9919_v25 }
  0x38   : > { %9638 = vmatprep.subr.bf16.mxu1 %v9920_v26  ;;  %9600 = vmatprep.mubr.msk.bf16.mxu0 %vm581_vm1, %v590_v30 }
  0x39   : > { %9648 = vmatprep.mubr.msk.bf16.mxu1 %vm581_vm1, %v590_v30 }
  0x3a   : > { %9591 = vmatpush3.bf16.msra.mxu0 %v9919_v25 }
  0x3b   : > { %9639 = vmatpush3.bf16.msra.mxu1 %v9920_v26  ;;  %9592 = vmatprep.subr.bf16.mxu0 %v9921_v29 }
  0x3c   : > { %9640 = vmatprep.subr.bf16.mxu1 %v9922_v31 }
  0x3e   : > { %9593 = vmatpush3.bf16.msra.mxu0 %v9921_v29 }
  0x3f   : > { %9641 = vmatpush3.bf16.msra.mxu1 %v9922_v31  ;;  %9594 = vmatprep.subr.bf16.mxu0 %v9923_v32 }
  0x40   : > { %9642 = vmatprep.subr.bf16.mxu1 %v9924_v33 }
  0x42   : > { %9595 = vmatpush3.bf16.msra.mxu0 %v9923_v32 }
  0x43   : > { %9643 = vmatpush3.bf16.msra.mxu1 %v9924_v33  ;;  %9596 = vmatprep.subr.bf16.mxu0 %v9925_v34 }
  0x44   : > { %9644 = vmatprep.subr.bf16.mxu1 %v9926_v35 }
  0x46   : > { %9597 = vmatpush3.bf16.msra.mxu0 %v9925_v34 }
  0x47   : > { %9645 = vmatpush3.bf16.msra.mxu1 %v9926_v35  ;;  %9598 = vmatprep.subr.bf16.mxu0 %v9927_v36 }
  0x48   : > { %9646 = vmatprep.subr.bf16.mxu1 %v9928_v37 }
  0x4a   : > { %9599 = vmatpush3.bf16.msra.mxu0 %v9927_v36 }
  0x4b   : > { %9647 = vmatpush3.bf16.msra.mxu1 %v9928_v37  ;;  %9604 = vmatprep.subr.bf16.mxu0 %v9929_v40 }
  0x4c   : > { %9652 = vmatprep.subr.bf16.mxu1 %v9930_v41 }
  0x4d   : > { %9601 = vmatmul.mubr.msk.bf16.vlgmr.msra.gmra.mrb[0].mxu0 %vm581_vm1, %v591_v44 }
  0x4e   : > { %9605 = vmatpush3.bf16.msra.mxu0 %v9929_v40  ;;  %9649 = vmatmul.mubr.msk.bf16.vlgmr.msra.gmra.mrb[0].mxu1 %vm581_vm1, %v591_v44 }
  0x4f   : > { %9653 = vmatpush3.bf16.msra.mxu1 %v9930_v41  ;;  %9606 = vmatprep.subr.bf16.mxu0 %v9931_v45 }
  0x50   : > { %9654 = vmatprep.subr.bf16.mxu1 %v9932_v46  ;;  %9616 = vmatprep.mubr.msk.bf16.mxu0 %vm581_vm1, %v602_v47 }
  0x51   : > { %9664 = vmatprep.mubr.msk.bf16.mxu1 %vm581_vm1, %v602_v47 }
  0x52   : > { %9607 = vmatpush3.bf16.msra.mxu0 %v9931_v45 }
  0x53   : > { %9655 = vmatpush3.bf16.msra.mxu1 %v9932_v46  ;;  %9608 = vmatprep.subr.bf16.mxu0 %v9933_v48 }
  0x54   : > { %9656 = vmatprep.subr.bf16.mxu1 %v9934_v49 }
  0x56   : > { %9609 = vmatpush3.bf16.msra.mxu0 %v9933_v48 }
  0x57   : > { %9657 = vmatpush3.bf16.msra.mxu1 %v9934_v49  ;;  %9610 = vmatprep.subr.bf16.mxu0 %v9935_v50 }
  0x58   : > { %9658 = vmatprep.subr.bf16.mxu1 %v9936_v51 }
  0x5a   : > { %9611 = vmatpush3.bf16.msra.mxu0 %v9935_v50 }
  0x5b   : > { %9659 = vmatpush3.bf16.msra.mxu1 %v9936_v51  ;;  %9612 = vmatprep.subr.bf16.mxu0 %v9937_v52 }
  0x5c   : > { %9660 = vmatprep.subr.bf16.mxu1 %v9938_v53 }
  0x5e   : > { %9613 = vmatpush3.bf16.msra.mxu0 %v9937_v52 }
  0x5f   : > { %9661 = vmatpush3.bf16.msra.mxu1 %v9938_v53  ;;  %9614 = vmatprep.subr.bf16.mxu0 %v9939_v54 }
  0x60   : > { %9662 = vmatprep.subr.bf16.mxu1 %v9940_v55 }
  0x62   : > { %9615 = vmatpush3.bf16.msra.mxu0 %v9939_v54 }
  0x63   : > { %9663 = vmatpush3.bf16.msra.mxu1 %v9940_v55  ;;  %9668 = vmatprep.subr.bf16.mxu0 %v10896_v6 }
  0x64   : > { %9688 = vmatprep.subr.bf16.mxu1 %v10896_v6 }
  0x65   : > { %9617 = vmatmul.mubr.msk.bf16.vlgmr.msra.gmra.mrb[0].mxu0 %vm581_vm1, %v603_v58 }
  0x66   : > { %9665 = vmatmul.mubr.msk.bf16.vlgmr.msra.gmra.mrb[0].mxu1 %vm581_vm1, %v603_v58  ;;  %9669 = vmatpush3.bf16.msra.mxu0 %v9941_v59  ;;  %vm7841_vm1 = vcmask 359424  }
  0x67   : > { %9670 = vmatprep.subr.bf16.mxu0 %v10896_v6  ;;  %9689 = vmatpush3.bf16.msra.mxu1 %v9942_v61 }
  0x68   : > { %9690 = vmatprep.subr.bf16.mxu1 %v10896_v6  ;;  %9684 = vmatprep.mubr.msk.bf16.mxu0 %vm10897_vm2, %v10896_v6 }
  0x69   : > { %9704 = vmatprep.mubr.msk.bf16.mxu1 %vm10897_vm2, %v10896_v6 }
  0x6a   : > { %9671 = vmatpush3.bf16.msra.mxu0 %v9943_v60 }
  0x6b   : > { %9672 = vmatprep.subr.bf16.mxu0 %v10896_v6  ;;  %9691 = vmatpush3.bf16.msra.mxu1 %v9944_v63 }
  0x6c   : > { %9692 = vmatprep.subr.bf16.mxu1 %v10896_v6 }
  0x6e   : > { %9673 = vmatpush3.bf16.msra.mxu0 %v9945_v62 }
  0x6f   : > { %9674 = vmatprep.subr.bf16.mxu0 %v10896_v6  ;;  %9693 = vmatpush3.bf16.msra.mxu1 %v9946_v1 }
  0x70   : > { %9694 = vmatprep.subr.bf16.mxu1 %v10896_v6 }
  0x72   : > { %9675 = vmatpush3.bf16.msra.mxu0 %v9947_v0 }
  0x73   : > { %9676 = vmatprep.subr.bf16.mxu0 %v10896_v6  ;;  %9695 = vmatpush3.bf16.msra.mxu1 %v9948_v3 }
  0x74   : > { %9696 = vmatprep.subr.bf16.mxu1 %v10896_v6 }
  0x76   : > { %9677 = vmatpush3.bf16.msra.mxu0 %v9949_v2 }
  0x77   : > { %9678 = vmatprep.subr.bf16.mxu0 %v10896_v6  ;;  %9697 = vmatpush3.bf16.msra.mxu1 %v9950_v5 }
  0x78   : > { %9698 = vmatprep.subr.bf16.mxu1 %v10896_v6 }
  0x7a   : > { %9679 = vmatpush3.bf16.msra.mxu0 %v9951_v4 }
  0x7b   : > { %9680 = vmatprep.subr.bf16.mxu0 %v10896_v6  ;;  %9699 = vmatpush3.bf16.msra.mxu1 %v9952_v8 }
  0x7c   : > { %9700 = vmatprep.subr.bf16.mxu1 %v10896_v6 }
  0x7e   : > { %9681 = vmatpush3.bf16.msra.mxu0 %v9953_v7 }
  0x7f   : > { %9682 = vmatprep.subr.bf16.mxu0 %v10896_v6  ;;  %9701 = vmatpush3.bf16.msra.mxu1 %v9954_v10 }
  0x80   : > { %9702 = vmatprep.subr.bf16.mxu1 %v10896_v6 }
  0x82   : > { %9683 = vmatpush3.bf16.msra.mxu0 %v9955_v9 }
  0x83   : > { %9708 = vmatprep.subr.bf16.mxu0 %v10896_v6  ;;  %9703 = vmatpush3.bf16.msra.mxu1 %v9956_v11 }
  0x84   : > { %9728 = vmatprep.subr.bf16.mxu1 %v10896_v6 }
 0x138   : > { %v9618_v18 = vpop.f32.mrb[0].mxu0 }
 0x139   : > { %v928_v19 = vadd.f32 %v9618_v18, %v8052_v15  ;;  %v9666_v20 = vpop.f32.mrb[0].mxu1  ;;  %v901_v21 = vpop.f32.mrb[1].mxu0 }
 0x13a   : > { %v1233_v22 = vadd.f32 %v9666_v20, %v8052_v15  ;;  %v926_v23 = vadd.f32 %v8052_v15, %v901_v21  ;;  %v1212_v24 = vpop.f32.mrb[1].mxu1  ;;  %v9619_v25 = vpop.f32.mrb[2].mxu0 }
 0x13b   : > { %v932_v26 = vmax.f32 %v928_v19, 0.0  ;;  %v1231_v28 = vadd.f32 %v8052_v15, %v1212_v24  ;;  %v929_v29 = vadd.f32 %v9619_v25, %v8052_v15  ;;  %v9667_v30 = vpop.f32.mrb[2].mxu1  ;;  %v904_v31 = vpop.f32.mrb[3].mxu0 }
 0x13c   : > { %v1237_v32 = vmax.f32 %v1233_v22, 0.0  ;;  %v930_v33 = vmax.f32 %v926_v23, 0.0  ;;  %v1234_v34 = vadd.f32 %v9667_v30, %v8052_v15  ;;  %v927_v35 = vadd.f32 %v8052_v15, %v904_v31  ;;  %v1215_v36 = vpop.f32.mrb[3].mxu1 }
 0x13d   : > { %v1235_v37 = vmax.f32 %v1231_v28, 0.0  ;;  %v933_v38 = vmax.f32 %v929_v29, 0.0  ;;  %v1232_v39 = vadd.f32 %v8052_v15, %v1215_v36 }
 0x13e   : > { %v1241_v40 = vmax.f32 %v932_v26, %v1237_v32  ;;  %v1238_v41 = vmax.f32 %v1234_v34, 0.0  ;;  %v931_v42 = vmax.f32 %v927_v35, 0.0 }
 0x13f   : > { %v1239_v43 = vmax.f32 %v930_v33, %v1235_v37  ;;  %v1236_v44 = vmax.f32 %v1232_v39, 0.0 }
 0x140   : > { %v1281_v45 = vcombine.high %v1241_v40, %v1241_v40  ;;  %v1288_v46 = vrot.slane %v1241_v40, %v11256_v27  ;;  %v11259_v47 = vmax.f32 %v933_v38, %v1238_v41 }
 0x141   : > { %v1247_v48 = vcombine.high %v1239_v43, %v1239_v43  ;;  %v1254_v49 = vrot.slane %v1239_v43, %v11256_v27  ;;  %v11262_v50 = vmax.f32 %v931_v42, %v1236_v44 }
 0x142   : > { %v1295_v51 = vrot.slane %v1281_v45, %v11256_v27  ;;  %v1296_v52 = vcombine.high %v1288_v46, %v1288_v46  ;;  %v1388_v53 = vsel %vm1331_vm3, %v1288_v46, -inf  ;;  %v1298_v33 = vcombine.high %v11259_v47, %v11259_v47 }
 0x143   : > { %v1389_v54 = vrot.slane %v1388_v53, 4  ;;  %v1261_v55 = vrot.slane %v1247_v48, %v11256_v27  ;;  %v1262_v56 = vcombine.high %v1254_v49, %v1254_v49  ;;  %v1332_v57 = vsel %vm1331_vm3, %v1254_v49, -inf }
 0x144   : > { %v1297_v58 = vcombine.high %v1295_v51, %v1295_v51  ;;  %v1395_v59 = vsel %vm1331_vm3, %v1296_v52, -inf  ;;  %v1402_v60 = vsel %vm1331_vm3, %v1295_v51, -inf  ;;  %v1333_v61 = vrot.slane %v1332_v57, 4 }
 0x145   : > { %v1390_v62 = vmax.f32 %v1388_v53, %v1389_v54  ;;  %v1396_v63 = vrot.slane %v1395_v59, 4  ;;  %v1403_v0 = vrot.slane %v1402_v60, 4  ;;  %v1263_v1 = vcombine.high %v1261_v55, %v1261_v55 }
 0x146   : > { %v1409_v2 = vsel %vm1331_vm3, %v1297_v58, -inf  ;;  %v1334_v3 = vmax.f32 %v1332_v57, %v1333_v61  ;;  %v1339_v4 = vsel %vm1331_vm3, %v1262_v56, -inf  ;;  %v1346_v5 = vsel %vm1331_vm3, %v1261_v55, -inf }
 0x147   : > { %v1391_v7 = vrot.slane %v1390_v62, 2  ;;  %v1397_v8 = vmax.f32 %v1395_v59, %v1396_v63  ;;  %v1404_v9 = vmax.f32 %v1402_v60, %v1403_v0  ;;  %v1410_v10 = vrot.slane %v1409_v2, 4 }
 0x148   : > { %v1335_v11 = vrot.slane %v1334_v3, 2  ;;  %v1340_v12 = vrot.slane %v1339_v4, 4  ;;  %v1347_v13 = vrot.slane %v1346_v5, 4  ;;  %v1353_v15 = vsel %vm1331_vm3, %v1263_v1, -inf }
 0x149   : > { %v1392_v16 = vmax.f32 %v1390_v62, %v1391_v7  ;;  %v1398_v18 = vrot.slane %v1397_v8, 2  ;;  %v1405_v19 = vrot.slane %v1404_v9, 2  ;;  %v1411_v20 = vmax.f32 %v1409_v2, %v1410_v10 }
 0x14a   : > { %v1336_v21 = vmax.f32 %v1334_v3, %v1335_v11  ;;  %v1341_v22 = vmax.f32 %v1339_v4, %v1340_v12  ;;  %v1348_v23 = vmax.f32 %v1346_v5, %v1347_v13  ;;  %v1354_v24 = vrot.slane %v1353_v15, 4 }
 0x14b   : > { %v1393_v25 = vrot.slane %v1392_v16, 1  ;;  %v1399_v26 = vmax.f32 %v1397_v8, %v1398_v18  ;;  %v1406_v28 = vmax.f32 %v1404_v9, %v1405_v19  ;;  %v1412_v29 = vrot.slane %v1411_v20, 2 }
 0x14c   : > { %v1342_v30 = vrot.slane %v1341_v22, 2  ;;  %v1349_v31 = vrot.slane %v1348_v23, 2  ;;  %v1355_v32 = vmax.f32 %v1353_v15, %v1354_v24  ;;  %v1337_v42 = vrot.slane %v1336_v21, 1 }
 0x14d   : > { %v1400_v34 = vrot.slane %v1399_v26, 1  ;;  %v1407_v35 = vrot.slane %v1406_v28, 1  ;;  %v1413_v36 = vmax.f32 %v1411_v20, %v1412_v29  ;;  %v1394_v40 = vmax.f32 %v1392_v16, %v1393_v25 }
 0x14e   : > { %v1343_v37 = vmax.f32 %v1341_v22, %v1342_v30  ;;  %v1350_v38 = vmax.f32 %v1348_v23, %v1349_v31  ;;  %v1356_v39 = vrot.slane %v1355_v32, 2  ;;  %v1305_v43 = vrot.slane %v11259_v47, %v11256_v27 }
 0x14f   : > { %v1401_v41 = vmax.f32 %v1399_v26, %v1400_v34  ;;  %v1414_v44 = vrot.slane %v1413_v36, 1  ;;  %v1312_v48 = vrot.slane %v1298_v33, %v11256_v27  ;;  %v1408_v49 = vmax.f32 %v1406_v28, %v1407_v35 }
 0x150   : > { %v1344_v45 = vrot.slane %v1343_v37, 1  ;;  %v1357_v46 = vmax.f32 %v1355_v32, %v1356_v39  ;;  %v1351_v51 = vrot.slane %v1350_v38, 1  ;;  %v1313_v52 = vcombine.high %v1305_v43, %v1305_v43 }
 0x151   : > { %v1416_v53 = vsel %vm1331_vm3, %v1305_v43, -inf  ;;  %v1476_v54 = vsel %vm1462_vm4, %v1401_v41, %v1394_v40  ;;  %v1314_v57 = vcombine.high %v1312_v48, %v1312_v48  ;;  %v1430_v47 = vsel %vm1331_vm3, %v1312_v48, -inf }
 0x152   : > { %v1345_v55 = vmax.f32 %v1343_v37, %v1344_v45  ;;  %v1358_v56 = vrot.slane %v1357_v46, 1  ;;  %v1417_v58 = vrot.slane %v1416_v53, 4  ;;  %v1423_v59 = vsel %vm1331_vm3, %v1313_v52, -inf }
 0x153   : > { %v1415_v60 = vmax.f32 %v1413_v36, %v1414_v44  ;;  %v1338_v61 = vmax.f32 %v1336_v21, %v1337_v42  ;;  %v1424_v62 = vrot.slane %v1423_v59, 4  ;;  %v1431_v63 = vrot.slane %v1430_v47, 4 }
 0x154   : > { %v1477_v0 = vsel %vm1464_vm5, %v1408_v49, %v1476_v54  ;;  %v1352_v1 = vmax.f32 %v1350_v38, %v1351_v51  ;;  %v1418_v2 = vmax.f32 %v1416_v53, %v1417_v58  ;;  %v1437_v3 = vsel %vm1331_vm3, %v1314_v57, -inf }
 0x155   : > { %v1425_v4 = vmax.f32 %v1423_v59, %v1424_v62  ;;  %v1432_v5 = vmax.f32 %v1430_v47, %v1431_v63  ;;  %v1438_v7 = vrot.slane %v1437_v3, 4  ;;  %v1264_v8 = vcombine.high %v11262_v50, %v11262_v50 }
 0x156   : > { %v1359_v9 = vmax.f32 %v1357_v46, %v1358_v56  ;;  %v1463_v10 = vsel %vm1462_vm4, %v1345_v55, %v1338_v61  ;;  %v1419_v11 = vrot.slane %v1418_v2, 2  ;;  %v1271_v12 = vrot.slane %v11262_v50, %v11256_v27 }
 0x157   : > { %v1426_v13 = vrot.slane %v1425_v4, 2  ;;  %v1433_v15 = vrot.slane %v1432_v5, 2  ;;  %v1439_v16 = vmax.f32 %v1437_v3, %v1438_v7  ;;  %v1278_v18 = vrot.slane %v1264_v8, %v11256_v27 }
 0x158   : > { %v1420_v19 = vmax.f32 %v1418_v2, %v1419_v11  ;;  %v1478_v20 = vsel %vm1466_vm6, %v1415_v60, %v1477_v0  ;;  %v1279_v21 = vcombine.high %v1271_v12, %v1271_v12  ;;  %v1360_v22 = vsel %vm1331_vm3, %v1271_v12, -inf  ;;  %v9957_v11 = vld [vmem:[%s13563_s4 + $0x80] sm:$0xff]  }
 0x159   : > { %v1427_v23 = vmax.f32 %v1425_v4, %v1426_v13  ;;  %v1434_v24 = vmax.f32 %v1432_v5, %v1433_v15  ;;  %v1440_v25 = vrot.slane %v1439_v16, 2  ;;  %v1280_v26 = vcombine.high %v1278_v18, %v1278_v18  ;;  %v9959_v13 = vld [vmem:[%s13563_s4 + $0x88] sm:$0xff]   ;;  %v9958_v15 = vld [vmem:[%s13564_s5 + $0x40] sm:$0xff]  }
 0x15a   : > { %v1421_v28 = vrot.slane %v1420_v19, 1  ;;  %v1361_v29 = vrot.slane %v1360_v22, 4  ;;  %v1367_v30 = vsel %vm1331_vm3, %v1279_v21, -inf  ;;  %v1374_v50 = vsel %vm1331_vm3, %v1278_v18, -inf  ;;  %v9960_v21 = vld [vmem:[%s13564_s5 + $0x48] sm:$0xff]  }
 0x15b   : > { %v1428_v31 = vrot.slane %v1427_v23, 1  ;;  %v1435_v32 = vrot.slane %v1434_v24, 1  ;;  %v1441_v33 = vmax.f32 %v1439_v16, %v1440_v25  ;;  %v1368_v34 = vrot.slane %v1367_v30, 4  ;;  %v9964_v25 = vld [vmem:[%s13564_s5 + $0x58] sm:$0xff]  }
 0x15c   : > { %v1422_v35 = vmax.f32 %v1420_v19, %v1421_v28  ;;  %v1362_v36 = vmax.f32 %v1360_v22, %v1361_v29  ;;  %v1375_v37 = vrot.slane %v1374_v50, 4  ;;  %v1381_v38 = vsel %vm1331_vm3, %v1280_v26, -inf  ;;  %v9961_v19 = vld [vmem:[%s13563_s4 + $0x90] sm:$0xff]   ;;  %v9963_v22 = vld [vmem:[%s13563_s4 + $0x98] sm:$0xff]   ;;  %v9967_v26 = vld [vmem:[%s13563_s4 + $0xa8] sm:$0xff]  }
 0x15d   : > { %v1429_v39 = vmax.f32 %v1427_v23, %v1428_v31  ;;  %v1436_v40 = vmax.f32 %v1434_v24, %v1435_v32  ;;  %v1442_v41 = vrot.slane %v1441_v33, 1  ;;  %v1369_v42 = vmax.f32 %v1367_v30, %v1368_v34  ;;  %v9962_v23 = vld [vmem:[%s13564_s5 + $0x50] sm:$0xff]   ;;  %v9965_v24 = vld [vmem:[%s13563_s4 + $0xa0] sm:$0xff]   ;;  %v9968_v30 = vld [vmem:[%s13564_s5 + $0x68] sm:$0xff]  }
 0x15e   : > { %v1479_v43 = vsel %vm1468_vm7, %v1422_v35, %v1478_v20  ;;  %v1363_v44 = vrot.slane %v1362_v36, 2  ;;  %v1376_v45 = vmax.f32 %v1374_v50, %v1375_v37  ;;  %v1382_v46 = vrot.slane %v1381_v38, 4  ;;  %v9966_v28 = vld [vmem:[%s13564_s5 + $0x60] sm:$0xff]   ;;  %v9969_v29 = vld [vmem:[%s13563_s4 + $0xb0] sm:$0xff]   ;;  %v9971_v50 = vld [vmem:[%s13563_s4 + $0xb8] sm:$0xff]  }
 0x15f   : > { %v1465_v48 = vsel %vm1464_vm5, %v1352_v1, %v1463_v10  ;;  %v1443_v49 = vmax.f32 %v1441_v33, %v1442_v41  ;;  %v1480_v51 = vsel %vm1470_vm8, %v1429_v39, %v1479_v43  ;;  %v1370_v52 = vrot.slane %v1369_v42, 2  ;;  %v9970_v33 = vld [vmem:[%s13564_s5 + $0x70] sm:$0xff]   ;;  %v9973_v34 = vld [vmem:[%s13564_s5] sm:$0xff]   ;;  %v9975_v37 = vld [vmem:[%s13564_s5 + $0x8] sm:$0xff]  }
 0x160   : > { %v1481_v53 = vsel %vm1472_vm9, %v1436_v40, %v1480_v51  ;;  %v1364_v54 = vmax.f32 %v1362_v36, %v1363_v44  ;;  %v1377_v55 = vrot.slane %v1376_v45, 2  ;;  %v1383_v56 = vmax.f32 %v1381_v38, %v1382_v46  ;;  %v9972_v36 = vld [vmem:[%s13564_s5 + $0x78] sm:$0xff]   ;;  %v9974_v38 = vld [vmem:[%s13564_s5 + $0x80] sm:$0xff]   ;;  %v9977_v39 = vld [vmem:[%s13564_s5 + $0x10] sm:$0xff]  }
 0x161   : > { %v1482_v57 = vsel %vm1474_vm10, %v1443_v49, %v1481_v53  ;;  %v1371_v58 = vmax.f32 %v1369_v42, %v1370_v52  ;;  %v1467_v62 = vsel %vm1466_vm6, %v1359_v9, %v1465_v48  ;;  %v9976_v40 = vld [vmem:[%s13564_s5 + $0x88] sm:$0xff]   ;;  %v9979_v41 = vld [vmem:[%s13564_s5 + $0x18] sm:$0xff]   ;;  %v9978_v42 = vld [vmem:[%s13564_s5 + $0x90] sm:$0xff]  }
 0x162   : > { %1486 = vst [vmem:[#allocation3 + $0x9] sm:$0xff] %v1482_v57  ;;  %v1365_v59 = vrot.slane %v1364_v54, 1  ;;  %v1378_v47 = vmax.f32 %v1376_v45, %v1377_v55  ;;  %v1384_v60 = vrot.slane %v1383_v56, 2  ;;  %v9981_v43 = vld [vmem:[%s13564_s5 + $0x20] sm:$0xff]   ;;  %v9980_v44 = vld [vmem:[%s13564_s5 + $0x98] sm:$0xff]   ;;  %v9983_v45 = vld [vmem:[%s13564_s5 + $0x28] sm:$0xff]  }
 0x163   : > { %v1372_v61 = vrot.slane %v1371_v58, 1  ;;  %v9982_v46 = vld [vmem:[%s13564_s5 + $0xa0] sm:$0xff]   ;;  %v9985_v48 = vld [vmem:[%s13564_s5 + $0x30] sm:$0xff]   ;;  %v9984_v49 = vld [vmem:[%s13564_s5 + $0xa8] sm:$0xff]  }
 0x164   : > { %v1366_v63 = vmax.f32 %v1364_v54, %v1365_v59  ;;  %v1379_v0 = vrot.slane %v1378_v47, 1  ;;  %v1385_v1 = vmax.f32 %v1383_v56, %v1384_v60  ;;  %v9987_v51 = vld [vmem:[%s13564_s5 + $0x38] sm:$0xff]   ;;  %v9986_v52 = vld [vmem:[%s13564_s5 + $0xb0] sm:$0xff]   ;;  %v9991_v54 = vld [vmem:[%s13566_s7 + $0x84] ss:$8 sps:$4 sm:$0xff]  }
 0x165   : > { %v1373_v2 = vmax.f32 %v1371_v58, %v1372_v61  ;;  %v9988_v53 = vld [vmem:[%s13564_s5 + $0xb8] sm:$0xff]   ;;  %v9989_v55 = vld [vmem:[%s13566_s7 + $0x80] ss:$8 sps:$4 sm:$0xff]   ;;  %v10003_v58 = vld [vmem:[%s13566_s7 + $0xa4] ss:$8 sps:$4 sm:$0xff]  }
 0x166   : > { %v1380_v3 = vmax.f32 %v1378_v47, %v1379_v0  ;;  %v1386_v4 = vrot.slane %v1385_v1, 1  ;;  %v1469_v5 = vsel %vm1468_vm7, %v1366_v63, %v1467_v62  ;;  %v9997_v56 = vld [vmem:[%s13566_s7 + $0x94] ss:$8 sps:$4 sm:$0xff]   ;;  %v9994_v59 = vld [vmem:[%s13566_s7 + $0x4] ss:$8 sps:$4 sm:$0xff]  }
 0x167   : > { %v1471_v7 = vsel %vm1470_vm8, %v1373_v2, %v1469_v5  ;;  %v10001_v47 = vld [vmem:[%s13566_s7 + $0xa0] ss:$8 sps:$4 sm:$0xff]   ;;  %v10009_v61 = vld [vmem:[%s13566_s7 + $0xb4] ss:$8 sps:$4 sm:$0xff]   ;;  %v10007_v63 = vld [vmem:[%s13566_s7 + $0xb0] ss:$8 sps:$4 sm:$0xff]  }
 0x168   : > { %v1387_v8 = vmax.f32 %v1385_v1, %v1386_v4  ;;  %v1473_v10 = vsel %vm1472_vm9, %v1380_v3, %v1471_v7  ;;  %v9992_v60 = vld [vmem:[%s13566_s7] ss:$8 sps:$4 sm:$0xff]   ;;  %v10000_v62 = vld [vmem:[%s13566_s7 + $0x14] ss:$8 sps:$4 sm:$0xff]   ;;  %v9998_v0 = vld [vmem:[%s13566_s7 + $0x10] ss:$8 sps:$4 sm:$0xff]  }
 0x169   : > { %v1494_v32 = vld [vmem:[#allocation3 + $0xa] sm:$0xff]  ;;  %v10015_v1 = vld [vmem:[%s13566_s7 + $0xc4] ss:$8 sps:$4 sm:$0xff]   ;;  %v10013_v3 = vld [vmem:[%s13566_s7 + $0xc0] ss:$8 sps:$4 sm:$0xff]  }
 0x16a   : > { %v1475_v12 = vsel %vm1474_vm10, %v1387_v8, %v1473_v10  ;;  %v10006_v2 = vld [vmem:[%s13566_s7 + $0x24] ss:$8 sps:$4 sm:$0xff]   ;;  %v10004_v4 = vld [vmem:[%s13566_s7 + $0x20] ss:$8 sps:$4 sm:$0xff]   ;;  %v10021_v5 = vld [vmem:[%s13566_s7 + $0xd4] ss:$8 sps:$4 sm:$0xff]  }
 0x16b   : > { %1485 = vst [vmem:[#allocation3 + $0x1] sm:$0xff] %v1475_v12  ;;  %v11309_v9 = vpack.c.bf16 %v1482_v57, %v1475_v12  ;;  %v9995_v57 = vld [vmem:[%s13566_s7 + $0x90] ss:$8 sps:$4 sm:$0xff]   ;;  %v10012_v7 = vld [vmem:[%s13566_s7 + $0x34] ss:$8 sps:$4 sm:$0xff]  }
 0x16c   : > { %v10019_v8 = vld [vmem:[%s13566_s7 + $0xd0] ss:$8 sps:$4 sm:$0xff]   ;;  %v10018_v12 = vld [vmem:[%s13566_s7 + $0x44] ss:$8 sps:$4 sm:$0xff]  }
 0x16d   : > { %9685 = vmatmul.mubr.bf16.vlgmr.msra.gmra.mrb[4].mxu0 %v11309_v9  ;;  %v10010_v10 = vld [vmem:[%s13566_s7 + $0x30] ss:$8 sps:$4 sm:$0xff]  }
 0x16e   : > { %9709 = vmatpush3.bf16.msra.mxu0 %v9957_v11  ;;  %9724 = vmatprep.mubr.msk.bf16.mxu0 %vm10897_vm2, %v10896_v6  ;;  %v10027_v11 = vld [vmem:[%s13566_s7 + $0xe4] ss:$8 sps:$4 sm:$0xff]  }
 0x16f   : > { %9710 = vmatprep.subr.bf16.mxu0 %v10896_v6 }
 0x172   : > { %v1487_v16 = vld [vmem:[#allocation3] sm:$0xff]  ;;  %v1488_v18 = vld [vmem:[#allocation3 + $0x8] sm:$0xff]  ;;  %9711 = vmatpush3.bf16.msra.mxu0 %v9959_v13 }
 0x173   : > { %v11324_v20 = vpack.c.bf16 %v1488_v18, %v1487_v16  ;;  %9712 = vmatprep.subr.bf16.mxu0 %v10896_v6  ;;  %v1493_v31 = vld [vmem:[#allocation3 + $0x2] sm:$0xff]  ;;  %v10024_v16 = vld [vmem:[%s13566_s7 + $0x54] ss:$8 sps:$4 sm:$0xff]  }
 0x174   : > { %v1495_v35 = vpack.c.bf16 %v1494_v32, %v1493_v31  ;;  %v10016_v13 = vld [vmem:[%s13566_s7 + $0x40] ss:$8 sps:$4 sm:$0xff]   ;;  %v10031_v18 = vld [vmem:[%s13566_s7 + $0xf0] ss:$8 sps:$4 sm:$0xff]  }
 0x175   : > { %9705 = vmatmul.mubr.bf16.vlgmr.msra.gmra.mrb[4].mxu1 %v11324_v20 }
 0x176   : > { %9729 = vmatpush3.bf16.msra.mxu1 %v9958_v15  ;;  %9713 = vmatpush3.bf16.msra.mxu0 %v9961_v19  ;;  %v10033_v15 = vld [vmem:[%s13566_s7 + $0xf4] ss:$8 sps:$4 sm:$0xff]   ;;  %v10022_v19 = vld [vmem:[%s13566_s7 + $0x50] ss:$8 sps:$4 sm:$0xff]  }
 0x177   : > { %9730 = vmatprep.subr.bf16.mxu1 %v10896_v6  ;;  %9714 = vmatprep.subr.bf16.mxu0 %v10896_v6 }
 0x178   : > { %9744 = vmatprep.mubr.msk.bf16.mxu1 %vm10897_vm2, %v10896_v6 }
 0x17a   : > { %9731 = vmatpush3.bf16.msra.mxu1 %v9960_v21  ;;  %9715 = vmatpush3.bf16.msra.mxu0 %v9963_v22  ;;  %v10028_v21 = vld [vmem:[%s13566_s7 + $0x60] ss:$8 sps:$4 sm:$0xff]   ;;  %v10036_v22 = vld [vmem:[%s13566_s7 + $0x74] ss:$8 sps:$4 sm:$0xff]  }
 0x17b   : > { %9732 = vmatprep.subr.bf16.mxu1 %v10896_v6  ;;  %9716 = vmatprep.subr.bf16.mxu0 %v10896_v6 }
 0x17e   : > { %9733 = vmatpush3.bf16.msra.mxu1 %v9962_v23  ;;  %9717 = vmatpush3.bf16.msra.mxu0 %v9965_v24  ;;  %v10899_v23 = vmov 0   ;;  %v10039_v24 = vld [vmem:[%s13566_s7 + $0x104] ss:$8 sps:$4 sm:$0xff]  }
 0x17f   : > { %9734 = vmatprep.subr.bf16.mxu1 %v10896_v6  ;;  %9718 = vmatprep.subr.bf16.mxu0 %v10896_v6 }
 0x182   : > { %9735 = vmatpush3.bf16.msra.mxu1 %v9964_v25  ;;  %9719 = vmatpush3.bf16.msra.mxu0 %v9967_v26  ;;  %v10034_v25 = vld [vmem:[%s13566_s7 + $0x70] ss:$8 sps:$4 sm:$0xff]  }
 0x183   : > { %9736 = vmatprep.subr.bf16.mxu1 %v10896_v6  ;;  %9720 = vmatprep.subr.bf16.mxu0 %v10896_v6 }
 0x186   : > { %9737 = vmatpush3.bf16.msra.mxu1 %v9966_v28  ;;  %9721 = vmatpush3.bf16.msra.mxu0 %v9969_v29 }
 0x187   : > { %9738 = vmatprep.subr.bf16.mxu1 %v10896_v6  ;;  %9722 = vmatprep.subr.bf16.mxu0 %v10896_v6 }
 0x18a   : > { %9739 = vmatpush3.bf16.msra.mxu1 %v9968_v30  ;;  %9723 = vmatpush3.bf16.msra.mxu0 %v9971_v50 }
 0x18b   : > { %9740 = vmatprep.subr.bf16.mxu1 %v10896_v6  ;;  %9748 = vmatprep.subr.bf16.mxu0 %v10896_v6 }
 0x18d   : > { %9725 = vmatmul.mubr.bf16.vlgmr.msra.gmra.mrb[8].mxu0 %v1495_v35 }
 0x18e   : > { %9741 = vmatpush3.bf16.msra.mxu1 %v9970_v33  ;;  %9749 = vmatpush3.bf16.msra.mxu0 %v9973_v34 }
 0x18f   : > { %9742 = vmatprep.subr.bf16.mxu1 %v10896_v6  ;;  %9750 = vmatprep.subr.bf16.mxu0 %v10896_v6 }
 0x190   : > { %9764 = vmatprep.mubr.msk.bf16.mxu0 %vm10897_vm2, %v10896_v6 }
 0x192   : > { %9743 = vmatpush3.bf16.msra.mxu1 %v9972_v36  ;;  %9751 = vmatpush3.bf16.msra.mxu0 %v9975_v37  ;;  %v10069_v36 = vld [vmem:[%s13568_s9 + $0x104] ss:$8 sps:$4 sm:$0xff]  }
 0x193   : > { %9768 = vmatprep.subr.bf16.mxu1 %v10896_v6  ;;  %9752 = vmatprep.subr.bf16.mxu0 %v10896_v6 }
 0x195   : > { %9745 = vmatmul.mubr.bf16.vlgmr.msra.gmra.mrb[8].mxu1 %v11309_v9  ;;  %v10025_v9 = vld [vmem:[%s13566_s7 + $0xe0] ss:$8 sps:$4 sm:$0xff]  }
 0x196   : > { %9769 = vmatpush3.bf16.msra.mxu1 %v9974_v38  ;;  %9753 = vmatpush3.bf16.msra.mxu0 %v9977_v39 }
 0x197   : > { %9770 = vmatprep.subr.bf16.mxu1 %v10896_v6  ;;  %9754 = vmatprep.subr.bf16.mxu0 %v10896_v6 }
 0x198   : > { %9784 = vmatprep.mubr.msk.bf16.mxu1 %vm10897_vm2, %v10896_v6 }
 0x19a   : > { %9771 = vmatpush3.bf16.msra.mxu1 %v9976_v40  ;;  %9755 = vmatpush3.bf16.msra.mxu0 %v9979_v41 }
 0x19b   : > { %9772 = vmatprep.subr.bf16.mxu1 %v10896_v6  ;;  %9756 = vmatprep.subr.bf16.mxu0 %v10896_v6 }
 0x19e   : > { %9773 = vmatpush3.bf16.msra.mxu1 %v9978_v42  ;;  %9757 = vmatpush3.bf16.msra.mxu0 %v9981_v43 }
 0x19f   : > { %9774 = vmatprep.subr.bf16.mxu1 %v10896_v6  ;;  %9758 = vmatprep.subr.bf16.mxu0 %v10896_v6 }
 0x1a2   : > { %9775 = vmatpush3.bf16.msra.mxu1 %v9980_v44  ;;  %9759 = vmatpush3.bf16.msra.mxu0 %v9983_v45 }
 0x1a3   : > { %9776 = vmatprep.subr.bf16.mxu1 %v10896_v6  ;;  %9760 = vmatprep.subr.bf16.mxu0 %v10896_v6 }
 0x1a6   : > { %9777 = vmatpush3.bf16.msra.mxu1 %v9982_v46  ;;  %9761 = vmatpush3.bf16.msra.mxu0 %v9985_v48 }
 0x1a7   : > { %9778 = vmatprep.subr.bf16.mxu1 %v10896_v6  ;;  %9762 = vmatprep.subr.bf16.mxu0 %v10896_v6 }
 0x1aa   : > { %9779 = vmatpush3.bf16.msra.mxu1 %v9984_v49  ;;  %9763 = vmatpush3.bf16.msra.mxu0 %v9987_v51 }
 0x1ab   : > { %9780 = vmatprep.subr.bf16.mxu1 %v10896_v6  ;;  %2389 = vmatprep.subr.bf16.mxu0 %v9991_v54 }
 0x1ad   : > { %9765 = vmatmul.mubr.bf16.vlgmr.msra.gmra.mrb[12].mxu0 %v11324_v20  ;;  %v10030_v20 = vld [vmem:[%s13566_s7 + $0x64] ss:$8 sps:$4 sm:$0xff]  }
 0x1ae   : > { %9781 = vmatpush3.bf16.msra.mxu1 %v9986_v52  ;;  %2390 = vmatpush1.bf16.msra.mxu0 %v9989_v55  ;;  %v8157_v55 = vld [vmem:[%s13565_s6] ss:$0 sm:$0xff] }
 0x1af   : > { %9782 = vmatprep.subr.bf16.mxu1 %v10896_v6  ;;  %2391 = vmatprep.subr.bf16.mxu0 %v9997_v56 }
 0x1b0   : > { %2421 = vmatprep.mubr.bf16.mxu0 %v10899_v23 }
 0x1b2   : > { %9783 = vmatpush3.bf16.msra.mxu1 %v9988_v53  ;;  %2392 = vmatpush1.bf16.msra.mxu0 %v9995_v57 }
 0x1b3   : > { %2393 = vmatprep.subr.bf16.mxu0 %v10003_v58  ;;  %2510 = vmatprep.subr.bf16.mxu1 %v9994_v59 }
 0x1b5   : > { %9785 = vmatmul.mubr.bf16.vlgmr.msra.gmra.mrb[12].mxu1 %v1495_v35 }
 0x1b6   : > { %2394 = vmatpush1.bf16.msra.mxu0 %v10001_v47  ;;  %2511 = vmatpush1.bf16.msra.mxu1 %v9992_v60 }
 0x1b7   : > { %2395 = vmatprep.subr.bf16.mxu0 %v10009_v61  ;;  %2512 = vmatprep.subr.bf16.mxu1 %v10000_v62 }
 0x1b8   : > { %2542 = vmatprep.mubr.bf16.mxu1 %v10899_v23 }
 0x1ba   : > { %2396 = vmatpush1.bf16.msra.mxu0 %v10007_v63  ;;  %2513 = vmatpush1.bf16.msra.mxu1 %v9998_v0 }
 0x1bb   : > { %2397 = vmatprep.subr.bf16.mxu0 %v10015_v1  ;;  %2514 = vmatprep.subr.bf16.mxu1 %v10006_v2 }
 0x1be   : > { %2398 = vmatpush1.bf16.msra.mxu0 %v10013_v3  ;;  %2515 = vmatpush1.bf16.msra.mxu1 %v10004_v4 }
 0x1bf   : > { %2399 = vmatprep.subr.bf16.mxu0 %v10021_v5  ;;  %2516 = vmatprep.subr.bf16.mxu1 %v10012_v7 }
 0x1c2   : > { %2400 = vmatpush1.bf16.msra.mxu0 %v10019_v8  ;;  %2517 = vmatpush1.bf16.msra.mxu1 %v10010_v10 }
 0x1c3   : > { %2401 = vmatprep.subr.bf16.mxu0 %v10027_v11  ;;  %2518 = vmatprep.subr.bf16.mxu1 %v10018_v12 }
 0x1c6   : > { %2402 = vmatpush1.bf16.msra.mxu0 %v10025_v9  ;;  %2519 = vmatpush1.bf16.msra.mxu1 %v10016_v13 }
 0x1c7   : > { %2403 = vmatprep.subr.bf16.mxu0 %v10033_v15  ;;  %2520 = vmatprep.subr.bf16.mxu1 %v10024_v16 }
 0x1ca   : > { %2404 = vmatpush1.bf16.msra.mxu0 %v10031_v18  ;;  %2521 = vmatpush1.bf16.msra.mxu1 %v10022_v19 }
 0x1cb   : > { %2522 = vmatprep.subr.bf16.mxu1 %v10030_v20  ;;  %2648 = vmatprep.subr.bf16.mxu0 %v10039_v24 }
 0x1ce   : > { %2523 = vmatpush1.bf16.msra.mxu1 %v10028_v21 }
 0x1cf   : > { %2524 = vmatprep.subr.bf16.mxu1 %v10036_v22 }
 0x1d2   : > { %2525 = vmatpush1.bf16.msra.mxu1 %v10034_v25 }
 0x1d3   : > { %2984 = vmatprep.subr.bf16.mxu1 %v10069_v36 }
 0x240   : > { %v1612_v26 = vpop.f32.mrb[4].mxu0 }
 0x241   : > { %v9686_v28 = vpop.f32.mrb[5].mxu0 }
 0x242   : > { %v1615_v29 = vpop.f32.mrb[6].mxu0 }
 0x243   : > { %v9687_v30 = vpop.f32.mrb[7].mxu0 }
 0x248   : > { %v1701_v50 = vpop.f32.mrb[4].mxu1 }
 0x249   : > { %v1702_v31 = vadd.f32 %v1701_v50, %v1612_v26  ;;  %v9706_v32 = vpop.f32.mrb[5].mxu1 }
 0x24a   : > { %v1704_v33 = vpop.f32.mrb[6].mxu1 }
 0x24b   : > { %v1705_v34 = vadd.f32 %v1704_v33, %v1615_v29  ;;  %v9707_v35 = vpop.f32.mrb[7].mxu1 }
 0x260   : > { %v1807_v37 = vpop.f32.mrb[8].mxu0 }
 0x261   : > { %v1814_v38 = vadd.f32 %v1807_v37, %v1702_v31  ;;  %v9726_v39 = vpop.f32.mrb[9].mxu0 }
 0x262   : > { %v1810_v40 = vpop.f32.mrb[10].mxu0 }
 0x263   : > { %v1815_v41 = vadd.f32 %v1810_v40, %v1705_v34  ;;  %v9727_v42 = vpop.f32.mrb[11].mxu0  ;;  %v1822_v57 = vadd.f32 %v8157_v55, %v1814_v38 }
 0x265   : > { %v1823_v60 = vadd.f32 %v8157_v55, %v1815_v41  ;;  %v1824_v0 = vmax.f32 %v1822_v57, 0.0 }
 0x267   : > { %v1825_v3 = vmax.f32 %v1823_v60, 0.0 }
 0x268   : > { %v1941_v43 = vpop.f32.mrb[8].mxu1 }
 0x269   : > { %v9746_v44 = vpop.f32.mrb[9].mxu1 }
 0x26a   : > { %v1944_v45 = vpop.f32.mrb[10].mxu1 }
 0x26b   : > { %v9747_v46 = vpop.f32.mrb[11].mxu1 }
 0x280   : > { %v2030_v48 = vpop.f32.mrb[12].mxu0 }
 0x281   : > { %v2031_v49 = vadd.f32 %v2030_v48, %v1941_v43  ;;  %v9766_v51 = vpop.f32.mrb[13].mxu0 }
 0x282   : > { %v2033_v52 = vpop.f32.mrb[14].mxu0 }
 0x283   : > { %v2034_v53 = vadd.f32 %v2033_v52, %v1944_v45  ;;  %v9767_v54 = vpop.f32.mrb[15].mxu0 }
 0x288   : > { %v2136_v56 = vpop.f32.mrb[12].mxu1 }
 0x289   : > { %v2143_v58 = vadd.f32 %v2136_v56, %v2031_v49  ;;  %v9786_v59 = vpop.f32.mrb[13].mxu1 }
 0x28a   : > { %v2139_v47 = vpop.f32.mrb[14].mxu1 }
 0x28b   : > { %v2145_v61 = vadd.f32 %v8157_v55, %v2143_v58  ;;  %v2144_v62 = vadd.f32 %v2139_v47, %v2034_v53  ;;  %v9787_v63 = vpop.f32.mrb[15].mxu1 }
 0x28d   : > { %v2147_v1 = vmax.f32 %v2145_v61, 0.0  ;;  %v2146_v2 = vadd.f32 %v8157_v55, %v2144_v62 }
 0x28f   : > { %v2149_v4 = vmax.f32 %v1824_v0, %v2147_v1  ;;  %v2148_v5 = vmax.f32 %v2146_v2, 0.0 }
 0x291   : > { %v2153_v7 = vcombine.high %v2149_v4, %v2149_v4  ;;  %v2160_v8 = vrot.slane %v2149_v4, %v11256_v27  ;;  %v2150_v10 = vmax.f32 %v1825_v3, %v2148_v5 }
 0x293   : > { %v2167_v11 = vrot.slane %v2153_v7, %v11256_v27  ;;  %v2168_v12 = vcombine.high %v2160_v8, %v2160_v8  ;;  %v2195_v9 = vsel %vm1331_vm3, %v2160_v8, -inf  ;;  %v2170_v13 = vcombine.high %v2150_v10, %v2150_v10 }
 0x294   : > { %v2196_v15 = vrot.slane %v2195_v9, 4  ;;  %v2177_v16 = vrot.slane %v2150_v10, %v11256_v27 }
 0x295   : > { %v2169_v18 = vcombine.high %v2167_v11, %v2167_v11  ;;  %v2202_v19 = vsel %vm1331_vm3, %v2168_v12, -inf  ;;  %v2209_v20 = vsel %vm1331_vm3, %v2167_v11, -inf  ;;  %v2184_v21 = vrot.slane %v2170_v13, %v11256_v27 }
 0x296   : > { %v2197_v22 = vmax.f32 %v2195_v9, %v2196_v15  ;;  %v2203_v24 = vrot.slane %v2202_v19, 4  ;;  %v2210_v25 = vrot.slane %v2209_v20, 4  ;;  %v2185_v26 = vcombine.high %v2177_v16, %v2177_v16 }
 0x297   : > { %v2216_v28 = vsel %vm1331_vm3, %v2169_v18, -inf  ;;  %v2186_v29 = vcombine.high %v2184_v21, %v2184_v21  ;;  %v2223_v30 = vsel %vm1331_vm3, %v2177_v16, -inf  ;;  %v2237_v50 = vsel %vm1331_vm3, %v2184_v21, -inf }
 0x298   : > { %v2198_v31 = vrot.slane %v2197_v22, 2  ;;  %v2204_v32 = vmax.f32 %v2202_v19, %v2203_v24  ;;  %v2211_v33 = vmax.f32 %v2209_v20, %v2210_v25  ;;  %v2217_v34 = vrot.slane %v2216_v28, 4  ;;  %v10037_v25 = vld [vmem:[%s13566_s7 + $0x100] ss:$8 sps:$4 sm:$0xff]  }
 0x299   : > { %v2224_v35 = vrot.slane %v2223_v30, 4  ;;  %v2230_v36 = vsel %vm1331_vm3, %v2185_v26, -inf  ;;  %v2238_v37 = vrot.slane %v2237_v50, 4  ;;  %v2244_v38 = vsel %vm1331_vm3, %v2186_v29, -inf  ;;  %v10040_v29 = vld [vmem:[%s13566_s7 + $0x110] ss:$8 sps:$4 sm:$0xff]  }
 0x29a   : > { %v2199_v39 = vmax.f32 %v2197_v22, %v2198_v31  ;;  %v2205_v40 = vrot.slane %v2204_v32, 2  ;;  %v2212_v41 = vrot.slane %v2211_v33, 2  ;;  %v2218_v42 = vmax.f32 %v2216_v28, %v2217_v34  ;;  %v10042_v28 = vld [vmem:[%s13566_s7 + $0x114] ss:$8 sps:$4 sm:$0xff]   ;;  %v10043_v31 = vld [vmem:[%s13566_s7 + $0x120] ss:$8 sps:$4 sm:$0xff]  }
 0x29b   : > { %v2225_v43 = vmax.f32 %v2223_v30, %v2224_v35  ;;  %v2231_v44 = vrot.slane %v2230_v36, 4  ;;  %v2239_v45 = vmax.f32 %v2237_v50, %v2238_v37  ;;  %v2245_v46 = vrot.slane %v2244_v38, 4  ;;  %v10045_v30 = vld [vmem:[%s13566_s7 + $0x124] ss:$8 sps:$4 sm:$0xff]   ;;  %v10048_v34 = vld [vmem:[%s13566_s7 + $0x134] ss:$8 sps:$4 sm:$0xff]  }
 0x29c   : > { %v2200_v48 = vrot.slane %v2199_v39, 1  ;;  %v2206_v49 = vmax.f32 %v2204_v32, %v2205_v40  ;;  %v2213_v51 = vmax.f32 %v2211_v33, %v2212_v41  ;;  %v2219_v52 = vrot.slane %v2218_v42, 2  ;;  %v10067_v32 = vld [vmem:[%s13568_s9 + $0x100] ss:$8 sps:$4 sm:$0xff]   ;;  %v10075_v35 = vld [vmem:[%s13568_s9 + $0x114] ss:$8 sps:$4 sm:$0xff]  }
 0x29d   : > { %v2226_v53 = vrot.slane %v2225_v43, 2  ;;  %v2232_v54 = vmax.f32 %v2230_v36, %v2231_v44  ;;  %v2240_v55 = vrot.slane %v2239_v45, 2  ;;  %v2246_v56 = vmax.f32 %v2244_v38, %v2245_v46  ;;  %v10046_v36 = vld [vmem:[%s13566_s7 + $0x130] ss:$8 sps:$4 sm:$0xff]   ;;  %v10051_v38 = vld [vmem:[%s13566_s7 + $0x144] ss:$8 sps:$4 sm:$0xff]  }
 0x29e   : > { %v2207_v57 = vrot.slane %v2206_v49, 1  ;;  %v2214_v58 = vrot.slane %v2213_v51, 1  ;;  %v2220_v59 = vmax.f32 %v2218_v42, %v2219_v52  ;;  %v2201_v63 = vmax.f32 %v2199_v39, %v2200_v48  ;;  %v10073_v37 = vld [vmem:[%s13568_s9 + $0x110] ss:$8 sps:$4 sm:$0xff]   ;;  %v10049_v39 = vld [vmem:[%s13566_s7 + $0x140] ss:$8 sps:$4 sm:$0xff]  }
 0x29f   : > { %v2227_v47 = vmax.f32 %v2225_v43, %v2226_v53  ;;  %v2233_v60 = vrot.slane %v2232_v54, 2  ;;  %v2241_v61 = vmax.f32 %v2239_v45, %v2240_v55  ;;  %v2247_v62 = vrot.slane %v2246_v56, 2  ;;  %v10054_v40 = vld [vmem:[%s13566_s7 + $0x154] ss:$8 sps:$4 sm:$0xff]   ;;  %v10052_v41 = vld [vmem:[%s13566_s7 + $0x150] ss:$8 sps:$4 sm:$0xff]  }
 0x2a0   : > { %v2208_v0 = vmax.f32 %v2206_v49, %v2207_v57  ;;  %v2215_v1 = vmax.f32 %v2213_v51, %v2214_v58  ;;  %v2221_v2 = vrot.slane %v2220_v59, 1  ;;  %v10057_v42 = vld [vmem:[%s13566_s7 + $0x164] ss:$8 sps:$4 sm:$0xff]   ;;  %v10055_v43 = vld [vmem:[%s13566_s7 + $0x160] ss:$8 sps:$4 sm:$0xff]  }
 0x2a1   : > { %v2228_v3 = vrot.slane %v2227_v47, 1  ;;  %v2234_v4 = vmax.f32 %v2232_v54, %v2233_v60  ;;  %v2248_v5 = vmax.f32 %v2246_v56, %v2247_v62  ;;  %v2242_v10 = vrot.slane %v2241_v61, 1  ;;  %v10060_v44 = vld [vmem:[%s13566_s7 + $0x174] ss:$8 sps:$4 sm:$0xff]   ;;  %v10058_v45 = vld [vmem:[%s13566_s7 + $0x170] ss:$8 sps:$4 sm:$0xff]  }
 0x2a2   : > { %v2222_v7 = vmax.f32 %v2220_v59, %v2221_v2  ;;  %v2261_v8 = vsel %vm1462_vm4, %v2208_v0, %v2201_v63  ;;  %v10063_v46 = vld [vmem:[%s13568_s9 + $0x4] ss:$8 sps:$4 sm:$0xff]   ;;  %v10061_v49 = vld [vmem:[%s13568_s9] ss:$8 sps:$4 sm:$0xff]   ;;  %v10066_v52 = vld [vmem:[%s13568_s9 + $0x14] ss:$8 sps:$4 sm:$0xff]  }
 0x2a3   : > { %v2262_v11 = vsel %vm1464_vm5, %v2215_v1, %v2261_v8  ;;  %v2229_v12 = vmax.f32 %v2227_v47, %v2228_v3  ;;  %v2235_v9 = vrot.slane %v2234_v4, 1  ;;  %v2249_v13 = vrot.slane %v2248_v5, 1  ;;  %v10064_v53 = vld [vmem:[%s13568_s9 + $0x10] ss:$8 sps:$4 sm:$0xff]   ;;  %v10072_v54 = vld [vmem:[%s13568_s9 + $0x24] ss:$8 sps:$4 sm:$0xff]  }
 0x2a4   : > { %v2263_v15 = vsel %vm1466_vm6, %v2222_v7, %v2262_v11  ;;  %v2243_v19 = vmax.f32 %v2241_v61, %v2242_v10  ;;  %v10070_v55 = vld [vmem:[%s13568_s9 + $0x20] ss:$8 sps:$4 sm:$0xff]   ;;  %v10078_v56 = vld [vmem:[%s13568_s9 + $0x34] ss:$8 sps:$4 sm:$0xff]   ;;  %v10076_v57 = vld [vmem:[%s13568_s9 + $0x30] ss:$8 sps:$4 sm:$0xff]  }
 0x2a5   : > { %v2236_v16 = vmax.f32 %v2234_v4, %v2235_v9  ;;  %v2264_v18 = vsel %vm1468_vm7, %v2229_v12, %v2263_v15  ;;  %v2250_v20 = vmax.f32 %v2248_v5, %v2249_v13  ;;  %v10081_v58 = vld [vmem:[%s13568_s9 + $0x124] ss:$8 sps:$4 sm:$0xff]   ;;  %v10079_v59 = vld [vmem:[%s13568_s9 + $0x120] ss:$8 sps:$4 sm:$0xff]   ;;  %v10087_v61 = vld [vmem:[%s13568_s9 + $0x134] ss:$8 sps:$4 sm:$0xff]  }
 0x2a6   : > { %v10084_v47 = vld [vmem:[%s13568_s9 + $0x44] ss:$8 sps:$4 sm:$0xff]   ;;  %v10082_v60 = vld [vmem:[%s13568_s9 + $0x40] ss:$8 sps:$4 sm:$0xff]   ;;  %v10085_v62 = vld [vmem:[%s13568_s9 + $0x130] ss:$8 sps:$4 sm:$0xff]  }
 0x2a7   : > { %v2265_v21 = vsel %vm1470_vm8, %v2236_v16, %v2264_v18  ;;  %v10090_v63 = vld [vmem:[%s13568_s9 + $0x54] ss:$8 sps:$4 sm:$0xff]   ;;  %v10088_v0 = vld [vmem:[%s13568_s9 + $0x50] ss:$8 sps:$4 sm:$0xff]   ;;  %v10093_v1 = vld [vmem:[%s13568_s9 + $0x144] ss:$8 sps:$4 sm:$0xff]  }
 0x2a8   : > { %v2266_v22 = vsel %vm1472_vm9, %v2243_v19, %v2265_v21  ;;  %v10091_v2 = vld [vmem:[%s13568_s9 + $0x140] ss:$8 sps:$4 sm:$0xff]   ;;  %v10096_v4 = vld [vmem:[%s13568_s9 + $0x64] ss:$8 sps:$4 sm:$0xff]   ;;  %v10097_v5 = vld [vmem:[%s13568_s9 + $0x150] ss:$8 sps:$4 sm:$0xff]  }
 0x2a9   : > { %v2267_v24 = vsel %vm1474_vm10, %v2250_v20, %v2266_v22  ;;  %v10094_v3 = vld [vmem:[%s13568_s9 + $0x60] ss:$8 sps:$4 sm:$0xff]   ;;  %v10099_v7 = vld [vmem:[%s13568_s9 + $0x154] ss:$8 sps:$4 sm:$0xff]   ;;  %v10105_v10 = vld [vmem:[%s13568_s9 + $0x164] ss:$8 sps:$4 sm:$0xff]  }
 0x2aa   : > { %2269 = vst [vmem:[#allocation4 + $0x1] sm:$0xff] %v2267_v24  ;;  %v2273_v26 = vpack.c.bf16 %v2267_v24, %v2267_v24  ;;  %v10102_v8 = vld [vmem:[%s13568_s9 + $0x74] ss:$8 sps:$4 sm:$0xff]   ;;  %v10100_v11 = vld [vmem:[%s13568_s9 + $0x70] ss:$8 sps:$4 sm:$0xff]  }
 0x2ab   : > { %v10108_v12 = vld [vmem:[%s13568_s9 + $0x84] ss:$8 sps:$4 sm:$0xff]   ;;  %v10103_v9 = vld [vmem:[%s13568_s9 + $0x160] ss:$8 sps:$4 sm:$0xff]   ;;  %v10111_v13 = vld [vmem:[%s13568_s9 + $0x174] ss:$8 sps:$4 sm:$0xff]  }
 0x2ac   : > { %2422 = vmatmul.mubr.bf16.vlgmr.msra.gmra.mrb[16].mxu0 %v2273_v26  ;;  %v10106_v15 = vld [vmem:[%s13568_s9 + $0x80] ss:$8 sps:$4 sm:$0xff]   ;;  %v10114_v16 = vld [vmem:[%s13568_s9 + $0x94] ss:$8 sps:$4 sm:$0xff]   ;;  %v10109_v18 = vld [vmem:[%s13568_s9 + $0x170] ss:$8 sps:$4 sm:$0xff]  }
 0x2ad   : > { %2649 = vmatpush1.bf16.msra.mxu0 %v10037_v25  ;;  %2680 = vmatprep.mubr.bf16.mxu0 %v10899_v23  ;;  %v10117_v19 = vld [vmem:[%s13568_s9 + $0x184] ss:$8 sps:$4 sm:$0xff]   ;;  %v10112_v20 = vld [vmem:[%s13568_s9 + $0x90] ss:$8 sps:$4 sm:$0xff]   ;;  %v10115_v22 = vld [vmem:[%s13568_s9 + $0x180] ss:$8 sps:$4 sm:$0xff]  }
 0x2ae   : > { %2650 = vmatprep.subr.bf16.mxu0 %v10042_v28  ;;  %v10120_v21 = vld [vmem:[%s13568_s9 + $0xa4] ss:$8 sps:$4 sm:$0xff]   ;;  %v10123_v24 = vld [vmem:[%s13568_s9 + $0x194] ss:$8 sps:$4 sm:$0xff]   ;;  %v10118_v25 = vld [vmem:[%s13568_s9 + $0xa0] ss:$8 sps:$4 sm:$0xff]  }
 0x2af   : > { %v10121_v26 = vld [vmem:[%s13568_s9 + $0x190] ss:$8 sps:$4 sm:$0xff]   ;;  %v10126_v28 = vld [vmem:[%s13568_s9 + $0xb4] ss:$8 sps:$4 sm:$0xff]  }
 0x2b1   : > { %v2270_v50 = vld [vmem:[#allocation4] sm:$0xff]  ;;  %2651 = vmatpush1.bf16.msra.mxu0 %v10040_v29  ;;  %v10124_v29 = vld [vmem:[%s13568_s9 + $0xb0] ss:$8 sps:$4 sm:$0xff]  }
 0x2b2   : > { %v2271_v33 = vpack.c.bf16 %v2270_v50, %v2270_v50  ;;  %2652 = vmatprep.subr.bf16.mxu0 %v10045_v30  ;;  %v2274_v48 = vld [vmem:[#allocation4 + $0x2] sm:$0xff] }
 0x2b3   : > { %v2275_v51 = vpack.c.bf16 %v2274_v48, %v2274_v48  ;;  %v10129_v30 = vld [vmem:[%s13568_s9 + $0x1a4] ss:$8 sps:$4 sm:$0xff]   ;;  %v10127_v50 = vld [vmem:[%s13568_s9 + $0x1a0] ss:$8 sps:$4 sm:$0xff]  }
 0x2b4   : > { %2543 = vmatmul.mubr.bf16.vlgmr.msra.gmra.mrb[16].mxu1 %v2271_v33  ;;  %v10135_v33 = vld [vmem:[%s13568_s9 + $0x1b4] ss:$8 sps:$4 sm:$0xff]   ;;  %v10156_v48 = vld [vmem:[%s13569_s10 + $0x104] ss:$8 sps:$4 sm:$0xff]  }
 0x2b5   : > { %2653 = vmatpush1.bf16.msra.mxu0 %v10043_v31  ;;  %2985 = vmatpush1.bf16.msra.mxu1 %v10067_v32  ;;  %v10132_v31 = vld [vmem:[%s13568_s9 + $0xc4] ss:$8 sps:$4 sm:$0xff]   ;;  %v10130_v32 = vld [vmem:[%s13568_s9 + $0xc0] ss:$8 sps:$4 sm:$0xff]  }
 0x2b6   : > { %2654 = vmatprep.subr.bf16.mxu0 %v10048_v34  ;;  %2986 = vmatprep.subr.bf16.mxu1 %v10075_v35  ;;  %v10133_v34 = vld [vmem:[%s13568_s9 + $0x1b0] ss:$8 sps:$4 sm:$0xff]   ;;  %v10138_v35 = vld [vmem:[%s13568_s9 + $0xd4] ss:$8 sps:$4 sm:$0xff]  }
 0x2b9   : > { %2655 = vmatpush1.bf16.msra.mxu0 %v10046_v36  ;;  %2987 = vmatpush1.bf16.msra.mxu1 %v10073_v37  ;;  %v10136_v36 = vld [vmem:[%s13568_s9 + $0xd0] ss:$8 sps:$4 sm:$0xff]   ;;  %v10141_v37 = vld [vmem:[%s13568_s9 + $0x1c4] ss:$8 sps:$4 sm:$0xff]  }
 0x2ba   : > { %2656 = vmatprep.subr.bf16.mxu0 %v10051_v38  ;;  %2988 = vmatprep.subr.bf16.mxu1 %v10081_v58  ;;  %v10139_v38 = vld [vmem:[%s13568_s9 + $0x1c0] ss:$8 sps:$4 sm:$0xff]  }
 0x2bd   : > { %2657 = vmatpush1.bf16.msra.mxu0 %v10049_v39  ;;  %2989 = vmatpush1.bf16.msra.mxu1 %v10079_v59  ;;  %v10142_v39 = vld [vmem:[%s13568_s9 + $0xe0] ss:$8 sps:$4 sm:$0xff]  }
 0x2be   : > { %2658 = vmatprep.subr.bf16.mxu0 %v10054_v40  ;;  %2990 = vmatprep.subr.bf16.mxu1 %v10087_v61  ;;  %v10144_v40 = vld [vmem:[%s13568_s9 + $0xe4] ss:$8 sps:$4 sm:$0xff]  }
 0x2c1   : > { %2659 = vmatpush1.bf16.msra.mxu0 %v10052_v41  ;;  %2991 = vmatpush1.bf16.msra.mxu1 %v10085_v62  ;;  %v10147_v41 = vld [vmem:[%s13568_s9 + $0x1d4] ss:$8 sps:$4 sm:$0xff]   ;;  %v11819_v62 = vsub.s32 0, %v11253_v17 }
 0x2c2   : > { %2660 = vmatprep.subr.bf16.mxu0 %v10057_v42  ;;  %2992 = vmatprep.subr.bf16.mxu1 %v10093_v1  ;;  %v10145_v42 = vld [vmem:[%s13568_s9 + $0x1d0] ss:$8 sps:$4 sm:$0xff]  }
 0x2c5   : > { %2661 = vmatpush1.bf16.msra.mxu0 %v10055_v43  ;;  %2993 = vmatpush1.bf16.msra.mxu1 %v10091_v2  ;;  %v10150_v43 = vld [vmem:[%s13568_s9 + $0xf4] ss:$8 sps:$4 sm:$0xff]  }
 0x2c6   : > { %2662 = vmatprep.subr.bf16.mxu0 %v10060_v44  ;;  %2994 = vmatprep.subr.bf16.mxu1 %v10099_v7  ;;  %v10153_v44 = vld [vmem:[%s13568_s9 + $0x1e4] ss:$8 sps:$4 sm:$0xff]  }
 0x2c9   : > { %2663 = vmatpush1.bf16.msra.mxu0 %v10058_v45  ;;  %2995 = vmatpush1.bf16.msra.mxu1 %v10097_v5  ;;  %v10148_v45 = vld [vmem:[%s13568_s9 + $0xf0] ss:$8 sps:$4 sm:$0xff]  }
 0x2ca   : > { %3185 = vmatprep.subr.bf16.mxu0 %v10063_v46  ;;  %2996 = vmatprep.subr.bf16.mxu1 %v10105_v10  ;;  %v10151_v46 = vld [vmem:[%s13568_s9 + $0x1e0] ss:$8 sps:$4 sm:$0xff]  }
 0x2cc   : > { %2681 = vmatmul.mubr.bf16.vlgmr.msra.gmra.mrb[20].mxu0 %v2275_v51  ;;  %v10157_v51 = vld [vmem:[%s13568_s9 + $0x1f0] ss:$8 sps:$4 sm:$0xff]  }
 0x2cd   : > { %3186 = vmatpush1.bf16.msra.mxu0 %v10061_v49  ;;  %2997 = vmatpush1.bf16.msra.mxu1 %v10103_v9  ;;  %v10159_v49 = vld [vmem:[%s13568_s9 + $0x1f4] ss:$8 sps:$4 sm:$0xff]  }
 0x2ce   : > { %3187 = vmatprep.subr.bf16.mxu0 %v10066_v52  ;;  %2998 = vmatprep.subr.bf16.mxu1 %v10111_v13  ;;  %v10165_v52 = vld [vmem:[%s13568_s9 + $0x204] ss:$8 sps:$4 sm:$0xff]  }
 0x2d1   : > { %3188 = vmatpush1.bf16.msra.mxu0 %v10064_v53  ;;  %2999 = vmatpush1.bf16.msra.mxu1 %v10109_v18 }
 0x2d2   : > { %3189 = vmatprep.subr.bf16.mxu0 %v10072_v54  ;;  %3000 = vmatprep.subr.bf16.mxu1 %v10117_v19 }
 0x2d5   : > { %3190 = vmatpush1.bf16.msra.mxu0 %v10070_v55  ;;  %3001 = vmatpush1.bf16.msra.mxu1 %v10115_v22 }
 0x2d6   : > { %3191 = vmatprep.subr.bf16.mxu0 %v10078_v56  ;;  %3002 = vmatprep.subr.bf16.mxu1 %v10123_v24 }
 0x2d9   : > { %3192 = vmatpush1.bf16.msra.mxu0 %v10076_v57  ;;  %3003 = vmatpush1.bf16.msra.mxu1 %v10121_v26 }
 0x2da   : > { %3193 = vmatprep.subr.bf16.mxu0 %v10084_v47  ;;  %3004 = vmatprep.subr.bf16.mxu1 %v10129_v30 }
 0x2dd   : > { %3194 = vmatpush1.bf16.msra.mxu0 %v10082_v60  ;;  %3005 = vmatpush1.bf16.msra.mxu1 %v10127_v50 }
 0x2de   : > { %3195 = vmatprep.subr.bf16.mxu0 %v10090_v63  ;;  %3006 = vmatprep.subr.bf16.mxu1 %v10135_v33  ;;  %v2691_v63 = vld [vmem:[%s13567_s8] sm:$0x3] }
 0x2df   : > { %v2696_v1 = vrot.slane %v2691_v63, %v11819_v62 }
 0x2e1   : > { %3196 = vmatpush1.bf16.msra.mxu0 %v10088_v0  ;;  %3007 = vmatpush1.bf16.msra.mxu1 %v10133_v34  ;;  %v11825_v0 = vsub.s32 1, %v11253_v17 }
 0x2e2   : > { %3197 = vmatprep.subr.bf16.mxu0 %v10096_v4  ;;  %3008 = vmatprep.subr.bf16.mxu1 %v10141_v37 }
 0x2e5   : > { %3198 = vmatpush1.bf16.msra.mxu0 %v10094_v3  ;;  %3009 = vmatpush1.bf16.msra.mxu1 %v10139_v38  ;;  %v2700_v3 = vrot.slane %v2691_v63, %v11825_v0  ;;  %v10187_v63 = vld [vmem:[%s13568_s9 + $0x240] ss:$8 sps:$4 sm:$0xff]  }
 0x2e6   : > { %3199 = vmatprep.subr.bf16.mxu0 %v10102_v8  ;;  %3010 = vmatprep.subr.bf16.mxu1 %v10147_v41 }
 0x2e9   : > { %3200 = vmatpush1.bf16.msra.mxu0 %v10100_v11  ;;  %3011 = vmatpush1.bf16.msra.mxu1 %v10145_v42  ;;  %v10163_v42 = vld [vmem:[%s13568_s9 + $0x200] ss:$8 sps:$4 sm:$0xff]  }
 0x2ea   : > { %3201 = vmatprep.subr.bf16.mxu0 %v10108_v12  ;;  %3012 = vmatprep.subr.bf16.mxu1 %v10153_v44  ;;  %v10168_v44 = vld [vmem:[%s13569_s10 + $0x124] ss:$8 sps:$4 sm:$0xff]  }
 0x2ed   : > { %3202 = vmatpush1.bf16.msra.mxu0 %v10106_v15  ;;  %3013 = vmatpush1.bf16.msra.mxu1 %v10151_v46 }
 0x2ee   : > { %3203 = vmatprep.subr.bf16.mxu0 %v10114_v16  ;;  %3014 = vmatprep.subr.bf16.mxu1 %v10159_v49  ;;  %v10174_v49 = vld [vmem:[%s13569_s10 + $0x134] ss:$8 sps:$4 sm:$0xff]  }
 0x2f1   : > { %3204 = vmatpush1.bf16.msra.mxu0 %v10112_v20  ;;  %3015 = vmatpush1.bf16.msra.mxu1 %v10157_v51  ;;  %v10169_v51 = vld [vmem:[%s13568_s9 + $0x210] ss:$8 sps:$4 sm:$0xff]  }
 0x2f2   : > { %3205 = vmatprep.subr.bf16.mxu0 %v10120_v21  ;;  %3425 = vmatprep.subr.bf16.mxu1 %v10165_v52  ;;  %v10177_v52 = vld [vmem:[%s13568_s9 + $0x224] ss:$8 sps:$4 sm:$0xff]  }
 0x2f5   : > { %3206 = vmatpush1.bf16.msra.mxu0 %v10118_v25 }
 0x2f6   : > { %3207 = vmatprep.subr.bf16.mxu0 %v10126_v28  ;;  %v10154_v28 = vld [vmem:[%s13569_s10 + $0x100] ss:$8 sps:$4 sm:$0xff]  }
 0x2f9   : > { %3208 = vmatpush1.bf16.msra.mxu0 %v10124_v29  ;;  %v10162_v29 = vld [vmem:[%s13569_s10 + $0x114] ss:$8 sps:$4 sm:$0xff]  }
 0x2fa   : > { %3209 = vmatprep.subr.bf16.mxu0 %v10132_v31 }
 0x2fd   : > { %3210 = vmatpush1.bf16.msra.mxu0 %v10130_v32 }
 0x2fe   : > { %3211 = vmatprep.subr.bf16.mxu0 %v10138_v35 }
 0x301   : > { %3212 = vmatpush1.bf16.msra.mxu0 %v10136_v36  ;;  %v10160_v36 = vld [vmem:[%s13569_s10 + $0x110] ss:$8 sps:$4 sm:$0xff]  }
 0x302   : > { %3213 = vmatprep.subr.bf16.mxu0 %v10144_v40 }
 0x305   : > { %3214 = vmatpush1.bf16.msra.mxu0 %v10142_v39 }
 0x306   : > { %3215 = vmatprep.subr.bf16.mxu0 %v10150_v43 }
 0x309   : > { %3216 = vmatpush1.bf16.msra.mxu0 %v10148_v45  ;;  %v10171_v45 = vld [vmem:[%s13568_s9 + $0x214] ss:$8 sps:$4 sm:$0xff]  }
 0x30a   : > { %3708 = vmatprep.subr.bf16.mxu0 %v10156_v48  ;;  %v10166_v48 = vld [vmem:[%s13569_s10 + $0x120] ss:$8 sps:$4 sm:$0xff]  }
 0x37f   : > { %v2423_v53 = vpop.f32.mrb[16].mxu0 }
 0x380   : > { %v2425_v54 = vpop.f32.mrb[17].mxu0 }
 0x381   : > { %v2427_v55 = vpop.f32.mrb[18].mxu0 }
 0x382   : > { %v2428_v56 = vpop.f32.mrb[19].mxu0  ;;  %v10175_v55 = vld [vmem:[%s13568_s9 + $0x220] ss:$8 sps:$4 sm:$0xff]  }
 0x383   : > { %v10183_v56 = vld [vmem:[%s13568_s9 + $0x234] ss:$8 sps:$4 sm:$0xff]  }
 0x387   : > { %v2544_v57 = vpop.f32.mrb[16].mxu1 }
 0x388   : > { %v2545_v58 = vadd.f32 %v2544_v57, %v2423_v53  ;;  %v2546_v59 = vpop.f32.mrb[17].mxu1  ;;  %v10172_v53 = vld [vmem:[%s13569_s10 + $0x130] ss:$8 sps:$4 sm:$0xff]   ;;  %v10178_v57 = vld [vmem:[%s13569_s10 + $0x140] ss:$8 sps:$4 sm:$0xff]  }
 0x389   : > { %v2547_v47 = vadd.f32 %v2546_v59, %v2425_v54  ;;  %v2548_v60 = vpop.f32.mrb[18].mxu1  ;;  %v10180_v54 = vld [vmem:[%s13569_s10 + $0x144] ss:$8 sps:$4 sm:$0xff]   ;;  %v10181_v59 = vld [vmem:[%s13568_s9 + $0x230] ss:$8 sps:$4 sm:$0xff]  }
 0x38a   : > { %v2549_v61 = vpop.f32.mrb[19].mxu1  ;;  %v10184_v60 = vld [vmem:[%s13569_s10 + $0x150] ss:$8 sps:$4 sm:$0xff]  }
 0x38b   : > { %v10192_v61 = vld [vmem:[%s13569_s10 + $0x164] ss:$8 sps:$4 sm:$0xff]  }
 0x39f   : > { %v2682_v2 = vpop.f32.mrb[20].mxu0 }
 0x3a0   : > { %v2689_v4 = vadd.f32 %v2682_v2, %v2545_v58  ;;  %v2684_v5 = vpop.f32.mrb[21].mxu0  ;;  %v10186_v58 = vld [vmem:[%s13569_s10 + $0x154] ss:$8 sps:$4 sm:$0xff]   ;;  %v10190_v2 = vld [vmem:[%s13569_s10 + $0x160] ss:$8 sps:$4 sm:$0xff]  }
 0x3a1   : > { %v2690_v7 = vadd.f32 %v2684_v5, %v2547_v47  ;;  %v2686_v8 = vpop.f32.mrb[22].mxu0  ;;  %v10189_v47 = vld [vmem:[%s13568_s9 + $0x244] ss:$8 sps:$4 sm:$0xff]  }
 0x3a2   : > { %v2703_v10 = vadd.f32 %v2696_v1, %v2689_v4  ;;  %v2687_v11 = vpop.f32.mrb[23].mxu0  ;;  %v10195_v1 = vld [vmem:[%s13568_s9 + $0x254] ss:$8 sps:$4 sm:$0xff]   ;;  %v10193_v4 = vld [vmem:[%s13568_s9 + $0x250] ss:$8 sps:$4 sm:$0xff]  }
 0x3a3   : > { %v2704_v12 = vadd.f32 %v2700_v3, %v2690_v7  ;;  %v10198_v3 = vld [vmem:[%s13569_s10 + $0x174] ss:$8 sps:$4 sm:$0xff]   ;;  %v10201_v5 = vld [vmem:[%s13568_s9 + $0x264] ss:$8 sps:$4 sm:$0xff]   ;;  %v10196_v7 = vld [vmem:[%s13569_s10 + $0x170] ss:$8 sps:$4 sm:$0xff]  }
 0x3a4   : > { %v2705_v9 = vmax.f32 %v2703_v10, 0.0  ;;  %v10204_v8 = vld [vmem:[%s13569_s10 + $0x184] ss:$8 sps:$4 sm:$0xff]   ;;  %v10199_v10 = vld [vmem:[%s13568_s9 + $0x260] ss:$8 sps:$4 sm:$0xff]  }
 0x3a5   : > { %v2706_v13 = vmax.f32 %v2704_v12, 0.0  ;;  %v10207_v11 = vld [vmem:[%s13568_s9 + $0x274] ss:$8 sps:$4 sm:$0xff]   ;;  %v10202_v12 = vld [vmem:[%s13569_s10 + $0x180] ss:$8 sps:$4 sm:$0xff]  }
 0x3a6   : > { %v2718_v15 = vrot.slane %v2705_v9, 7  ;;  %v10210_v9 = vld [vmem:[%s13569_s10 + $0x194] ss:$8 sps:$4 sm:$0xff]  }
 0x3a7   : > { %v2719_v16 = vrot.slane %v2706_v13, 7  ;;  %v10205_v13 = vld [vmem:[%s13568_s9 + $0x270] ss:$8 sps:$4 sm:$0xff]  }
 0x3a8   : > { %2722 = vst [vmem:[#allocation5] sm:$0xfe] %v2718_v15  ;;  %2724 = vst [vmem:[#allocation5 + $0x10] sm:$0x1] %v2718_v15  ;;  %v10213_v15 = vld [vmem:[%s13568_s9 + $0x284] ss:$8 sps:$4 sm:$0xff]  }
 0x3a9   : > { %2723 = vst [vmem:[#allocation5 + $0x8] sm:$0xfe] %v2719_v16  ;;  %2725 = vst [vmem:[#allocation5 + $0x18] sm:$0x1] %v2719_v16  ;;  %v10208_v16 = vld [vmem:[%s13569_s10 + $0x190] ss:$8 sps:$4 sm:$0xff]  }
 0x3af   : > { %v2726_v18 = vld [vmem:[#allocation5] sm:$0xff]  ;;  %v2732_v20 = vld [vmem:[#allocation5 + $0x10] sm:$0x1] }
 0x3b0   : > { %v2730_v19 = vld [vmem:[#allocation5] sm:$0xfe]  ;;  %v2727_v21 = vld [vmem:[#allocation5 + $0x8] sm:$0xff]  ;;  %v2733_v24 = vld [vmem:[#allocation5 + $0x18] sm:$0x1]  ;;  %v11837_v50 = vpack.c.bf16 %v2726_v18, %v2726_v18 }
 0x3b1   : > { %v2731_v22 = vld [vmem:[#allocation5 + $0x8] sm:$0xfe]  ;;  %v2734_v25 = vpack.c.bf16 %v2732_v20, %v2730_v19  ;;  %v11829_v26 = vpack.c.bf16 %v2727_v21, %v2727_v21  ;;  %v2739_v33 = vld [vmem:[#allocation5 + $0x18] sm:$0x3]  ;;  %v10216_v18 = vld [vmem:[%s13569_s10 + $0x1a4] ss:$8 sps:$4 sm:$0xff]  }
 0x3b2   : > { %v2735_v30 = vpack.c.bf16 %v2733_v24, %v2731_v22  ;;  %v2737_v32 = vld [vmem:[#allocation5 + $0x8] sm:$0xfc]  ;;  %v10211_v19 = vld [vmem:[%s13568_s9 + $0x280] ss:$8 sps:$4 sm:$0xff]  }
 0x3b3   : > { %v2811_v31 = vshll.u32 %v2734_v25, 16  ;;  %3217 = vmatprep.mubr.bf16.mxu0 %v11829_v26  ;;  %v2741_v39 = vpack.c.bf16 %v2739_v33, %v2737_v32  ;;  %v2809_v40 = vshrl.u32 %v2734_v25, 16  ;;  %v10219_v20 = vld [vmem:[%s13568_s9 + $0x294] ss:$8 sps:$4 sm:$0xff]   ;;  %v10214_v21 = vld [vmem:[%s13569_s10 + $0x1a0] ss:$8 sps:$4 sm:$0xff]  }
 0x3b4   : > { %v2818_v34 = vshll.u32 %v2735_v30, 16  ;;  %3218 = vmatmul.mubr.bf16.vlgmr.msra.gmra.mrb[24].mxu0 %v11837_v50  ;;  %v2816_v37 = vshrl.u32 %v2735_v30, 16  ;;  %v10222_v22 = vld [vmem:[%s13569_s10 + $0x1b4] ss:$8 sps:$4 sm:$0xff]   ;;  %v10217_v24 = vld [vmem:[%s13568_s9 + $0x290] ss:$8 sps:$4 sm:$0xff]  }
 0x3b5   : > { %v2813_v35 = vrot.slane %v2811_v31, 1  ;;  %3709 = vmatpush1.bf16.msra.mxu0 %v10154_v28  ;;  %v11855_v46 = vrot.slane %v2741_v39, 1  ;;  %v10225_v25 = vld [vmem:[%s13568_s9 + $0x2a4] ss:$8 sps:$4 sm:$0xff]   ;;  %v10220_v28 = vld [vmem:[%s13569_s10 + $0x1b0] ss:$8 sps:$4 sm:$0xff]  }
 0x3b6   : > { %v2820_v38 = vrot.slane %v2818_v34, 1  ;;  %3710 = vmatprep.subr.bf16.mxu0 %v10162_v29  ;;  %v10228_v29 = vld [vmem:[%s13569_s10 + $0x1c4] ss:$8 sps:$4 sm:$0xff]   ;;  %v10223_v30 = vld [vmem:[%s13568_s9 + $0x2a0] ss:$8 sps:$4 sm:$0xff]  }
 0x3b7   : > { %v11847_v43 = vor.u32 %v2813_v35, %v2809_v40  ;;  %v10231_v31 = vld [vmem:[%s13568_s9 + $0x2b4] ss:$8 sps:$4 sm:$0xff]   ;;  %v10226_v32 = vld [vmem:[%s13569_s10 + $0x1c0] ss:$8 sps:$4 sm:$0xff]   ;;  %v10229_v34 = vld [vmem:[%s13568_s9 + $0x2b0] ss:$8 sps:$4 sm:$0xff]  }
 0x3b8   : > { %v2821_v41 = vor.u32 %v2820_v38, %v2816_v37  ;;  %v10234_v33 = vld [vmem:[%s13569_s10 + $0x1d4] ss:$8 sps:$4 sm:$0xff]   ;;  %v10237_v35 = vld [vmem:[%s13568_s9 + $0x2c4] ss:$8 sps:$4 sm:$0xff]   ;;  %v10235_v38 = vld [vmem:[%s13568_s9 + $0x2c0] ss:$8 sps:$4 sm:$0xff]  }
 0x3b9   : > { %3711 = vmatpush1.bf16.msra.mxu0 %v10160_v36  ;;  %v10232_v36 = vld [vmem:[%s13569_s10 + $0x1d0] ss:$8 sps:$4 sm:$0xff]   ;;  %v10240_v37 = vld [vmem:[%s13569_s10 + $0x1e4] ss:$8 sps:$4 sm:$0xff]   ;;  %v10243_v39 = vld [vmem:[%s13568_s9 + $0x2d4] ss:$8 sps:$4 sm:$0xff]  }
 0x3ba   : > { %3016 = vmatprep.mubr.bf16.mxu1 %v2821_v41  ;;  %3740 = vmatprep.mubr.bf16.mxu0 %v2821_v41  ;;  %v10238_v40 = vld [vmem:[%s13569_s10 + $0x1e0] ss:$8 sps:$4 sm:$0xff]   ;;  %v10246_v41 = vld [vmem:[%s13569_s10 + $0x1f4] ss:$8 sps:$4 sm:$0xff]  }
 0x3bb   : > { %3017 = vmatmul.mubr.bf16.vlgmr.msra.gmra.mrb[20].mxu1 %v11847_v43  ;;  %3712 = vmatprep.subr.bf16.mxu0 %v10168_v44  ;;  %v10249_v44 = vld [vmem:[%s13568_s9 + $0x2e4] ss:$8 sps:$4 sm:$0xff]  }
 0x3bc   : > { %3426 = vmatpush1.bf16.msra.mxu1 %v10163_v42  ;;  %3457 = vmatprep.mubr.bf16.mxu1 %v11855_v46  ;;  %v10241_v42 = vld [vmem:[%s13568_s9 + $0x2d0] ss:$8 sps:$4 sm:$0xff]  }
 0x3bd   : > { %3427 = vmatprep.subr.bf16.mxu1 %v10171_v45  ;;  %3713 = vmatpush1.bf16.msra.mxu0 %v10166_v48  ;;  %v10244_v45 = vld [vmem:[%s13569_s10 + $0x1f0] ss:$8 sps:$4 sm:$0xff]   ;;  %v10252_v48 = vld [vmem:[%s13569_s10 + $0x204] ss:$8 sps:$4 sm:$0xff]  }
 0x3be   : > { %3714 = vmatprep.subr.bf16.mxu0 %v10174_v49  ;;  %v10247_v49 = vld [vmem:[%s13568_s9 + $0x2e0] ss:$8 sps:$4 sm:$0xff]  }
 0x3c0   : > { %3428 = vmatpush1.bf16.msra.mxu1 %v10169_v51  ;;  %v10255_v51 = vld [vmem:[%s13568_s9 + $0x2f4] ss:$8 sps:$4 sm:$0xff]  }
 0x3c1   : > { %3429 = vmatprep.subr.bf16.mxu1 %v10177_v52  ;;  %3715 = vmatpush1.bf16.msra.mxu0 %v10172_v53  ;;  %v10250_v52 = vld [vmem:[%s13569_s10 + $0x200] ss:$8 sps:$4 sm:$0xff]   ;;  %v2736_v53 = vld [vmem:[#allocation5] sm:$0xfc] }
 0x3c2   : > { %3716 = vmatprep.subr.bf16.mxu0 %v10180_v54  ;;  %v2738_v54 = vld [vmem:[#allocation5 + $0x10] sm:$0x3] }
 0x3c4   : > { %3430 = vmatpush1.bf16.msra.mxu1 %v10175_v55  ;;  %v10258_v55 = vld [vmem:[%s13569_s10 + $0x214] ss:$8 sps:$4 sm:$0xff]  }
 0x3c5   : > { %3431 = vmatprep.subr.bf16.mxu1 %v10183_v56  ;;  %3717 = vmatpush1.bf16.msra.mxu0 %v10178_v57  ;;  %v10253_v56 = vld [vmem:[%s13568_s9 + $0x2f0] ss:$8 sps:$4 sm:$0xff]   ;;  %v2740_v57 = vpack.c.bf16 %v2738_v54, %v2736_v53  ;;  %v10336_v53 = vld [vmem:[%s13569_s10 + $0x2e4] ss:$8 sps:$4 sm:$0xff]   ;;  %v10331_v54 = vld [vmem:[%s13569_s10 + $0xc0] ss:$8 sps:$4 sm:$0xff]  }
 0x3c6   : > { %3718 = vmatprep.subr.bf16.mxu0 %v10186_v58  ;;  %v10261_v58 = vld [vmem:[%s13569_s10 + $0x4] ss:$8 sps:$4 sm:$0xff]  }
 0x3c8   : > { %3432 = vmatpush1.bf16.msra.mxu1 %v10181_v59  ;;  %v10256_v59 = vld [vmem:[%s13569_s10 + $0x210] ss:$8 sps:$4 sm:$0xff]  }
 0x3c9   : > { %3433 = vmatprep.subr.bf16.mxu1 %v10189_v47  ;;  %3719 = vmatpush1.bf16.msra.mxu0 %v10184_v60  ;;  %v10264_v47 = vld [vmem:[%s13569_s10 + $0x224] ss:$8 sps:$4 sm:$0xff]   ;;  %v12050_v60 = vrot.slane %v2740_v57, 1  ;;  %v10342_v57 = vld [vmem:[%s13569_s10 + $0x2f4] ss:$8 sps:$4 sm:$0xff]  }
 0x3ca   : > { %3720 = vmatprep.subr.bf16.mxu0 %v10192_v61  ;;  %v10262_v61 = vld [vmem:[%s13569_s10 + $0x220] ss:$8 sps:$4 sm:$0xff]  }
 0x3cc   : > { %3434 = vmatpush1.bf16.msra.mxu1 %v10187_v63  ;;  %v10270_v63 = vld [vmem:[%s13569_s10 + $0x234] ss:$8 sps:$4 sm:$0xff]  }
 0x3cd   : > { %3435 = vmatprep.subr.bf16.mxu1 %v10195_v1  ;;  %3721 = vmatpush1.bf16.msra.mxu0 %v10190_v2  ;;  %v10265_v1 = vld [vmem:[%s13569_s10 + $0x10] ss:$8 sps:$4 sm:$0xff]   ;;  %v10273_v2 = vld [vmem:[%s13569_s10 + $0x24] ss:$8 sps:$4 sm:$0xff]  }
 0x3ce   : > { %3722 = vmatprep.subr.bf16.mxu0 %v10198_v3  ;;  %v10268_v3 = vld [vmem:[%s13569_s10 + $0x230] ss:$8 sps:$4 sm:$0xff]  }
 0x3d0   : > { %3436 = vmatpush1.bf16.msra.mxu1 %v10193_v4  ;;  %v10276_v4 = vld [vmem:[%s13569_s10 + $0x244] ss:$8 sps:$4 sm:$0xff]  }
 0x3d1   : > { %3437 = vmatprep.subr.bf16.mxu1 %v10201_v5  ;;  %3723 = vmatpush1.bf16.msra.mxu0 %v10196_v7  ;;  %v10279_v5 = vld [vmem:[%s13569_s10 + $0x34] ss:$8 sps:$4 sm:$0xff]   ;;  %v10274_v7 = vld [vmem:[%s13569_s10 + $0x240] ss:$8 sps:$4 sm:$0xff]  }
 0x3d2   : > { %3724 = vmatprep.subr.bf16.mxu0 %v10204_v8  ;;  %v10282_v8 = vld [vmem:[%s13569_s10 + $0x254] ss:$8 sps:$4 sm:$0xff]  }
 0x3d4   : > { %3438 = vmatpush1.bf16.msra.mxu1 %v10199_v10  ;;  %v10277_v10 = vld [vmem:[%s13569_s10 + $0x30] ss:$8 sps:$4 sm:$0xff]  }
 0x3d5   : > { %3439 = vmatprep.subr.bf16.mxu1 %v10207_v11  ;;  %3725 = vmatpush1.bf16.msra.mxu0 %v10202_v12  ;;  %v10285_v11 = vld [vmem:[%s13569_s10 + $0x44] ss:$8 sps:$4 sm:$0xff]   ;;  %v10280_v12 = vld [vmem:[%s13569_s10 + $0x250] ss:$8 sps:$4 sm:$0xff]  }
 0x3d6   : > { %3726 = vmatprep.subr.bf16.mxu0 %v10210_v9  ;;  %v10288_v9 = vld [vmem:[%s13569_s10 + $0x264] ss:$8 sps:$4 sm:$0xff]  }
 0x3d8   : > { %3440 = vmatpush1.bf16.msra.mxu1 %v10205_v13  ;;  %v10283_v13 = vld [vmem:[%s13569_s10 + $0x40] ss:$8 sps:$4 sm:$0xff]  }
 0x3d9   : > { %3441 = vmatprep.subr.bf16.mxu1 %v10213_v15  ;;  %3727 = vmatpush1.bf16.msra.mxu0 %v10208_v16  ;;  %v10291_v15 = vld [vmem:[%s13569_s10 + $0x54] ss:$8 sps:$4 sm:$0xff]   ;;  %v10286_v16 = vld [vmem:[%s13569_s10 + $0x260] ss:$8 sps:$4 sm:$0xff]  }
 0x3da   : > { %3728 = vmatprep.subr.bf16.mxu0 %v10216_v18  ;;  %v10294_v18 = vld [vmem:[%s13569_s10 + $0x274] ss:$8 sps:$4 sm:$0xff]  }
 0x3dc   : > { %3442 = vmatpush1.bf16.msra.mxu1 %v10211_v19  ;;  %v10289_v19 = vld [vmem:[%s13569_s10 + $0x50] ss:$8 sps:$4 sm:$0xff]  }
 0x3dd   : > { %3443 = vmatprep.subr.bf16.mxu1 %v10219_v20  ;;  %3729 = vmatpush1.bf16.msra.mxu0 %v10214_v21  ;;  %v10297_v20 = vld [vmem:[%s13569_s10 + $0x64] ss:$8 sps:$4 sm:$0xff]   ;;  %v10292_v21 = vld [vmem:[%s13569_s10 + $0x270] ss:$8 sps:$4 sm:$0xff]  }
 0x3de   : > { %3730 = vmatprep.subr.bf16.mxu0 %v10222_v22  ;;  %v10300_v22 = vld [vmem:[%s13569_s10 + $0x284] ss:$8 sps:$4 sm:$0xff]  }
 0x3e0   : > { %3444 = vmatpush1.bf16.msra.mxu1 %v10217_v24  ;;  %v10295_v24 = vld [vmem:[%s13569_s10 + $0x60] ss:$8 sps:$4 sm:$0xff]  }
 0x3e1   : > { %3445 = vmatprep.subr.bf16.mxu1 %v10225_v25  ;;  %3731 = vmatpush1.bf16.msra.mxu0 %v10220_v28  ;;  %v10303_v25 = vld [vmem:[%s13569_s10 + $0x74] ss:$8 sps:$4 sm:$0xff]   ;;  %v10298_v28 = vld [vmem:[%s13569_s10 + $0x280] ss:$8 sps:$4 sm:$0xff]  }
 0x3e2   : > { %3732 = vmatprep.subr.bf16.mxu0 %v10228_v29  ;;  %v10306_v29 = vld [vmem:[%s13569_s10 + $0x294] ss:$8 sps:$4 sm:$0xff]  }
 0x3e4   : > { %3446 = vmatpush1.bf16.msra.mxu1 %v10223_v30  ;;  %v10301_v30 = vld [vmem:[%s13569_s10 + $0x70] ss:$8 sps:$4 sm:$0xff]  }
 0x3e5   : > { %3447 = vmatprep.subr.bf16.mxu1 %v10231_v31  ;;  %3733 = vmatpush1.bf16.msra.mxu0 %v10226_v32  ;;  %v10309_v31 = vld [vmem:[%s13569_s10 + $0x84] ss:$8 sps:$4 sm:$0xff]   ;;  %v10304_v32 = vld [vmem:[%s13569_s10 + $0x290] ss:$8 sps:$4 sm:$0xff]  }
 0x3e6   : > { %3734 = vmatprep.subr.bf16.mxu0 %v10234_v33  ;;  %v10312_v33 = vld [vmem:[%s13569_s10 + $0x2a4] ss:$8 sps:$4 sm:$0xff]  }
 0x3e8   : > { %3448 = vmatpush1.bf16.msra.mxu1 %v10229_v34  ;;  %v10307_v34 = vld [vmem:[%s13569_s10 + $0x80] ss:$8 sps:$4 sm:$0xff]  }
 0x3e9   : > { %3449 = vmatprep.subr.bf16.mxu1 %v10237_v35  ;;  %3735 = vmatpush1.bf16.msra.mxu0 %v10232_v36  ;;  %v10315_v35 = vld [vmem:[%s13569_s10 + $0x94] ss:$8 sps:$4 sm:$0xff]   ;;  %v10310_v36 = vld [vmem:[%s13569_s10 + $0x2a0] ss:$8 sps:$4 sm:$0xff]  }
 0x3ea   : > { %3736 = vmatprep.subr.bf16.mxu0 %v10240_v37  ;;  %v10318_v37 = vld [vmem:[%s13569_s10 + $0x2b4] ss:$8 sps:$4 sm:$0xff]  }
 0x3ec   : > { %3450 = vmatpush1.bf16.msra.mxu1 %v10235_v38  ;;  %v10313_v38 = vld [vmem:[%s13569_s10 + $0x90] ss:$8 sps:$4 sm:$0xff]  }
 0x3ed   : > { %3451 = vmatprep.subr.bf16.mxu1 %v10243_v39  ;;  %3737 = vmatpush1.bf16.msra.mxu0 %v10238_v40  ;;  %v10321_v39 = vld [vmem:[%s13569_s10 + $0xa4] ss:$8 sps:$4 sm:$0xff]   ;;  %v10316_v40 = vld [vmem:[%s13569_s10 + $0x2b0] ss:$8 sps:$4 sm:$0xff]  }
 0x3ee   : > { %3738 = vmatprep.subr.bf16.mxu0 %v10246_v41  ;;  %v10324_v41 = vld [vmem:[%s13569_s10 + $0x2c4] ss:$8 sps:$4 sm:$0xff]  }
 0x3f0   : > { %3452 = vmatpush1.bf16.msra.mxu1 %v10241_v42  ;;  %v10319_v42 = vld [vmem:[%s13569_s10 + $0xa0] ss:$8 sps:$4 sm:$0xff]  }
 0x3f1   : > { %3453 = vmatprep.subr.bf16.mxu1 %v10249_v44  ;;  %3739 = vmatpush1.bf16.msra.mxu0 %v10244_v45  ;;  %v10327_v44 = vld [vmem:[%s13569_s10 + $0xb4] ss:$8 sps:$4 sm:$0xff]   ;;  %v10322_v45 = vld [vmem:[%s13569_s10 + $0x2c0] ss:$8 sps:$4 sm:$0xff]  }
 0x3f2   : > { %4143 = vmatprep.subr.bf16.mxu0 %v10252_v48  ;;  %v10330_v48 = vld [vmem:[%s13569_s10 + $0x2d4] ss:$8 sps:$4 sm:$0xff]  }
 0x3f4   : > { %3454 = vmatpush1.bf16.msra.mxu1 %v10247_v49  ;;  %3741 = vmatmul.mubr.bf16.vlgmr.msra.gmra.mrb[28].mxu0 %v11847_v43  ;;  %v10259_v43 = vld [vmem:[%s13569_s10] ss:$8 sps:$4 sm:$0xff]   ;;  %v10325_v49 = vld [vmem:[%s13569_s10 + $0xb0] ss:$8 sps:$4 sm:$0xff]  }
 0x3f5   : > { %3455 = vmatprep.subr.bf16.mxu1 %v10255_v51  ;;  %4144 = vmatpush1.bf16.msra.mxu0 %v10250_v52  ;;  %v10333_v51 = vld [vmem:[%s13569_s10 + $0xc4] ss:$8 sps:$4 sm:$0xff]   ;;  %v10328_v52 = vld [vmem:[%s13569_s10 + $0x2d0] ss:$8 sps:$4 sm:$0xff]  }
 0x3f6   : > { %4175 = vmatprep.mubr.bf16.mxu0 %v11855_v46  ;;  %4145 = vmatprep.subr.bf16.mxu0 %v10258_v55  ;;  %v10267_v46 = vld [vmem:[%s13569_s10 + $0x14] ss:$8 sps:$4 sm:$0xff]  }
 0x3f7   : > { %v10339_v55 = vld [vmem:[%s13569_s10 + $0xd4] ss:$8 sps:$4 sm:$0xff]  }
 0x3f8   : > { %3456 = vmatpush1.bf16.msra.mxu1 %v10253_v56  ;;  %v10334_v56 = vld [vmem:[%s13569_s10 + $0x2e0] ss:$8 sps:$4 sm:$0xff]  }
 0x3f9   : > { %3909 = vmatprep.subr.bf16.mxu1 %v10261_v58  ;;  %4146 = vmatpush1.bf16.msra.mxu0 %v10256_v59  ;;  %v10337_v58 = vld [vmem:[%s13569_s10 + $0xd0] ss:$8 sps:$4 sm:$0xff]   ;;  %v10345_v59 = vld [vmem:[%s13569_s10 + $0xe4] ss:$8 sps:$4 sm:$0xff]  }
 0x3fa   : > { %4147 = vmatprep.subr.bf16.mxu0 %v10264_v47  ;;  %v10340_v47 = vld [vmem:[%s13569_s10 + $0x2f0] ss:$8 sps:$4 sm:$0xff]  }
 0x3fb   : > { %3458 = vmatmul.mubr.bf16.vlgmr.msra.gmra.mrb[24].mxu1 %v12050_v60 }
 0x3fc   : > { %3910 = vmatpush1.bf16.msra.mxu1 %v10259_v43  ;;  %3941 = vmatprep.mubr.bf16.mxu1 %v11829_v26  ;;  %v10271_v26 = vld [vmem:[%s13569_s10 + $0x20] ss:$8 sps:$4 sm:$0xff]  }
 0x3fd   : > { %3911 = vmatprep.subr.bf16.mxu1 %v10267_v46  ;;  %4148 = vmatpush1.bf16.msra.mxu0 %v10262_v61  ;;  %v10343_v43 = vld [vmem:[%s13569_s10 + $0xe0] ss:$8 sps:$4 sm:$0xff]   ;;  %v10348_v46 = vld [vmem:[%s13569_s10 + $0xf4] ss:$8 sps:$4 sm:$0xff]   ;;  %v10346_v61 = vld [vmem:[%s13569_s10 + $0xf0] ss:$8 sps:$4 sm:$0xff]  }
 0x3fe   : > { %4149 = vmatprep.subr.bf16.mxu0 %v10270_v63 }
 0x400   : > { %3912 = vmatpush1.bf16.msra.mxu1 %v10265_v1 }
 0x401   : > { %3913 = vmatprep.subr.bf16.mxu1 %v10273_v2  ;;  %4150 = vmatpush1.bf16.msra.mxu0 %v10268_v3 }
 0x402   : > { %4151 = vmatprep.subr.bf16.mxu0 %v10276_v4 }
 0x404   : > { %3914 = vmatpush1.bf16.msra.mxu1 %v10271_v26 }
 0x405   : > { %3915 = vmatprep.subr.bf16.mxu1 %v10279_v5  ;;  %4152 = vmatpush1.bf16.msra.mxu0 %v10274_v7 }
 0x406   : > { %4153 = vmatprep.subr.bf16.mxu0 %v10282_v8 }
 0x408   : > { %3916 = vmatpush1.bf16.msra.mxu1 %v10277_v10 }
 0x409   : > { %3917 = vmatprep.subr.bf16.mxu1 %v10285_v11  ;;  %4154 = vmatpush1.bf16.msra.mxu0 %v10280_v12  ;;  %v10352_v11 = vld [vmem:[%s13571_s12 + $0x128] ss:$12 sps:$4 sm:$0xff]  }
 0x40a   : > { %4155 = vmatprep.subr.bf16.mxu0 %v10288_v9  ;;  %v10355_v12 = vld [vmem:[%s13571_s12 + $0x13c] ss:$12 sps:$4 sm:$0xff]   ;;  %v10353_v9 = vld [vmem:[%s13571_s12 + $0x138] ss:$12 sps:$4 sm:$0xff]  }
 0x40c   : > { %3918 = vmatpush1.bf16.msra.mxu1 %v10283_v13  ;;  %v10356_v13 = vld [vmem:[%s13571_s12 + $0x140] ss:$12 sps:$4 sm:$0xff]  }
 0x40d   : > { %3919 = vmatprep.subr.bf16.mxu1 %v10291_v15  ;;  %4156 = vmatpush1.bf16.msra.mxu0 %v10286_v16  ;;  %v10359_v15 = vld [vmem:[%s13571_s12 + $0x154] ss:$12 sps:$4 sm:$0xff]   ;;  %v10357_v16 = vld [vmem:[%s13571_s12 + $0x150] ss:$12 sps:$4 sm:$0xff]  }
 0x40e   : > { %4157 = vmatprep.subr.bf16.mxu0 %v10294_v18  ;;  %v10360_v18 = vld [vmem:[%s13571_s12 + $0x158] ss:$12 sps:$4 sm:$0xff]  }
 0x410   : > { %3920 = vmatpush1.bf16.msra.mxu1 %v10289_v19  ;;  %v10363_v19 = vld [vmem:[%s13571_s12 + $0x16c] ss:$12 sps:$4 sm:$0xff]  }
 0x411   : > { %3921 = vmatprep.subr.bf16.mxu1 %v10297_v20  ;;  %4158 = vmatpush1.bf16.msra.mxu0 %v10292_v21  ;;  %v10361_v20 = vld [vmem:[%s13571_s12 + $0x168] ss:$12 sps:$4 sm:$0xff]   ;;  %v10364_v21 = vld [vmem:[%s13571_s12 + $0x170] ss:$12 sps:$4 sm:$0xff]  }
 0x412   : > { %4159 = vmatprep.subr.bf16.mxu0 %v10300_v22  ;;  %v10367_v22 = vld [vmem:[%s13571_s12 + $0x184] ss:$12 sps:$4 sm:$0xff]  }
 0x414   : > { %3922 = vmatpush1.bf16.msra.mxu1 %v10295_v24  ;;  %v10365_v24 = vld [vmem:[%s13571_s12 + $0x180] ss:$12 sps:$4 sm:$0xff]  }
 0x415   : > { %3923 = vmatprep.subr.bf16.mxu1 %v10303_v25  ;;  %4160 = vmatpush1.bf16.msra.mxu0 %v10298_v28  ;;  %v10368_v25 = vld [vmem:[%s13571_s12 + $0x188] ss:$12 sps:$4 sm:$0xff]  }
 0x416   : > { %4161 = vmatprep.subr.bf16.mxu0 %v10306_v29  ;;  %v10371_v28 = vld [vmem:[%s13571_s12 + $0x19c] ss:$12 sps:$4 sm:$0xff]   ;;  %v10369_v29 = vld [vmem:[%s13571_s12 + $0x198] ss:$12 sps:$4 sm:$0xff]  }
 0x418   : > { %3924 = vmatpush1.bf16.msra.mxu1 %v10301_v30  ;;  %v10372_v30 = vld [vmem:[%s13571_s12 + $0x1a0] ss:$12 sps:$4 sm:$0xff]  }
 0x419   : > { %3925 = vmatprep.subr.bf16.mxu1 %v10309_v31  ;;  %4162 = vmatpush1.bf16.msra.mxu0 %v10304_v32  ;;  %v10375_v31 = vld [vmem:[%s13571_s12 + $0x1b4] ss:$12 sps:$4 sm:$0xff]   ;;  %v10373_v32 = vld [vmem:[%s13571_s12 + $0x1b0] ss:$12 sps:$4 sm:$0xff]  }
 0x41a   : > { %4163 = vmatprep.subr.bf16.mxu0 %v10312_v33  ;;  %v10376_v33 = vld [vmem:[%s13571_s12 + $0x1b8] ss:$12 sps:$4 sm:$0xff]  }
 0x41c   : > { %3926 = vmatpush1.bf16.msra.mxu1 %v10307_v34  ;;  %v10379_v34 = vld [vmem:[%s13571_s12 + $0x1cc] ss:$12 sps:$4 sm:$0xff]  }
 0x41d   : > { %3927 = vmatprep.subr.bf16.mxu1 %v10315_v35  ;;  %4164 = vmatpush1.bf16.msra.mxu0 %v10310_v36  ;;  %v10377_v35 = vld [vmem:[%s13571_s12 + $0x1c8] ss:$12 sps:$4 sm:$0xff]   ;;  %v10380_v36 = vld [vmem:[%s13571_s12 + $0x1d0] ss:$12 sps:$4 sm:$0xff]  }
 0x41e   : > { %4165 = vmatprep.subr.bf16.mxu0 %v10318_v37  ;;  %v10381_v37 = vld [vmem:[%s13571_s12 + $0x1e0] ss:$12 sps:$4 sm:$0xff]  }
 0x420   : > { %3928 = vmatpush1.bf16.msra.mxu1 %v10313_v38  ;;  %v10383_v38 = vld [vmem:[%s13571_s12 + $0x1e4] ss:$12 sps:$4 sm:$0xff]  }
 0x421   : > { %3929 = vmatprep.subr.bf16.mxu1 %v10321_v39  ;;  %4166 = vmatpush1.bf16.msra.mxu0 %v10316_v40  ;;  %v10384_v39 = vld [vmem:[%s13571_s12 + $0x1e8] ss:$12 sps:$4 sm:$0xff]   ;;  %v10385_v40 = vld [vmem:[%s13571_s12 + $0x1f8] ss:$12 sps:$4 sm:$0xff]  }
 0x422   : > { %4167 = vmatprep.subr.bf16.mxu0 %v10324_v41  ;;  %v10388_v41 = vld [vmem:[%s13571_s12 + $0x200] ss:$12 sps:$4 sm:$0xff]  }
 0x424   : > { %3930 = vmatpush1.bf16.msra.mxu1 %v10319_v42  ;;  %v10391_v42 = vld [vmem:[%s13571_s12 + $0x214] ss:$12 sps:$4 sm:$0xff]  }
 0x425   : > { %3931 = vmatprep.subr.bf16.mxu1 %v10327_v44  ;;  %4168 = vmatpush1.bf16.msra.mxu0 %v10322_v45  ;;  %v10389_v44 = vld [vmem:[%s13571_s12 + $0x210] ss:$12 sps:$4 sm:$0xff]   ;;  %v10392_v45 = vld [vmem:[%s13571_s12 + $0x218] ss:$12 sps:$4 sm:$0xff]  }
 0x426   : > { %4169 = vmatprep.subr.bf16.mxu0 %v10330_v48  ;;  %v10395_v48 = vld [vmem:[%s13571_s12 + $0x22c] ss:$12 sps:$4 sm:$0xff]  }
 0x428   : > { %3932 = vmatpush1.bf16.msra.mxu1 %v10325_v49  ;;  %v10393_v49 = vld [vmem:[%s13571_s12 + $0x228] ss:$12 sps:$4 sm:$0xff]  }
 0x429   : > { %3933 = vmatprep.subr.bf16.mxu1 %v10333_v51  ;;  %4170 = vmatpush1.bf16.msra.mxu0 %v10328_v52  ;;  %v10396_v51 = vld [vmem:[%s13571_s12 + $0x230] ss:$12 sps:$4 sm:$0xff]  }
 0x42a   : > { %4171 = vmatprep.subr.bf16.mxu0 %v10336_v53  ;;  %v10399_v52 = vld [vmem:[%s13571_s12 + $0x4] ss:$12 sps:$4 sm:$0xff]  }
 0x42c   : > { %3934 = vmatpush1.bf16.msra.mxu1 %v10331_v54 }
 0x42d   : > { %3935 = vmatprep.subr.bf16.mxu1 %v10339_v55  ;;  %4172 = vmatpush1.bf16.msra.mxu0 %v10334_v56 }
 0x42e   : > { %4173 = vmatprep.subr.bf16.mxu0 %v10342_v57 }
 0x430   : > { %3936 = vmatpush1.bf16.msra.mxu1 %v10337_v58 }
 0x431   : > { %3937 = vmatprep.subr.bf16.mxu1 %v10345_v59  ;;  %4174 = vmatpush1.bf16.msra.mxu0 %v10340_v47 }
 0x432   : > { %4696 = vmatprep.subr.bf16.mxu0 %v10899_v23 }
 0x434   : > { %3938 = vmatpush1.bf16.msra.mxu1 %v10343_v43  ;;  %4176 = vmatmul.mubr.bf16.vlgmr.msra.gmra.mrb[32].mxu0 %v12050_v60  ;;  %v10351_v60 = vld [vmem:[%s13571_s12 + $0x124] ss:$12 sps:$4 sm:$0xff]  }
 0x435   : > { %3939 = vmatprep.subr.bf16.mxu1 %v10348_v46  ;;  %4697 = vmatpush1.bf16.msra.mxu0 %v10352_v11 }
 0x436   : > { %4698 = vmatprep.subr.bf16.mxu0 %v10899_v23 }
 0x438   : > { %3940 = vmatpush1.bf16.msra.mxu1 %v10346_v61 }
 0x439   : > { %4655 = vmatprep.subr.bf16.mxu1 %v10351_v60  ;;  %4699 = vmatpush1.bf16.msra.mxu0 %v10356_v13 }
 0x43a   : > { %4700 = vmatprep.subr.bf16.mxu0 %v10899_v23 }
 0x43b   : > { %3942 = vmatmul.mubr.bf16.vlgmr.msra.gmra.mrb[28].mxu1 %v11837_v50  ;;  %v10349_v50 = vld [vmem:[%s13571_s12 + $0x120] ss:$12 sps:$4 sm:$0xff]  }
 0x43c   : > { %4656 = vmatpush1.bf16.msra.mxu1 %v10349_v50 }
 0x43d   : > { %4657 = vmatprep.subr.bf16.mxu1 %v10355_v12  ;;  %4701 = vmatpush1.bf16.msra.mxu0 %v10360_v18 }
 0x43e   : > { %4702 = vmatprep.subr.bf16.mxu0 %v10899_v23 }
 0x440   : > { %4658 = vmatpush1.bf16.msra.mxu1 %v10353_v9 }
 0x441   : > { %4659 = vmatprep.subr.bf16.mxu1 %v10359_v15  ;;  %4703 = vmatpush1.bf16.msra.mxu0 %v10364_v21 }
 0x442   : > { %4704 = vmatprep.subr.bf16.mxu0 %v10899_v23 }
 0x444   : > { %4660 = vmatpush1.bf16.msra.mxu1 %v10357_v16 }
 0x445   : > { %4661 = vmatprep.subr.bf16.mxu1 %v10363_v19  ;;  %4705 = vmatpush1.bf16.msra.mxu0 %v10368_v25 }
 0x446   : > { %4706 = vmatprep.subr.bf16.mxu0 %v10899_v23 }
 0x448   : > { %4662 = vmatpush1.bf16.msra.mxu1 %v10361_v20 }
 0x449   : > { %4663 = vmatprep.subr.bf16.mxu1 %v10367_v22  ;;  %4707 = vmatpush1.bf16.msra.mxu0 %v10372_v30 }
 0x44a   : > { %4708 = vmatprep.subr.bf16.mxu0 %v10899_v23 }
 0x44c   : > { %4664 = vmatpush1.bf16.msra.mxu1 %v10365_v24 }
 0x44d   : > { %4665 = vmatprep.subr.bf16.mxu1 %v10371_v28  ;;  %4709 = vmatpush1.bf16.msra.mxu0 %v10376_v33 }
 0x44e   : > { %4710 = vmatprep.subr.bf16.mxu0 %v10899_v23 }
 0x450   : > { %4666 = vmatpush1.bf16.msra.mxu1 %v10369_v29 }
 0x451   : > { %4667 = vmatprep.subr.bf16.mxu1 %v10375_v31  ;;  %4711 = vmatpush1.bf16.msra.mxu0 %v10380_v36 }
 0x452   : > { %4712 = vmatprep.subr.bf16.mxu0 %v10899_v23 }
 0x454   : > { %4668 = vmatpush1.bf16.msra.mxu1 %v10373_v32 }
 0x455   : > { %4669 = vmatprep.subr.bf16.mxu1 %v10379_v34  ;;  %4713 = vmatpush1.bf16.msra.mxu0 %v10384_v39 }
 0x456   : > { %4714 = vmatprep.subr.bf16.mxu0 %v10899_v23 }
 0x458   : > { %4670 = vmatpush1.bf16.msra.mxu1 %v10377_v35 }
 0x459   : > { %4671 = vmatprep.subr.bf16.mxu1 %v10383_v38  ;;  %4715 = vmatpush1.bf16.msra.mxu0 %v10388_v41 }
 0x45a   : > { %4716 = vmatprep.subr.bf16.mxu0 %v10899_v23 }
 0x45c   : > { %4672 = vmatpush1.bf16.msra.mxu1 %v10381_v37 }
 0x45d   : > { %4673 = vmatprep.subr.bf16.mxu1 %v10387_v14  ;;  %4717 = vmatpush1.bf16.msra.mxu0 %v10392_v45 }
 0x45e   : > { %4718 = vmatprep.subr.bf16.mxu0 %v10899_v23 }
 0x460   : > { %4674 = vmatpush1.bf16.msra.mxu1 %v10385_v40 }
 0x461   : > { %4675 = vmatprep.subr.bf16.mxu1 %v10391_v42  ;;  %4719 = vmatpush1.bf16.msra.mxu0 %v10396_v51 }
 0x462   : > { %4972 = vmatprep.subr.bf16.mxu0 %v10899_v23 }
 0x464   : > { %4676 = vmatpush1.bf16.msra.mxu1 %v10389_v44 }
 0x465   : > { %4677 = vmatprep.subr.bf16.mxu1 %v10395_v48 }
 0x468   : > { %4678 = vmatpush1.bf16.msra.mxu1 %v10393_v49 }
 0x469   : > { %4931 = vmatprep.subr.bf16.mxu1 %v10399_v52 }
 0x487   : > { %v3219_v63 = vpop.f32.mrb[24].mxu0 }
 0x488   : > { %v3221_v1 = vpop.f32.mrb[25].mxu0 }
 0x489   : > { %v3223_v2 = vpop.f32.mrb[26].mxu0 }
 0x48a   : > { %v3224_v3 = vpop.f32.mrb[27].mxu0 }
 0x48e   : > { %v3018_v4 = vpop.f32.mrb[20].mxu1 }
 0x48f   : > { %v12228_v26 = vadd.f32 %v3219_v63, %v3018_v4  ;;  %v3020_v5 = vpop.f32.mrb[21].mxu1 }
 0x490   : > { %v12230_v7 = vadd.f32 %v3221_v1, %v3020_v5  ;;  %v3022_v8 = vpop.f32.mrb[22].mxu1  ;;  %v2742_v1 = vld [vmem:[%s13570_s11] sm:$0x3] }
 0x491   : > { %v3023_v10 = vpop.f32.mrb[23].mxu1  ;;  %v3472_v4 = vrot.slane %v2742_v1, %v11819_v62  ;;  %v3476_v5 = vrot.slane %v2742_v1, %v11825_v0 }
 0x4c7   : > { %v3742_v53 = vpop.f32.mrb[28].mxu0 }
 0x4c8   : > { %v3744_v54 = vpop.f32.mrb[29].mxu0 }
 0x4c9   : > { %v3746_v55 = vpop.f32.mrb[30].mxu0 }
 0x4ca   : > { %v3747_v56 = vpop.f32.mrb[31].mxu0 }
 0x4ce   : > { %v3459_v57 = vpop.f32.mrb[24].mxu1 }
 0x4cf   : > { %v3466_v58 = vadd.f32 %v3459_v57, %v12228_v26  ;;  %v3461_v59 = vpop.f32.mrb[25].mxu1 }
 0x4d0   : > { %v3467_v47 = vadd.f32 %v3461_v59, %v12230_v7  ;;  %v3463_v43 = vpop.f32.mrb[26].mxu1 }
 0x4d1   : > { %v3464_v46 = vpop.f32.mrb[27].mxu1  ;;  %v3479_v7 = vadd.f32 %v3472_v4, %v3466_v58 }
 0x4d2   : > { %v3480_v9 = vadd.f32 %v3476_v5, %v3467_v47 }
 0x4d3   : > { %v3481_v18 = vmax.f32 %v3479_v7, 0.0 }
 0x4d4   : > { %v3482_v20 = vmax.f32 %v3480_v9, 0.0 }
 0x507   : > { %v4177_v61 = vpop.f32.mrb[32].mxu0 }
 0x508   : > { %v4179_v63 = vpop.f32.mrb[33].mxu0 }
 0x509   : > { %v4181_v2 = vpop.f32.mrb[34].mxu0 }
 0x50a   : > { %v4182_v3 = vpop.f32.mrb[35].mxu0 }
 0x50e   : > { %v3943_v8 = vpop.f32.mrb[28].mxu1 }
 0x50f   : > { %v3944_v10 = vadd.f32 %v3943_v8, %v3742_v53  ;;  %v3945_v26 = vpop.f32.mrb[29].mxu1 }
 0x510   : > { %v3946_v60 = vadd.f32 %v3945_v26, %v3744_v54  ;;  %v3947_v50 = vpop.f32.mrb[30].mxu1 }
 0x511   : > { %v4184_v11 = vadd.f32 %v4177_v61, %v3944_v10  ;;  %v3948_v12 = vpop.f32.mrb[31].mxu1 }
 0x512   : > { %v4185_v13 = vadd.f32 %v4179_v63, %v3946_v60 }
 0x513   : > { %v4186_v15 = vadd.f32 %v4184_v11, %v3472_v4 }
 0x514   : > { %v4187_v16 = vadd.f32 %v4185_v13, %v3476_v5 }
 0x515   : > { %v4188_v19 = vmax.f32 %v4186_v15, 0.0 }
 0x516   : > { %v4189_v21 = vmax.f32 %v4187_v16, 0.0 }
 0x517   : > { %v4190_v22 = vmax.f32 %v3481_v18, %v4188_v19 }
 0x518   : > { %v4191_v24 = vmax.f32 %v3482_v20, %v4189_v21 }
 0x51a   : > { %v4194_v25 = vcombine.low %v4190_v22, %v4191_v24  ;;  %v4195_v28 = vcombine.high %v4190_v22, %v4191_v24 }
 0x51c   : > { %v4202_v29 = vrot.slane %v4194_v25, %v11256_v27  ;;  %v4209_v30 = vrot.slane %v4195_v28, %v11256_v27 }
 0x51e   : > { %v4210_v31 = vcombine.high %v4202_v29, %v4202_v29  ;;  %v4211_v32 = vcombine.high %v4209_v30, %v4209_v30  ;;  %v4218_v33 = vrot.slane %v4202_v29, %v11256_v27  ;;  %v4234_v34 = vrot.slane %v4209_v30, %v11256_v27 }
 0x520   : > { %v4219_v35 = vcombine.high %v4218_v33, %v4218_v33  ;;  %v4226_v36 = vrot.slane %v4210_v31, %v11256_v27  ;;  %v4235_v37 = vcombine.high %v4234_v34, %v4234_v34  ;;  %v4242_v38 = vrot.slane %v4211_v32, %v11256_v27 }
 0x521   : > { %v4252_v39 = vsel %vm1331_vm3, %v4218_v33, -inf  ;;  %v4281_v14 = vsel %vm1331_vm3, %v4234_v34, -inf }
 0x522   : > { %v4227_v40 = vcombine.high %v4226_v36, %v4226_v36  ;;  %v4243_v41 = vcombine.high %v4242_v38, %v4242_v38  ;;  %v4253_v42 = vrot.slane %v4252_v39, 4  ;;  %v4260_v44 = vsel %vm4259_vm13, %v4219_v35, -inf }
 0x523   : > { %v4261_v45 = vrot.slane %v4260_v44, 4  ;;  %v4267_v48 = vsel %vm1331_vm3, %v4226_v36, -inf  ;;  %v4282_v49 = vrot.slane %v4281_v14, 4  ;;  %v4288_v51 = vsel %vm4259_vm13, %v4235_v37, -inf }
 0x524   : > { %v4254_v52 = vmax.f32 %v4252_v39, %v4253_v42  ;;  %v4268_v53 = vrot.slane %v4267_v48, 4  ;;  %v4274_v54 = vsel %vm4259_vm13, %v4227_v40, -inf  ;;  %v4289_v27 = vrot.slane %v4288_v51, 4 }
 0x525   : > { %v4262_v55 = vmax.f32 %v4260_v44, %v4261_v45  ;;  %v4275_v56 = vrot.slane %v4274_v54, 4  ;;  %v4283_v57 = vmax.f32 %v4281_v14, %v4282_v49  ;;  %v4295_v58 = vsel %vm1331_vm3, %v4242_v38, -inf }
 0x526   : > { %v4255_v59 = vrot.slane %v4254_v52, 2  ;;  %v4269_v47 = vmax.f32 %v4267_v48, %v4268_v53  ;;  %v4290_v43 = vmax.f32 %v4288_v51, %v4289_v27  ;;  %v4296_v46 = vrot.slane %v4295_v58, 4 }
 0x527   : > { %v4263_v61 = vrot.slane %v4262_v55, 2  ;;  %v4276_v63 = vmax.f32 %v4274_v54, %v4275_v56  ;;  %v4284_v1 = vrot.slane %v4283_v57, 2  ;;  %v4302_v2 = vsel %vm4259_vm13, %v4243_v41, -inf }
 0x528   : > { %v4256_v3 = vmax.f32 %v4254_v52, %v4255_v59  ;;  %v4270_v4 = vrot.slane %v4269_v47, 2  ;;  %v4291_v5 = vrot.slane %v4290_v43, 2  ;;  %v4297_v8 = vmax.f32 %v4295_v58, %v4296_v46  ;;  %v10400_v58 = vld [vmem:[%s13571_s12 + $0x8] ss:$12 sps:$4 sm:$0xff]  }
 0x529   : > { %v4264_v10 = vmax.f32 %v4262_v55, %v4263_v61  ;;  %v4277_v26 = vrot.slane %v4276_v63, 2  ;;  %v4285_v60 = vmax.f32 %v4283_v57, %v4284_v1  ;;  %v4303_v50 = vrot.slane %v4302_v2, 4  ;;  %v10397_v57 = vld [vmem:[%s13571_s12] ss:$12 sps:$4 sm:$0xff]   ;;  %v10401_v61 = vld [vmem:[%s13571_s12 + $0x18] ss:$12 sps:$4 sm:$0xff]  }
 0x52a   : > { %v4257_v7 = vrot.slane %v4256_v3, 1  ;;  %v4271_v11 = vmax.f32 %v4269_v47, %v4270_v4  ;;  %v4292_v12 = vmax.f32 %v4290_v43, %v4291_v5  ;;  %v4298_v9 = vrot.slane %v4297_v8, 2  ;;  %v10403_v43 = vld [vmem:[%s13571_s12 + $0x1c] ss:$12 sps:$4 sm:$0xff]   ;;  %v10407_v1 = vld [vmem:[%s13571_s12 + $0x34] ss:$12 sps:$4 sm:$0xff]  }
 0x52b   : > { %v4265_v13 = vrot.slane %v4264_v10, 1  ;;  %v4278_v15 = vmax.f32 %v4276_v63, %v4277_v26  ;;  %v4286_v16 = vrot.slane %v4285_v60, 1  ;;  %v4304_v18 = vmax.f32 %v4302_v2, %v4303_v50  ;;  %v10404_v63 = vld [vmem:[%s13571_s12 + $0x20] ss:$12 sps:$4 sm:$0xff]   ;;  %v10405_v2 = vld [vmem:[%s13571_s12 + $0x30] ss:$12 sps:$4 sm:$0xff]  }
 0x52c   : > { %v4272_v19 = vrot.slane %v4271_v11, 1  ;;  %v4293_v20 = vrot.slane %v4292_v12, 1  ;;  %v4299_v21 = vmax.f32 %v4297_v8, %v4298_v9  ;;  %v4258_v25 = vmax.f32 %v4256_v3, %v4257_v7  ;;  %v10408_v3 = vld [vmem:[%s13571_s12 + $0x38] ss:$12 sps:$4 sm:$0xff]   ;;  %v10409_v5 = vld [vmem:[%s13571_s12 + $0x48] ss:$12 sps:$4 sm:$0xff]  }
 0x52d   : > { %v4279_v22 = vrot.slane %v4278_v15, 1  ;;  %v4305_v24 = vrot.slane %v4304_v18, 2  ;;  %v4266_v30 = vmax.f32 %v4264_v10, %v4265_v13  ;;  %v4287_v32 = vmax.f32 %v4285_v60, %v4286_v16  ;;  %v10411_v4 = vld [vmem:[%s13571_s12 + $0x4c] ss:$12 sps:$4 sm:$0xff]   ;;  %v10412_v8 = vld [vmem:[%s13571_s12 + $0x50] ss:$12 sps:$4 sm:$0xff]  }
 0x52e   : > { %v4273_v28 = vmax.f32 %v4271_v11, %v4272_v19  ;;  %v4300_v29 = vrot.slane %v4299_v21, 1  ;;  %v4294_v34 = vmax.f32 %v4292_v12, %v4293_v20  ;;  %v10415_v10 = vld [vmem:[%s13571_s12 + $0x64] ss:$12 sps:$4 sm:$0xff]   ;;  %v10413_v26 = vld [vmem:[%s13571_s12 + $0x60] ss:$12 sps:$4 sm:$0xff]  }
 0x52f   : > { %v4280_v31 = vmax.f32 %v4278_v15, %v4279_v22  ;;  %v4306_v33 = vmax.f32 %v4304_v18, %v4305_v24  ;;  %v10416_v60 = vld [vmem:[%s13571_s12 + $0x68] ss:$12 sps:$4 sm:$0xff]   ;;  %v10417_v7 = vld [vmem:[%s13571_s12 + $0x78] ss:$12 sps:$4 sm:$0xff]   ;;  %v10420_v11 = vld [vmem:[%s13571_s12 + $0x80] ss:$12 sps:$4 sm:$0xff]  }
 0x530   : > { %v4301_v35 = vmax.f32 %v4299_v21, %v4300_v29  ;;  %v4324_v36 = vsel %vm1464_vm5, %v4273_v28, %v4258_v25  ;;  %v10419_v50 = vld [vmem:[%s13571_s12 + $0x7c] ss:$12 sps:$4 sm:$0xff]   ;;  %v10423_v12 = vld [vmem:[%s13571_s12 + $0x94] ss:$12 sps:$4 sm:$0xff]   ;;  %v10424_v13 = vld [vmem:[%s13571_s12 + $0x98] ss:$12 sps:$4 sm:$0xff]  }
 0x531   : > { %v4307_v37 = vrot.slane %v4306_v33, 1  ;;  %v4325_v38 = vsel %vm1466_vm6, %v4287_v32, %v4324_v36  ;;  %v4327_v39 = vsel %vm1464_vm5, %v4280_v31, %v4266_v30  ;;  %v10421_v9 = vld [vmem:[%s13571_s12 + $0x90] ss:$12 sps:$4 sm:$0xff]   ;;  %v10427_v15 = vld [vmem:[%s13571_s12 + $0xac] ss:$12 sps:$4 sm:$0xff]  }
 0x532   : > { %v4326_v14 = vsel %vm1468_vm7, %v4301_v35, %v4325_v38  ;;  %v4328_v40 = vsel %vm1466_vm6, %v4294_v34, %v4327_v39  ;;  %v10425_v16 = vld [vmem:[%s13571_s12 + $0xa8] ss:$12 sps:$4 sm:$0xff]   ;;  %v10428_v18 = vld [vmem:[%s13571_s12 + $0xb0] ss:$12 sps:$4 sm:$0xff]   ;;  %v10429_v20 = vld [vmem:[%s13571_s12 + $0xc0] ss:$12 sps:$4 sm:$0xff]  }
 0x533   : > { %v4308_v41 = vmax.f32 %v4306_v33, %v4307_v37  ;;  %4332 = vst [vmem:[#allocation6] sm:$0x1e] %v4326_v14  ;;  %v10431_v19 = vld [vmem:[%s13571_s12 + $0xc4] ss:$12 sps:$4 sm:$0xff]   ;;  %v10432_v21 = vld [vmem:[%s13571_s12 + $0xc8] ss:$12 sps:$4 sm:$0xff]  }
 0x534   : > { %v10435_v22 = vld [vmem:[%s13571_s12 + $0xdc] ss:$12 sps:$4 sm:$0xff]   ;;  %v10433_v24 = vld [vmem:[%s13571_s12 + $0xd8] ss:$12 sps:$4 sm:$0xff]   ;;  %v10436_v25 = vld [vmem:[%s13571_s12 + $0xe0] ss:$12 sps:$4 sm:$0xff]  }
 0x535   : > { %v4329_v42 = vsel %vm1468_vm7, %v4308_v41, %v4328_v40  ;;  %v10439_v28 = vld [vmem:[%s13571_s12 + $0xf4] ss:$12 sps:$4 sm:$0xff]   ;;  %v10437_v29 = vld [vmem:[%s13571_s12 + $0xf0] ss:$12 sps:$4 sm:$0xff]   ;;  %v10440_v30 = vld [vmem:[%s13571_s12 + $0xf8] ss:$12 sps:$4 sm:$0xff]  }
 0x536   : > { %4334 = vst.msk [vmem:[#allocation6 + $0x8] sm:$0x1e] %vm4333_vm14, %v4329_v42  ;;  %v10443_v31 = vld [vmem:[%s13571_s12 + $0x10c] ss:$12 sps:$4 sm:$0xff]   ;;  %v10441_v33 = vld [vmem:[%s13571_s12 + $0x108] ss:$12 sps:$4 sm:$0xff]  }
 0x537   : > { %v10444_v34 = vld [vmem:[%s13571_s12 + $0x110] ss:$12 sps:$4 sm:$0xff]   ;;  %v10445_v38 = vld [vmem:[%s13571_s12 + $0x240] ss:$12 sps:$4 sm:$0xff]   ;;  %v10448_v14 = vld [vmem:[%s13571_s12 + $0x248] ss:$12 sps:$4 sm:$0xff]  }
 0x538   : > { %v10447_v35 = vld [vmem:[%s13571_s12 + $0x244] ss:$12 sps:$4 sm:$0xff]   ;;  %v10451_v41 = vld [vmem:[%s13571_s12 + $0x25c] ss:$12 sps:$4 sm:$0xff]  }
 0x539   : > { %v10449_v42 = vld [vmem:[%s13571_s12 + $0x258] ss:$12 sps:$4 sm:$0xff]  }
 0x53a   : > { %v4339_v44 = vld [vmem:[#allocation6] sm:$0x1e] }
 0x53b   : > { %v4341_v45 = vpack.c.bf16 %v4339_v44, %v4339_v44  ;;  %v4335_v36 = vld [vmem:[#allocation6] sm:$0xf]  ;;  %v10452_v44 = vld [vmem:[%s13571_s12 + $0x260] ss:$12 sps:$4 sm:$0xff]  }
 0x53c   : > { %v4337_v39 = vpack.c.bf16 %v4335_v36, %v4335_v36  ;;  %v10531_v36 = vld [vmem:[%s13573_s14 + $0x218] ss:$12 sps:$4 sm:$0xff]  }
 0x53d   : > { %v4340_v48 = vld [vmem:[#allocation6 + $0x8] sm:$0x1e]  ;;  %v4447_v49 = vshll.u32 %v4341_v45, 16  ;;  %v4445_v55 = vshrl.u32 %v4341_v45, 16  ;;  %v10455_v45 = vld [vmem:[%s13571_s12 + $0x274] ss:$12 sps:$4 sm:$0xff]  }
 0x53e   : > { %v4342_v51 = vpack.c.bf16 %v4340_v48, %v4340_v48  ;;  %v4336_v59 = vld [vmem:[#allocation6 + $0x8] sm:$0xf]  ;;  %v10453_v48 = vld [vmem:[%s13571_s12 + $0x270] ss:$12 sps:$4 sm:$0xff]  }
 0x53f   : > { %v4449_v53 = vrot.slane %v4447_v49, 1  ;;  %v4338_v46 = vpack.c.bf16 %v4336_v59, %v4336_v59  ;;  %v4344_v32 = vld [vmem:[#allocation6 + $0x8] sm:$0x3c]  ;;  %v10471_v59 = vld [vmem:[%s13571_s12 + $0x2d4] ss:$12 sps:$4 sm:$0xff]  }
 0x540   : > { %v4454_v52 = vshll.u32 %v4342_v51, 16  ;;  %v4452_v54 = vshrl.u32 %v4342_v51, 16  ;;  %v4346_v37 = vpack.c.bf16 %v4344_v32, %v4344_v32  ;;  %v10456_v49 = vld [vmem:[%s13571_s12 + $0x278] ss:$12 sps:$4 sm:$0xff]   ;;  %v10526_v32 = vld [vmem:[%s13573_s14 + $0x200] ss:$12 sps:$4 sm:$0xff]  }
 0x541   : > { %v4450_v47 = vor.u32 %v4449_v53, %v4445_v55  ;;  %v10459_v51 = vld [vmem:[%s13571_s12 + $0x28c] ss:$12 sps:$4 sm:$0xff]   ;;  %v10460_v53 = vld [vmem:[%s13571_s12 + $0x290] ss:$12 sps:$4 sm:$0xff]   ;;  %v10464_v55 = vld [vmem:[%s13571_s12 + $0x2a8] ss:$12 sps:$4 sm:$0xff]  }
 0x542   : > { %v4456_v27 = vrot.slane %v4454_v52, 1  ;;  %v5064_v40 = vrot.slane %v4346_v37, 1  ;;  %v10457_v52 = vld [vmem:[%s13571_s12 + $0x288] ss:$12 sps:$4 sm:$0xff]  }
 0x543   : > { %v10513_v37 = vld [vmem:[%s13573_s14 + $0x274] ss:$12 sps:$4 sm:$0xff]  }
 0x544   : > { %v4457_v56 = vor.u32 %v4456_v27, %v4452_v54  ;;  %v10463_v54 = vld [vmem:[%s13571_s12 + $0x2a4] ss:$12 sps:$4 sm:$0xff]   ;;  %v10461_v27 = vld [vmem:[%s13571_s12 + $0x2a0] ss:$12 sps:$4 sm:$0xff]  }
 0x546   : > { %8698 = vmatprep.mubr.msk.bf16.mxu1 %vm4651_vm15, %v4457_v56  ;;  %8699 = vmatprep.mubr.msk.bf16.mxu0 %vm4651_vm15, %v4457_v56  ;;  %v10467_v56 = vld [vmem:[%s13571_s12 + $0x2bc] ss:$12 sps:$4 sm:$0xff]  }
 0x547   : > { %4688 = vmatmul.mubr.bf16.vlgmr.msra.gmra.mrb[32].mxu1 %v4450_v47  ;;  %4729 = vmatmul.mubr.bf16.vlgmr.msra.gmra.mrb[36].mxu0 %v4450_v47  ;;  %v10469_v47 = vld [vmem:[%s13571_s12 + $0x2d0] ss:$12 sps:$4 sm:$0xff]  }
 0x548   : > { %4932 = vmatpush1.bf16.msra.mxu1 %v10397_v57  ;;  %4973 = vmatpush1.bf16.msra.mxu0 %v10400_v58  ;;  %v10465_v57 = vld [vmem:[%s13571_s12 + $0x2b8] ss:$12 sps:$4 sm:$0xff]   ;;  %v10468_v58 = vld [vmem:[%s13571_s12 + $0x2c0] ss:$12 sps:$4 sm:$0xff]  }
 0x549   : > { %8736 = vmatprep.mubr.msk.bf16.mxu1 %vm4651_vm15, %v4338_v46  ;;  %8737 = vmatprep.mubr.msk.bf16.mxu0 %vm4651_vm15, %v4338_v46  ;;  %v10475_v46 = vld [vmem:[%s13571_s12 + $0x2ec] ss:$12 sps:$4 sm:$0xff]  }
 0x54a   : > { %4933 = vmatprep.subr.bf16.mxu1 %v10403_v43  ;;  %4974 = vmatprep.subr.bf16.mxu0 %v10899_v23  ;;  %v10472_v43 = vld [vmem:[%s13571_s12 + $0x2d8] ss:$12 sps:$4 sm:$0xff]  }
 0x54c   : > { %4934 = vmatpush1.bf16.msra.mxu1 %v10401_v61  ;;  %4975 = vmatpush1.bf16.msra.mxu0 %v10404_v63  ;;  %v10473_v61 = vld [vmem:[%s13571_s12 + $0x2e8] ss:$12 sps:$4 sm:$0xff]   ;;  %v10476_v63 = vld [vmem:[%s13571_s12 + $0x2f0] ss:$12 sps:$4 sm:$0xff]  }
 0x54d   : > { %4935 = vmatprep.subr.bf16.mxu1 %v10407_v1  ;;  %4976 = vmatprep.subr.bf16.mxu0 %v10899_v23  ;;  %v10479_v1 = vld [vmem:[%s13571_s12 + $0x304] ss:$12 sps:$4 sm:$0xff]  }
 0x550   : > { %4936 = vmatpush1.bf16.msra.mxu1 %v10405_v2  ;;  %4977 = vmatpush1.bf16.msra.mxu0 %v10408_v3  ;;  %v10477_v2 = vld [vmem:[%s13571_s12 + $0x300] ss:$12 sps:$4 sm:$0xff]   ;;  %v10480_v3 = vld [vmem:[%s13571_s12 + $0x308] ss:$12 sps:$4 sm:$0xff]  }
 0x551   : > { %4937 = vmatprep.subr.bf16.mxu1 %v10411_v4  ;;  %4978 = vmatprep.subr.bf16.mxu0 %v10899_v23  ;;  %v10483_v4 = vld [vmem:[%s13571_s12 + $0x31c] ss:$12 sps:$4 sm:$0xff]  }
 0x554   : > { %4938 = vmatpush1.bf16.msra.mxu1 %v10409_v5  ;;  %4979 = vmatpush1.bf16.msra.mxu0 %v10412_v8  ;;  %v10481_v5 = vld [vmem:[%s13571_s12 + $0x318] ss:$12 sps:$4 sm:$0xff]   ;;  %v10484_v8 = vld [vmem:[%s13571_s12 + $0x320] ss:$12 sps:$4 sm:$0xff]  }
 0x555   : > { %4939 = vmatprep.subr.bf16.mxu1 %v10415_v10  ;;  %4980 = vmatprep.subr.bf16.mxu0 %v10899_v23  ;;  %v10487_v10 = vld [vmem:[%s13571_s12 + $0x334] ss:$12 sps:$4 sm:$0xff]  }
 0x558   : > { %4940 = vmatpush1.bf16.msra.mxu1 %v10413_v26  ;;  %4981 = vmatpush1.bf16.msra.mxu0 %v10416_v60  ;;  %v10485_v26 = vld [vmem:[%s13571_s12 + $0x330] ss:$12 sps:$4 sm:$0xff]   ;;  %v10488_v60 = vld [vmem:[%s13571_s12 + $0x338] ss:$12 sps:$4 sm:$0xff]  }
 0x559   : > { %4941 = vmatprep.subr.bf16.mxu1 %v10419_v50  ;;  %4982 = vmatprep.subr.bf16.mxu0 %v10899_v23  ;;  %v10491_v50 = vld [vmem:[%s13571_s12 + $0x34c] ss:$12 sps:$4 sm:$0xff]  }
 0x55c   : > { %4942 = vmatpush1.bf16.msra.mxu1 %v10417_v7  ;;  %4983 = vmatpush1.bf16.msra.mxu0 %v10420_v11  ;;  %v4343_v7 = vld [vmem:[#allocation6] sm:$0x3c] }
 0x55d   : > { %4943 = vmatprep.subr.bf16.mxu1 %v10423_v12  ;;  %4984 = vmatprep.subr.bf16.mxu0 %v10899_v23  ;;  %v10489_v11 = vld [vmem:[%s13571_s12 + $0x348] ss:$12 sps:$4 sm:$0xff]   ;;  %v10492_v12 = vld [vmem:[%s13571_s12 + $0x350] ss:$12 sps:$4 sm:$0xff]  }
 0x560   : > { %4944 = vmatpush1.bf16.msra.mxu1 %v10421_v9  ;;  %4985 = vmatpush1.bf16.msra.mxu0 %v10424_v13  ;;  %v4345_v9 = vpack.c.bf16 %v4343_v7, %v4343_v7  ;;  %v10495_v13 = vld [vmem:[%s13573_s14 + $0x1e4] ss:$12 sps:$4 sm:$0xff]  }
 0x561   : > { %4945 = vmatprep.subr.bf16.mxu1 %v10427_v15  ;;  %4986 = vmatprep.subr.bf16.mxu0 %v10899_v23  ;;  %v10493_v15 = vld [vmem:[%s13573_s14 + $0x1e0] ss:$12 sps:$4 sm:$0xff]  }
 0x564   : > { %4946 = vmatpush1.bf16.msra.mxu1 %v10425_v16  ;;  %4987 = vmatpush1.bf16.msra.mxu0 %v10428_v18  ;;  %v5063_v16 = vrot.slane %v4345_v9, 1  ;;  %v10498_v18 = vld [vmem:[%s13573_s14 + $0x1fc] ss:$12 sps:$4 sm:$0xff]  }
 0x565   : > { %4947 = vmatprep.subr.bf16.mxu1 %v10431_v19  ;;  %4988 = vmatprep.subr.bf16.mxu0 %v10899_v23  ;;  %v10496_v19 = vld [vmem:[%s13573_s14 + $0x1f8] ss:$12 sps:$4 sm:$0xff]  }
 0x568   : > { %4948 = vmatpush1.bf16.msra.mxu1 %v10429_v20  ;;  %4989 = vmatpush1.bf16.msra.mxu0 %v10432_v21  ;;  %v10499_v20 = vld [vmem:[%s13573_s14 + $0x210] ss:$12 sps:$4 sm:$0xff]   ;;  %v10501_v21 = vld [vmem:[%s13573_s14 + $0x214] ss:$12 sps:$4 sm:$0xff]  }
 0x569   : > { %4949 = vmatprep.subr.bf16.mxu1 %v10435_v22  ;;  %4990 = vmatprep.subr.bf16.mxu0 %v10899_v23  ;;  %v10504_v22 = vld [vmem:[%s13573_s14 + $0x22c] ss:$12 sps:$4 sm:$0xff]  }
 0x56c   : > { %4950 = vmatpush1.bf16.msra.mxu1 %v10433_v24  ;;  %4991 = vmatpush1.bf16.msra.mxu0 %v10436_v25  ;;  %v10502_v24 = vld [vmem:[%s13573_s14 + $0x228] ss:$12 sps:$4 sm:$0xff]   ;;  %v10507_v25 = vld [vmem:[%s13573_s14 + $0x244] ss:$12 sps:$4 sm:$0xff]  }
 0x56d   : > { %4951 = vmatprep.subr.bf16.mxu1 %v10439_v28  ;;  %4992 = vmatprep.subr.bf16.mxu0 %v10899_v23  ;;  %v10520_v28 = vld [vmem:[%s13573_s14 + $0x2a8] ss:$12 sps:$4 sm:$0xff]  }
 0x570   : > { %4952 = vmatpush1.bf16.msra.mxu1 %v10437_v29  ;;  %4993 = vmatpush1.bf16.msra.mxu0 %v10440_v30  ;;  %v10521_v29 = vld [vmem:[%s13573_s14 + $0x1e8] ss:$12 sps:$4 sm:$0xff]   ;;  %v10525_v30 = vld [vmem:[%s13573_s14 + $0x2c0] ss:$12 sps:$4 sm:$0xff]  }
 0x571   : > { %4953 = vmatprep.subr.bf16.mxu1 %v10443_v31  ;;  %4994 = vmatprep.subr.bf16.mxu0 %v10899_v23  ;;  %v10505_v31 = vld [vmem:[%s13573_s14 + $0x240] ss:$12 sps:$4 sm:$0xff]  }
 0x574   : > { %4954 = vmatpush1.bf16.msra.mxu1 %v10441_v33  ;;  %4995 = vmatpush1.bf16.msra.mxu0 %v10444_v34  ;;  %v10510_v33 = vld [vmem:[%s13573_s14 + $0x25c] ss:$12 sps:$4 sm:$0xff]   ;;  %v10530_v34 = vld [vmem:[%s13573_s14 + $0x2d8] ss:$12 sps:$4 sm:$0xff]  }
 0x575   : > { %5261 = vmatprep.subr.bf16.mxu1 %v10447_v35  ;;  %5302 = vmatprep.subr.bf16.mxu0 %v10899_v23  ;;  %v10508_v35 = vld [vmem:[%s13573_s14 + $0x258] ss:$12 sps:$4 sm:$0xff]  }
 0x577   : > { %4964 = vmatmul.mubr.bf16.vlgmr.msra.gmra.mrb[36].mxu1 %v4337_v39  ;;  %5005 = vmatmul.mubr.bf16.vlgmr.msra.gmra.mrb[40].mxu0 %v4337_v39  ;;  %v10511_v39 = vld [vmem:[%s13573_s14 + $0x270] ss:$12 sps:$4 sm:$0xff]  }
 0x578   : > { %5262 = vmatpush1.bf16.msra.mxu1 %v10445_v38  ;;  %8822 = vmatprep.mubr.msk.bf16.mxu1 %vm4651_vm15, %v5064_v40  ;;  %v10535_v38 = vld [vmem:[%s13573_s14 + $0x2f0] ss:$12 sps:$4 sm:$0xff]  }
 0x579   : > { %5303 = vmatpush1.bf16.msra.mxu0 %v10448_v14  ;;  %8823 = vmatprep.mubr.msk.bf16.mxu0 %vm4651_vm15, %v5064_v40  ;;  %v10536_v14 = vld [vmem:[%s13573_s14 + $0x230] ss:$12 sps:$4 sm:$0xff]   ;;  %v10516_v40 = vld [vmem:[%s13573_s14 + $0x28c] ss:$12 sps:$4 sm:$0xff]  }
 0x57a   : > { %5263 = vmatprep.subr.bf16.mxu1 %v10451_v41  ;;  %5304 = vmatprep.subr.bf16.mxu0 %v10899_v23  ;;  %v10540_v41 = vld [vmem:[%s13573_s14 + $0x308] ss:$12 sps:$4 sm:$0xff]  }
 0x57c   : > { %5264 = vmatpush1.bf16.msra.mxu1 %v10449_v42  ;;  %v10514_v42 = vld [vmem:[%s13573_s14 + $0x288] ss:$12 sps:$4 sm:$0xff]  }
 0x57d   : > { %5305 = vmatpush1.bf16.msra.mxu0 %v10452_v44  ;;  %5265 = vmatprep.subr.bf16.mxu1 %v10455_v45  ;;  %v10541_v44 = vld [vmem:[%s13573_s14 + $0x248] ss:$12 sps:$4 sm:$0xff]   ;;  %v10519_v45 = vld [vmem:[%s13573_s14 + $0x2a4] ss:$12 sps:$4 sm:$0xff]  }
 0x57e   : > { %5306 = vmatprep.subr.bf16.mxu0 %v10899_v23 }
 0x580   : > { %5266 = vmatpush1.bf16.msra.mxu1 %v10453_v48  ;;  %v10517_v48 = vld [vmem:[%s13573_s14 + $0x2a0] ss:$12 sps:$4 sm:$0xff]  }
 0x581   : > { %5307 = vmatpush1.bf16.msra.mxu0 %v10456_v49  ;;  %5267 = vmatprep.subr.bf16.mxu1 %v10459_v51  ;;  %v10524_v49 = vld [vmem:[%s13573_s14 + $0x2bc] ss:$12 sps:$4 sm:$0xff]   ;;  %v10522_v51 = vld [vmem:[%s13573_s14 + $0x2b8] ss:$12 sps:$4 sm:$0xff]  }
 0x582   : > { %5308 = vmatprep.subr.bf16.mxu0 %v10899_v23 }
 0x584   : > { %5268 = vmatpush1.bf16.msra.mxu1 %v10457_v52  ;;  %v10529_v52 = vld [vmem:[%s13573_s14 + $0x2d4] ss:$12 sps:$4 sm:$0xff]  }
 0x585   : > { %5309 = vmatpush1.bf16.msra.mxu0 %v10460_v53  ;;  %5269 = vmatprep.subr.bf16.mxu1 %v10463_v54  ;;  %v10527_v53 = vld [vmem:[%s13573_s14 + $0x2d0] ss:$12 sps:$4 sm:$0xff]   ;;  %v10534_v54 = vld [vmem:[%s13573_s14 + $0x2ec] ss:$12 sps:$4 sm:$0xff]  }
 0x586   : > { %5310 = vmatprep.subr.bf16.mxu0 %v10899_v23 }
 0x588   : > { %5270 = vmatpush1.bf16.msra.mxu1 %v10461_v27  ;;  %v10532_v27 = vld [vmem:[%s13573_s14 + $0x2e8] ss:$12 sps:$4 sm:$0xff]  }
 0x589   : > { %5311 = vmatpush1.bf16.msra.mxu0 %v10464_v55  ;;  %5271 = vmatprep.subr.bf16.mxu1 %v10467_v56  ;;  %v10539_v55 = vld [vmem:[%s13573_s14 + $0x304] ss:$12 sps:$4 sm:$0xff]   ;;  %v10537_v56 = vld [vmem:[%s13573_s14 + $0x300] ss:$12 sps:$4 sm:$0xff]  }
 0x58a   : > { %5312 = vmatprep.subr.bf16.mxu0 %v10899_v23 }
 0x58c   : > { %5272 = vmatpush1.bf16.msra.mxu1 %v10465_v57  ;;  %v10544_v57 = vld [vmem:[%s13573_s14 + $0x31c] ss:$12 sps:$4 sm:$0xff]  }
 0x58d   : > { %5313 = vmatpush1.bf16.msra.mxu0 %v10468_v58  ;;  %5273 = vmatprep.subr.bf16.mxu1 %v10471_v59  ;;  %v10545_v58 = vld [vmem:[%s13573_s14 + $0x320] ss:$12 sps:$4 sm:$0xff]   ;;  %v10542_v59 = vld [vmem:[%s13573_s14 + $0x318] ss:$12 sps:$4 sm:$0xff]  }
 0x58e   : > { %5314 = vmatprep.subr.bf16.mxu0 %v10899_v23 }
 0x590   : > { %5274 = vmatpush1.bf16.msra.mxu1 %v10469_v47  ;;  %v10546_v47 = vld [vmem:[%s13573_s14 + $0x260] ss:$12 sps:$4 sm:$0xff]  }
 0x591   : > { %5315 = vmatpush1.bf16.msra.mxu0 %v10472_v43  ;;  %5275 = vmatprep.subr.bf16.mxu1 %v10475_v46  ;;  %v10549_v43 = vld [vmem:[%s13573_s14 + $0x334] ss:$12 sps:$4 sm:$0xff]   ;;  %v10550_v46 = vld [vmem:[%s13573_s14 + $0x338] ss:$12 sps:$4 sm:$0xff]  }
 0x592   : > { %5316 = vmatprep.subr.bf16.mxu0 %v10899_v23 }
 0x594   : > { %5276 = vmatpush1.bf16.msra.mxu1 %v10473_v61  ;;  %v10547_v61 = vld [vmem:[%s13573_s14 + $0x330] ss:$12 sps:$4 sm:$0xff]  }
 0x595   : > { %5317 = vmatpush1.bf16.msra.mxu0 %v10476_v63  ;;  %5277 = vmatprep.subr.bf16.mxu1 %v10479_v1  ;;  %v10551_v63 = vld [vmem:[%s13573_s14 + $0x278] ss:$12 sps:$4 sm:$0xff]  }
 0x596   : > { %5318 = vmatprep.subr.bf16.mxu0 %v10899_v23  ;;  %v10554_v1 = vld [vmem:[%s13573_s14 + $0x34c] ss:$12 sps:$4 sm:$0xff]  }
 0x598   : > { %5278 = vmatpush1.bf16.msra.mxu1 %v10477_v2  ;;  %v10555_v2 = vld [vmem:[%s13573_s14 + $0x350] ss:$12 sps:$4 sm:$0xff]  }
 0x599   : > { %5319 = vmatpush1.bf16.msra.mxu0 %v10480_v3  ;;  %5279 = vmatprep.subr.bf16.mxu1 %v10483_v4  ;;  %v10552_v3 = vld [vmem:[%s13573_s14 + $0x348] ss:$12 sps:$4 sm:$0xff]   ;;  %v10556_v4 = vld [vmem:[%s13573_s14 + $0x290] ss:$12 sps:$4 sm:$0xff]  }
 0x59a   : > { %5320 = vmatprep.subr.bf16.mxu0 %v10899_v23 }
 0x59c   : > { %5280 = vmatpush1.bf16.msra.mxu1 %v10481_v5  ;;  %v10559_v5 = vld [vmem:[%s13573_s14 + $0x364] ss:$12 sps:$4 sm:$0xff]  }
 0x59d   : > { %5321 = vmatpush1.bf16.msra.mxu0 %v10484_v8  ;;  %5281 = vmatprep.subr.bf16.mxu1 %v10487_v10  ;;  %v10562_v8 = vld [vmem:[%s13573_s14 + $0x4] ss:$12 sps:$4 sm:$0xff]  }
 0x59e   : > { %5322 = vmatprep.subr.bf16.mxu0 %v10899_v23 }
 0x5a0   : > { %5282 = vmatpush1.bf16.msra.mxu1 %v10485_v26 }
 0x5a1   : > { %5323 = vmatpush1.bf16.msra.mxu0 %v10488_v60  ;;  %5283 = vmatprep.subr.bf16.mxu1 %v10491_v50 }
 0x5a2   : > { %5324 = vmatprep.subr.bf16.mxu0 %v10899_v23 }
 0x5a4   : > { %5284 = vmatpush1.bf16.msra.mxu1 %v10489_v11 }
 0x5a5   : > { %5325 = vmatpush1.bf16.msra.mxu0 %v10492_v12  ;;  %5866 = vmatprep.subr.bf16.mxu1 %v10495_v13 }
 0x5a6   : > { %9438 = vmatprep.subr.bf16.mxu0 %v10520_v28 }
 0x5a7   : > { %5294 = vmatmul.mubr.bf16.vlgmr.msra.gmra.mrb[40].mxu1 %v5063_v16 }
 0x5a8   : > { %5335 = vmatmul.mubr.bf16.vlgmr.msra.gmra.mrb[44].mxu0 %v5063_v16  ;;  %5867 = vmatpush1.bf16.msra.mxu1 %v10493_v15 }
 0x5a9   : > { %5868 = vmatprep.subr.bf16.mxu1 %v10498_v18  ;;  %9439 = vmatpush3.bf16.msra.mxu0 %v10521_v29  ;;  %v5345_v29 = vld [vmem:[%s13572_s13] sm:$0x7] }
 0x5aa   : > { %9440 = vmatprep.subr.bf16.mxu0 %v10525_v30  ;;  %v5350_v30 = vrot.slane %v5345_v29, %v11819_v62 }
 0x5ac   : > { %5869 = vmatpush1.bf16.msra.mxu1 %v10496_v19 }
 0x5ad   : > { %5870 = vmatprep.subr.bf16.mxu1 %v10501_v21  ;;  %9441 = vmatpush3.bf16.msra.mxu0 %v10526_v32  ;;  %v5354_v32 = vrot.slane %v5345_v29, %v11825_v0 }
 0x5ae   : > { %9442 = vmatprep.subr.bf16.mxu0 %v10530_v34 }
 0x5b0   : > { %5871 = vmatpush1.bf16.msra.mxu1 %v10499_v20 }
 0x5b1   : > { %5872 = vmatprep.subr.bf16.mxu1 %v10504_v22  ;;  %9443 = vmatpush3.bf16.msra.mxu0 %v10531_v36 }
 0x5b2   : > { %9444 = vmatprep.subr.bf16.mxu0 %v10535_v38 }
 0x5b4   : > { %5873 = vmatpush1.bf16.msra.mxu1 %v10502_v24 }
 0x5b5   : > { %5874 = vmatprep.subr.bf16.mxu1 %v10507_v25  ;;  %9445 = vmatpush3.bf16.msra.mxu0 %v10536_v14 }
 0x5b6   : > { %9446 = vmatprep.subr.bf16.mxu0 %v10540_v41 }
 0x5b8   : > { %5875 = vmatpush1.bf16.msra.mxu1 %v10505_v31 }
 0x5b9   : > { %5876 = vmatprep.subr.bf16.mxu1 %v10510_v33  ;;  %9447 = vmatpush3.bf16.msra.mxu0 %v10541_v44 }
 0x5ba   : > { %9448 = vmatprep.subr.bf16.mxu0 %v10545_v58  ;;  %v10568_v58 = vld [vmem:[%s13573_s14 + $0x1c] ss:$12 sps:$4 sm:$0xff]  }
 0x5bc   : > { %5877 = vmatpush1.bf16.msra.mxu1 %v10508_v35 }
 0x5bd   : > { %5878 = vmatprep.subr.bf16.mxu1 %v10513_v37  ;;  %9449 = vmatpush3.bf16.msra.mxu0 %v10546_v47  ;;  %v10566_v47 = vld [vmem:[%s13573_s14 + $0x18] ss:$12 sps:$4 sm:$0xff]  }
 0x5be   : > { %9450 = vmatprep.subr.bf16.mxu0 %v10550_v46  ;;  %v10571_v46 = vld [vmem:[%s13573_s14 + $0x394] ss:$12 sps:$4 sm:$0xff]  }
 0x5c0   : > { %5879 = vmatpush1.bf16.msra.mxu1 %v10511_v39 }
 0x5c1   : > { %5880 = vmatprep.subr.bf16.mxu1 %v10516_v40  ;;  %9451 = vmatpush3.bf16.msra.mxu0 %v10551_v63  ;;  %v10569_v63 = vld [vmem:[%s13573_s14 + $0x390] ss:$12 sps:$4 sm:$0xff]  }
 0x5c2   : > { %9452 = vmatprep.subr.bf16.mxu0 %v10555_v2 }
 0x5c4   : > { %5881 = vmatpush1.bf16.msra.mxu1 %v10514_v42 }
 0x5c5   : > { %5882 = vmatprep.subr.bf16.mxu1 %v10519_v45  ;;  %9453 = vmatpush3.bf16.msra.mxu0 %v10556_v4  ;;  %v10580_v4 = vld [vmem:[%s13573_s14 + $0x4c] ss:$12 sps:$4 sm:$0xff]  }
 0x5c6   : > { %6350 = vmatprep.subr.bf16.mxu0 %v10562_v8  ;;  %v10578_v8 = vld [vmem:[%s13573_s14 + $0x48] ss:$12 sps:$4 sm:$0xff]  }
 0x5c8   : > { %5883 = vmatpush1.bf16.msra.mxu1 %v10517_v48 }
 0x5c9   : > { %5884 = vmatprep.subr.bf16.mxu1 %v10524_v49 }
 0x5cc   : > { %5885 = vmatpush1.bf16.msra.mxu1 %v10522_v51  ;;  %v5357_v51 = vsub.s32 2, %v11253_v17  ;;  %v7727_v17 = vld [vmem:[%s13576_s17] sm:$0x1] }
 0x5cd   : > { %5886 = vmatprep.subr.bf16.mxu1 %v10529_v52 }
 0x5d0   : > { %5887 = vmatpush1.bf16.msra.mxu1 %v10527_v53 }
 0x5d1   : > { %5888 = vmatprep.subr.bf16.mxu1 %v10534_v54  ;;  %v10557_v54 = vld [vmem:[%s13573_s14 + $0x360] ss:$12 sps:$4 sm:$0xff]  }
 0x5d4   : > { %5889 = vmatpush1.bf16.msra.mxu1 %v10532_v27  ;;  %v10560_v27 = vld [vmem:[%s13573_s14] ss:$12 sps:$4 sm:$0xff]  }
 0x5d5   : > { %5890 = vmatprep.subr.bf16.mxu1 %v10539_v55  ;;  %v5358_v55 = vrot.slane %v5345_v29, %v5357_v51  ;;  %v10608_v29 = vld [vmem:[%s13573_s14 + $0x19c] ss:$12 sps:$4 sm:$0xff]  }
 0x5d8   : > { %5891 = vmatpush1.bf16.msra.mxu1 %v10537_v56 }
 0x5d9   : > { %5892 = vmatprep.subr.bf16.mxu1 %v10544_v57  ;;  %v10565_v57 = vld [vmem:[%s13573_s14 + $0x37c] ss:$12 sps:$4 sm:$0xff]  }
 0x5dc   : > { %5893 = vmatpush1.bf16.msra.mxu1 %v10542_v59  ;;  %v10563_v59 = vld [vmem:[%s13573_s14 + $0x378] ss:$12 sps:$4 sm:$0xff]  }
 0x5dd   : > { %5894 = vmatprep.subr.bf16.mxu1 %v10549_v43 }
 0x5e0   : > { %5895 = vmatpush1.bf16.msra.mxu1 %v10547_v61  ;;  %v10574_v61 = vld [vmem:[%s13573_s14 + $0x34] ss:$12 sps:$4 sm:$0xff]  }
 0x5e1   : > { %5896 = vmatprep.subr.bf16.mxu1 %v10554_v1  ;;  %v10572_v1 = vld [vmem:[%s13573_s14 + $0x30] ss:$12 sps:$4 sm:$0xff]  }
 0x5e4   : > { %5897 = vmatpush1.bf16.msra.mxu1 %v10552_v3  ;;  %v10577_v3 = vld [vmem:[%s13573_s14 + $0x3ac] ss:$12 sps:$4 sm:$0xff]  }
 0x5e5   : > { %5907 = vmatprep.subr.bf16.mxu1 %v10559_v5  ;;  %v10575_v5 = vld [vmem:[%s13573_s14 + $0x3a8] ss:$12 sps:$4 sm:$0xff]  }
 0x61a   : > { %v4689_v10 = vpop.f32.mrb[32].mxu1  ;;  %v4730_v26 = vpop.f32.mrb[36].mxu0 }
 0x61b   : > { %v4691_v60 = vpop.f32.mrb[33].mxu1  ;;  %v4732_v50 = vpop.f32.mrb[37].mxu0 }
 0x61c   : > { %v4693_v7 = vpop.f32.mrb[34].mxu1  ;;  %v4733_v11 = vpop.f32.mrb[38].mxu0  ;;  %v10584_v50 = vld [vmem:[%s13573_s14 + $0x368] ss:$12 sps:$4 sm:$0xff]  }
 0x61d   : > { %v4694_v12 = vpop.f32.mrb[35].mxu1  ;;  %v4734_v9 = vpop.f32.mrb[39].mxu0  ;;  %v10587_v11 = vld [vmem:[%s13573_s14 + $0x7c] ss:$12 sps:$4 sm:$0xff]  }
 0x61e   : > { %v10585_v12 = vld [vmem:[%s13573_s14 + $0x78] ss:$12 sps:$4 sm:$0xff]   ;;  %v10588_v9 = vld [vmem:[%s13573_s14 + $0x380] ss:$12 sps:$4 sm:$0xff]  }
 0x64a   : > { %v4965_v13 = vpop.f32.mrb[36].mxu1  ;;  %v5006_v15 = vpop.f32.mrb[40].mxu0 }
 0x64b   : > { %v4966_v16 = vadd.f32 %v4965_v13, %v4689_v10  ;;  %v5007_v18 = vadd.f32 %v5006_v15, %v4730_v26  ;;  %v4967_v19 = vpop.f32.mrb[37].mxu1  ;;  %v5008_v20 = vpop.f32.mrb[41].mxu0  ;;  %v10583_v26 = vld [vmem:[%s13573_s14 + $0x64] ss:$12 sps:$4 sm:$0xff]   ;;  %v10591_v13 = vld [vmem:[%s13573_s14 + $0x94] ss:$12 sps:$4 sm:$0xff]  }
 0x64c   : > { %v4968_v21 = vadd.f32 %v4967_v19, %v4691_v60  ;;  %v4969_v22 = vpop.f32.mrb[38].mxu1  ;;  %v5009_v24 = vpop.f32.mrb[42].mxu0  ;;  %v10581_v60 = vld [vmem:[%s13573_s14 + $0x60] ss:$12 sps:$4 sm:$0xff]   ;;  %v10589_v15 = vld [vmem:[%s13573_s14 + $0x90] ss:$12 sps:$4 sm:$0xff]  }
 0x64d   : > { %v4970_v25 = vpop.f32.mrb[39].mxu1  ;;  %v5010_v28 = vpop.f32.mrb[43].mxu0  ;;  %v10593_v19 = vld [vmem:[%s13573_s14 + $0xa8] ss:$12 sps:$4 sm:$0xff]   ;;  %v10596_v20 = vld [vmem:[%s13573_s14 + $0x3b0] ss:$12 sps:$4 sm:$0xff]  }
 0x64e   : > { %v10602_v22 = vld [vmem:[%s13573_s14 + $0x184] ss:$12 sps:$4 sm:$0xff]   ;;  %v10597_v24 = vld [vmem:[%s13573_s14 + $0xc0] ss:$12 sps:$4 sm:$0xff]   ;;  %v10605_v28 = vld [vmem:[%s13573_s14 + $0xdc] ss:$12 sps:$4 sm:$0xff]  }
 0x64f   : > { %v10600_v25 = vld [vmem:[%s13573_s14 + $0x180] ss:$12 sps:$4 sm:$0xff]  }
 0x67a   : > { %v5295_v31 = vpop.f32.mrb[40].mxu1 }
 0x67b   : > { %v5342_v33 = vadd.f32 %v5295_v31, %v4966_v16  ;;  %v5336_v34 = vpop.f32.mrb[44].mxu0  ;;  %v5297_v35 = vpop.f32.mrb[41].mxu1  ;;  %v10592_v16 = vld [vmem:[%s13573_s14 + $0x398] ss:$12 sps:$4 sm:$0xff]  }
 0x67c   : > { %v5344_v36 = vadd.f32 %v5336_v34, %v5007_v18  ;;  %v5343_v37 = vadd.f32 %v5297_v35, %v4968_v21  ;;  %v5338_v38 = vpop.f32.mrb[45].mxu0  ;;  %v5299_v39 = vpop.f32.mrb[42].mxu1  ;;  %v10595_v18 = vld [vmem:[%s13573_s14 + $0xac] ss:$12 sps:$4 sm:$0xff]   ;;  %v10599_v21 = vld [vmem:[%s13573_s14 + $0xc4] ss:$12 sps:$4 sm:$0xff]  }
 0x67d   : > { %v5362_v14 = vadd.f32 %v5350_v30, %v5342_v33  ;;  %v5339_v40 = vpop.f32.mrb[46].mxu0  ;;  %v5300_v41 = vpop.f32.mrb[43].mxu1  ;;  %v10603_v30 = vld [vmem:[%s13573_s14 + $0xd8] ss:$12 sps:$4 sm:$0xff]   ;;  %v10614_v33 = vld [vmem:[%s13573_s14 + $0x1b4] ss:$12 sps:$4 sm:$0xff]  }
 0x67e   : > { %v5363_v42 = vadd.f32 %v5354_v32, %v5343_v37  ;;  %v5340_v44 = vpop.f32.mrb[47].mxu0  ;;  %v5364_v43 = vadd.f32 %v5358_v55, %v5344_v36  ;;  %v10606_v31 = vld [vmem:[%s13573_s14 + $0x198] ss:$12 sps:$4 sm:$0xff]   ;;  %v10611_v32 = vld [vmem:[%s13573_s14 + $0xf4] ss:$12 sps:$4 sm:$0xff]  }
 0x67f   : > { %v5365_v45 = vmax.f32 %v5362_v14, 0.0  ;;  %v10609_v34 = vld [vmem:[%s13573_s14 + $0xf0] ss:$12 sps:$4 sm:$0xff]   ;;  %v10617_v36 = vld [vmem:[%s13573_s14 + $0x10c] ss:$12 sps:$4 sm:$0xff]  }
 0x680   : > { %v5366_v48 = vmax.f32 %v5363_v42, 0.0  ;;  %v5367_v2 = vmax.f32 %v5364_v43, 0.0  ;;  %v10612_v35 = vld [vmem:[%s13573_s14 + $0x1b0] ss:$12 sps:$4 sm:$0xff]   ;;  %v10620_v37 = vld [vmem:[%s13573_s14 + $0x1cc] ss:$12 sps:$4 sm:$0xff]  }
 0x681   : > { %v12782_v49 = vpack.c.bf16 %v5365_v45, %v5365_v45  ;;  %v10615_v38 = vld [vmem:[%s13573_s14 + $0x108] ss:$12 sps:$4 sm:$0xff]   ;;  %v10623_v14 = vld [vmem:[%s13573_s14 + $0x124] ss:$12 sps:$4 sm:$0xff]   ;;  %v10621_v41 = vld [vmem:[%s13573_s14 + $0x120] ss:$12 sps:$4 sm:$0xff]  }
 0x682   : > { %v12785_v52 = vpack.c.bf16 %v5366_v48, %v5366_v48  ;;  %v12843_v10 = vpack.c.bf16 %v5367_v2, %v5367_v2  ;;  %v10618_v39 = vld [vmem:[%s13573_s14 + $0x1c8] ss:$12 sps:$4 sm:$0xff]   ;;  %v10629_v45 = vld [vmem:[%s13573_s14 + $0xe0] ss:$12 sps:$4 sm:$0xff]   ;;  %v10626_v48 = vld [vmem:[%s13573_s14 + $0x138] ss:$12 sps:$4 sm:$0xff]  }
 0x683   : > { %v12799_v56 = vshrl.u32 %v12782_v49, 16  ;;  %v10624_v40 = vld [vmem:[%s13573_s14 + $0xc8] ss:$12 sps:$4 sm:$0xff]   ;;  %v10634_v55 = vld [vmem:[%s13573_s14 + $0xf8] ss:$12 sps:$4 sm:$0xff]  }
 0x684   : > { %v12788_v53 = vshrl.u32 %v12785_v52, 16  ;;  %v12855_v7 = vshrl.u32 %v12843_v10, 16  ;;  %v10625_v42 = vld [vmem:[%s13573_s14 + $0x8] ss:$12 sps:$4 sm:$0xff]  }
 0x685   : > { %v10628_v44 = vld [vmem:[%s13573_s14 + $0x13c] ss:$12 sps:$4 sm:$0xff]  }
 0x686   : > { %5898 = vmatprep.mubr.bf16.mxu1 %v12788_v53  ;;  %5980 = vmatprep.mubr.bf16.mxu0 %v12788_v53  ;;  %v10636_v43 = vld [vmem:[%s13573_s14 + $0x168] ss:$12 sps:$4 sm:$0xff]  }
 0x687   : > { %5899 = vmatmul.mubr.bf16.vlgmr.msra.gmra.mrb[44].mxu1 %v12799_v56  ;;  %5981 = vmatmul.mubr.bf16.vlgmr.msra.gmra.mrb[48].mxu0 %v12799_v56  ;;  %v10645_v2 = vld [vmem:[%s13573_s14 + $0x68] ss:$12 sps:$4 sm:$0xff]  }
 0x688   : > { %5908 = vmatpush1.bf16.msra.mxu1 %v10557_v54  ;;  %6351 = vmatpush1.bf16.msra.mxu0 %v10560_v27  ;;  %v10630_v54 = vld [vmem:[%s13573_s14 + $0x20] ss:$12 sps:$4 sm:$0xff]  }
 0x689   : > { %6382 = vmatprep.mubr.bf16.mxu0 %v12785_v52  ;;  %5909 = vmatprep.subr.bf16.mxu1 %v10565_v57  ;;  %v10633_v27 = vld [vmem:[%s13573_s14 + $0x154] ss:$12 sps:$4 sm:$0xff]   ;;  %v10631_v57 = vld [vmem:[%s13573_s14 + $0x150] ss:$12 sps:$4 sm:$0xff]  }
 0x68a   : > { %6352 = vmatprep.subr.bf16.mxu0 %v10568_v58  ;;  %5939 = vmatprep.mubr.bf16.mxu1 %v10899_v23  ;;  %v10635_v58 = vld [vmem:[%s13573_s14 + $0x38] ss:$12 sps:$4 sm:$0xff]  }
 0x68c   : > { %5910 = vmatpush1.bf16.msra.mxu1 %v10563_v59  ;;  %6353 = vmatpush1.bf16.msra.mxu0 %v10566_v47  ;;  %v10638_v59 = vld [vmem:[%s13573_s14 + $0x16c] ss:$12 sps:$4 sm:$0xff]   ;;  %v10639_v47 = vld [vmem:[%s13573_s14 + $0x110] ss:$12 sps:$4 sm:$0xff]  }
 0x68d   : > { %5911 = vmatprep.subr.bf16.mxu1 %v10571_v46  ;;  %6354 = vmatprep.subr.bf16.mxu0 %v10574_v61  ;;  %v10640_v46 = vld [vmem:[%s13573_s14 + $0x50] ss:$12 sps:$4 sm:$0xff]   ;;  %v10641_v61 = vld [vmem:[%s13573_s14 + $0x128] ss:$12 sps:$4 sm:$0xff]  }
 0x690   : > { %5912 = vmatpush1.bf16.msra.mxu1 %v10569_v63  ;;  %6355 = vmatpush1.bf16.msra.mxu0 %v10572_v1  ;;  %v10644_v63 = vld [vmem:[%s13573_s14 + $0x3c4] ss:$12 sps:$4 sm:$0xff]   ;;  %v10642_v1 = vld [vmem:[%s13573_s14 + $0x3c0] ss:$12 sps:$4 sm:$0xff]  }
 0x691   : > { %5913 = vmatprep.subr.bf16.mxu1 %v10577_v3  ;;  %6356 = vmatprep.subr.bf16.mxu0 %v10580_v4  ;;  %v10646_v3 = vld [vmem:[%s13573_s14 + $0x140] ss:$12 sps:$4 sm:$0xff]   ;;  %v10649_v4 = vld [vmem:[%s13573_s14 + $0x3dc] ss:$12 sps:$4 sm:$0xff]  }
 0x694   : > { %5914 = vmatpush1.bf16.msra.mxu1 %v10575_v5  ;;  %6357 = vmatpush1.bf16.msra.mxu0 %v10578_v8  ;;  %v6597_v5 = vrot.slane %v12785_v52, 1  ;;  %v10647_v8 = vld [vmem:[%s13573_s14 + $0x3d8] ss:$12 sps:$4 sm:$0xff]  }
 0x695   : > { %9788 = vmatprep.subr.bf16.mxu1 %v10896_v6  ;;  %6358 = vmatprep.subr.bf16.mxu0 %v10583_v26  ;;  %v10650_v26 = vld [vmem:[%s13573_s14 + $0x80] ss:$12 sps:$4 sm:$0xff]  }
 0x697   : > { %8964 = vmatmul.mubr.msk.bf16.vlgmr.msra.gmra.mrb[48].mxu1 %vm4651_vm15, %v12855_v7 }
 0x698   : > { %9789 = vmatpush3.bf16.msra.mxu1 %v10584_v50  ;;  %6359 = vmatpush1.bf16.msra.mxu0 %v10581_v60  ;;  %v10651_v60 = vld [vmem:[%s13573_s14 + $0x158] ss:$12 sps:$4 sm:$0xff]   ;;  %v10654_v50 = vld [vmem:[%s13573_s14 + $0x3f4] ss:$12 sps:$4 sm:$0xff]  }
 0x699   : > { %9790 = vmatprep.subr.bf16.mxu1 %v10896_v6  ;;  %6360 = vmatprep.subr.bf16.mxu0 %v10587_v11  ;;  %v10652_v11 = vld [vmem:[%s13573_s14 + $0x3f0] ss:$12 sps:$4 sm:$0xff]  }
 0x69a   : > { %9796 = vmatprep.mubr.msk.bf16.mxu1 %vm10897_vm2, %v10896_v6 }
 0x69c   : > { %9791 = vmatpush3.bf16.msra.mxu1 %v10588_v9  ;;  %6361 = vmatpush1.bf16.msra.mxu0 %v10585_v12  ;;  %v10655_v12 = vld [vmem:[%s13573_s14 + $0x98] ss:$12 sps:$4 sm:$0xff]   ;;  %v10656_v9 = vld [vmem:[%s13573_s14 + $0x170] ss:$12 sps:$4 sm:$0xff]  }
 0x69d   : > { %9792 = vmatprep.subr.bf16.mxu1 %v10896_v6  ;;  %6362 = vmatprep.subr.bf16.mxu0 %v10591_v13  ;;  %v10659_v13 = vld [vmem:[%s13573_s14 + $0x40c] ss:$12 sps:$4 sm:$0xff]  }
 0x6a0   : > { %9793 = vmatpush3.bf16.msra.mxu1 %v10592_v16  ;;  %6363 = vmatpush1.bf16.msra.mxu0 %v10589_v15  ;;  %v10657_v15 = vld [vmem:[%s13573_s14 + $0x408] ss:$12 sps:$4 sm:$0xff]   ;;  %v10660_v16 = vld [vmem:[%s13573_s14 + $0xb0] ss:$12 sps:$4 sm:$0xff]  }
 0x6a1   : > { %9794 = vmatprep.subr.bf16.mxu1 %v10896_v6  ;;  %6364 = vmatprep.subr.bf16.mxu0 %v10595_v18  ;;  %v10663_v18 = vld [vmem:[%s13573_s14 + $0x424] ss:$12 sps:$4 sm:$0xff]  }
 0x6a4   : > { %9795 = vmatpush3.bf16.msra.mxu1 %v10596_v20  ;;  %6365 = vmatpush1.bf16.msra.mxu0 %v10593_v19  ;;  %v10661_v19 = vld [vmem:[%s13573_s14 + $0x420] ss:$12 sps:$4 sm:$0xff]   ;;  %v10664_v20 = vld [vmem:[%s13573_s14 + $0x188] ss:$12 sps:$4 sm:$0xff]  }
 0x6a5   : > { %6366 = vmatprep.subr.bf16.mxu0 %v10599_v21  ;;  %6391 = vmatprep.subr.bf16.mxu1 %v10602_v22  ;;  %v10667_v21 = vld [vmem:[%s13573_s14 + $0x43c] ss:$12 sps:$4 sm:$0xff]   ;;  %v10665_v22 = vld [vmem:[%s13573_s14 + $0x438] ss:$12 sps:$4 sm:$0xff]  }
 0x6a7   : > { %9797 = vmatmul.mubr.msk.bf16.vlgmr.msra.gmra.mrb[52].mxu1 %vm4651_vm15, %v12855_v7 }
 0x6a8   : > { %6367 = vmatpush1.bf16.msra.mxu0 %v10597_v24  ;;  %6392 = vmatpush1.bf16.msra.mxu1 %v10600_v25  ;;  %v10668_v24 = vld [vmem:[%s13573_s14 + $0x1a0] ss:$12 sps:$4 sm:$0xff]  }
 0x6a9   : > { %6368 = vmatprep.subr.bf16.mxu0 %v10605_v28  ;;  %6393 = vmatprep.subr.bf16.mxu1 %v10608_v29  ;;  %v10671_v25 = vld [vmem:[%s13573_s14 + $0x454] ss:$12 sps:$4 sm:$0xff]   ;;  %v10669_v28 = vld [vmem:[%s13573_s14 + $0x450] ss:$12 sps:$4 sm:$0xff]   ;;  %v10672_v29 = vld [vmem:[%s13573_s14 + $0x1b8] ss:$12 sps:$4 sm:$0xff]  }
 0x6aa   : > { %6423 = vmatprep.mubr.bf16.mxu1 %v10899_v23 }
 0x6ac   : > { %6369 = vmatpush1.bf16.msra.mxu0 %v10603_v30  ;;  %6394 = vmatpush1.bf16.msra.mxu1 %v10606_v31  ;;  %v10675_v30 = vld [vmem:[%s13573_s14 + $0x46c] ss:$12 sps:$4 sm:$0xff]   ;;  %v10673_v31 = vld [vmem:[%s13573_s14 + $0x468] ss:$12 sps:$4 sm:$0xff]  }
 0x6ad   : > { %6370 = vmatprep.subr.bf16.mxu0 %v10611_v32  ;;  %6395 = vmatprep.subr.bf16.mxu1 %v10614_v33  ;;  %v10676_v32 = vld [vmem:[%s13573_s14 + $0x1d0] ss:$12 sps:$4 sm:$0xff]  }
 0x6ae   : > { %v10679_v33 = vld [vmem:[%s13573_s14 + $0x484] ss:$12 sps:$4 sm:$0xff]  }
 0x6b0   : > { %6371 = vmatpush1.bf16.msra.mxu0 %v10609_v34  ;;  %6396 = vmatpush1.bf16.msra.mxu1 %v10612_v35  ;;  %v10682_v34 = vld [vmem:[%s13573_s14 + $0x544] ss:$12 sps:$4 sm:$0xff]   ;;  %v10677_v35 = vld [vmem:[%s13573_s14 + $0x480] ss:$12 sps:$4 sm:$0xff]  }
 0x6b1   : > { %6372 = vmatprep.subr.bf16.mxu0 %v10617_v36  ;;  %6397 = vmatprep.subr.bf16.mxu1 %v10620_v37  ;;  %v10680_v36 = vld [vmem:[%s13573_s14 + $0x540] ss:$12 sps:$4 sm:$0xff]   ;;  %v10685_v37 = vld [vmem:[%s13573_s14 + $0x49c] ss:$12 sps:$4 sm:$0xff]  }
 0x6b4   : > { %6373 = vmatpush1.bf16.msra.mxu0 %v10615_v38  ;;  %6398 = vmatpush1.bf16.msra.mxu1 %v10618_v39  ;;  %v10688_v38 = vld [vmem:[%s13573_s14 + $0x55c] ss:$12 sps:$4 sm:$0xff]   ;;  %v10683_v39 = vld [vmem:[%s13573_s14 + $0x498] ss:$12 sps:$4 sm:$0xff]  }
 0x6b5   : > { %6374 = vmatprep.subr.bf16.mxu0 %v10623_v14  ;;  %9465 = vmatprep.subr.bf16.mxu1 %v10624_v40  ;;  %v10686_v14 = vld [vmem:[%s13573_s14 + $0x558] ss:$12 sps:$4 sm:$0xff]   ;;  %v10691_v40 = vld [vmem:[%s13573_s14 + $0x4b4] ss:$12 sps:$4 sm:$0xff]  }
 0x6b7   : > { %9026 = vmatmul.mubr.msk.bf16.vlgmr.msra.gmra.mrb[56].mxu1 %vm4651_vm15, %v12843_v10 }
 0x6b8   : > { %6375 = vmatpush1.bf16.msra.mxu0 %v10621_v41  ;;  %9466 = vmatpush3.bf16.msra.mxu1 %v10625_v42  ;;  %v10694_v41 = vld [vmem:[%s13573_s14 + $0x574] ss:$12 sps:$4 sm:$0xff]   ;;  %v10689_v42 = vld [vmem:[%s13573_s14 + $0x4b0] ss:$12 sps:$4 sm:$0xff]  }
 0x6b9   : > { %6464 = vmatprep.mubr.bf16.mxu1 %v12785_v52  ;;  %6376 = vmatprep.subr.bf16.mxu0 %v10628_v44  ;;  %v10692_v44 = vld [vmem:[%s13573_s14 + $0x570] ss:$12 sps:$4 sm:$0xff]   ;;  %v10715_v52 = vld [vmem:[%s13573_s14 + $0x3f8] ss:$12 sps:$4 sm:$0xff]  }
 0x6ba   : > { %9467 = vmatprep.subr.bf16.mxu1 %v10629_v45  ;;  %v10697_v45 = vld [vmem:[%s13573_s14 + $0x4cc] ss:$12 sps:$4 sm:$0xff]  }
 0x6bc   : > { %6377 = vmatpush1.bf16.msra.mxu0 %v10626_v48  ;;  %9468 = vmatpush3.bf16.msra.mxu1 %v10630_v54  ;;  %v10700_v48 = vld [vmem:[%s13573_s14 + $0x58c] ss:$12 sps:$4 sm:$0xff]   ;;  %v10695_v54 = vld [vmem:[%s13573_s14 + $0x4c8] ss:$12 sps:$4 sm:$0xff]  }
 0x6bd   : > { %6378 = vmatprep.subr.bf16.mxu0 %v10633_v27  ;;  %9469 = vmatprep.subr.bf16.mxu1 %v10634_v55  ;;  %v10698_v27 = vld [vmem:[%s13573_s14 + $0x588] ss:$12 sps:$4 sm:$0xff]   ;;  %v10703_v55 = vld [vmem:[%s13573_s14 + $0x4e4] ss:$12 sps:$4 sm:$0xff]  }
 0x6c0   : > { %6379 = vmatpush1.bf16.msra.mxu0 %v10631_v57  ;;  %9470 = vmatpush3.bf16.msra.mxu1 %v10635_v58  ;;  %v10704_v57 = vld [vmem:[%s13573_s14 + $0x488] ss:$12 sps:$4 sm:$0xff]   ;;  %v10701_v58 = vld [vmem:[%s13573_s14 + $0x4e0] ss:$12 sps:$4 sm:$0xff]  }
 0x6c1   : > { %6380 = vmatprep.subr.bf16.mxu0 %v10638_v59  ;;  %9471 = vmatprep.subr.bf16.mxu1 %v10639_v47  ;;  %v10705_v59 = vld [vmem:[%s13573_s14 + $0x3c8] ss:$12 sps:$4 sm:$0xff]   ;;  %v6598_v47 = vrot.slane %v12843_v10, 1 }
 0x6c4   : > { %6381 = vmatpush1.bf16.msra.mxu0 %v10636_v43  ;;  %9472 = vmatpush3.bf16.msra.mxu1 %v10640_v46  ;;  %v10708_v43 = vld [vmem:[%s13573_s14 + $0x4fc] ss:$12 sps:$4 sm:$0xff]   ;;  %v10709_v46 = vld [vmem:[%s13573_s14 + $0x4a0] ss:$12 sps:$4 sm:$0xff]  }
 0x6c5   : > { %9473 = vmatprep.subr.bf16.mxu1 %v10641_v61  ;;  %6924 = vmatprep.subr.bf16.mxu0 %v10644_v63  ;;  %v10706_v61 = vld [vmem:[%s13573_s14 + $0x4f8] ss:$12 sps:$4 sm:$0xff]   ;;  %v10710_v63 = vld [vmem:[%s13573_s14 + $0x3e0] ss:$12 sps:$4 sm:$0xff]  }
 0x6c7   : > { %6383 = vmatmul.mubr.bf16.vlgmr.msra.gmra.mrb[52].mxu0 %v12782_v49 }
 0x6c8   : > { %9474 = vmatpush3.bf16.msra.mxu1 %v10645_v2  ;;  %6925 = vmatpush1.bf16.msra.mxu0 %v10642_v1  ;;  %v10713_v1 = vld [vmem:[%s13573_s14 + $0x514] ss:$12 sps:$4 sm:$0xff]   ;;  %v10714_v2 = vld [vmem:[%s13573_s14 + $0x4b8] ss:$12 sps:$4 sm:$0xff]  }
 0x6c9   : > { %6956 = vmatprep.mubr.bf16.mxu0 %v6597_v5  ;;  %9475 = vmatprep.subr.bf16.mxu1 %v10646_v3  ;;  %v10711_v3 = vld [vmem:[%s13573_s14 + $0x510] ss:$12 sps:$4 sm:$0xff]  }
 0x6ca   : > { %6926 = vmatprep.subr.bf16.mxu0 %v10649_v4  ;;  %v10718_v4 = vld [vmem:[%s13573_s14 + $0x52c] ss:$12 sps:$4 sm:$0xff]  }
 0x6cc   : > { %9476 = vmatpush3.bf16.msra.mxu1 %v10650_v26  ;;  %6927 = vmatpush1.bf16.msra.mxu0 %v10647_v8  ;;  %v10716_v8 = vld [vmem:[%s13573_s14 + $0x528] ss:$12 sps:$4 sm:$0xff]   ;;  %v10720_v26 = vld [vmem:[%s13573_s14 + $0x410] ss:$12 sps:$4 sm:$0xff]  }
 0x6cd   : > { %9477 = vmatprep.subr.bf16.mxu1 %v10651_v60  ;;  %6928 = vmatprep.subr.bf16.mxu0 %v10654_v50  ;;  %v10721_v60 = vld [vmem:[%s13573_s14 + $0x4e8] ss:$12 sps:$4 sm:$0xff]   ;;  %v10724_v50 = vld [vmem:[%s13573_s14 + $0x5a4] ss:$12 sps:$4 sm:$0xff]  }
 0x6d0   : > { %9478 = vmatpush3.bf16.msra.mxu1 %v10655_v12  ;;  %6929 = vmatpush1.bf16.msra.mxu0 %v10652_v11  ;;  %v10722_v11 = vld [vmem:[%s13573_s14 + $0x5a0] ss:$12 sps:$4 sm:$0xff]   ;;  %v10725_v12 = vld [vmem:[%s13573_s14 + $0x428] ss:$12 sps:$4 sm:$0xff]  }
 0x6d1   : > { %9479 = vmatprep.subr.bf16.mxu1 %v10656_v9  ;;  %6930 = vmatprep.subr.bf16.mxu0 %v10659_v13  ;;  %v6596_v9 = vrot.slane %v12782_v49, 1  ;;  %v10726_v13 = vld [vmem:[%s13573_s14 + $0x500] ss:$12 sps:$4 sm:$0xff]  }
 0x6d4   : > { %9480 = vmatpush3.bf16.msra.mxu1 %v10660_v16  ;;  %6931 = vmatpush1.bf16.msra.mxu0 %v10657_v15  ;;  %v10729_v15 = vld [vmem:[%s13573_s14 + $0x5bc] ss:$12 sps:$4 sm:$0xff]   ;;  %v7171_v16 = vrot.slane %v12788_v53, 1  ;;  %v10795_v53 = vld [vmem:[%s13573_s14 + $0x5d8] ss:$12 sps:$4 sm:$0xff]  }
 0x6d5   : > { %9800 = vmatprep.subr.bf16.mxu1 %v10896_v6  ;;  %6932 = vmatprep.subr.bf16.mxu0 %v10663_v18  ;;  %v10727_v18 = vld [vmem:[%s13573_s14 + $0x5b8] ss:$12 sps:$4 sm:$0xff]  }
 0x6d7   : > { %6465 = vmatmul.mubr.bf16.vlgmr.msra.gmra.mrb[60].mxu1 %v12782_v49  ;;  %v10730_v49 = vld [vmem:[%s13573_s14 + $0x440] ss:$12 sps:$4 sm:$0xff]  }
 0x6d8   : > { %9801 = vmatpush3.bf16.msra.mxu1 %v10664_v20  ;;  %6933 = vmatpush1.bf16.msra.mxu0 %v10661_v19  ;;  %v10731_v19 = vld [vmem:[%s13573_s14 + $0x518] ss:$12 sps:$4 sm:$0xff]   ;;  %v10734_v20 = vld [vmem:[%s13573_s14 + $0x5d4] ss:$12 sps:$4 sm:$0xff]  }
 0x6d9   : > { %9802 = vmatprep.subr.bf16.mxu1 %v10896_v6  ;;  %6934 = vmatprep.subr.bf16.mxu0 %v10667_v21  ;;  %v10732_v21 = vld [vmem:[%s13573_s14 + $0x5d0] ss:$12 sps:$4 sm:$0xff]  }
 0x6da   : > { %9808 = vmatprep.mubr.msk.bf16.mxu1 %vm10897_vm2, %v10896_v6 }
 0x6dc   : > { %9803 = vmatpush3.bf16.msra.mxu1 %v10668_v24  ;;  %6935 = vmatpush1.bf16.msra.mxu0 %v10665_v22  ;;  %v10735_v22 = vld [vmem:[%s13573_s14 + $0x458] ss:$12 sps:$4 sm:$0xff]   ;;  %v10736_v24 = vld [vmem:[%s13573_s14 + $0x530] ss:$12 sps:$4 sm:$0xff]  }
 0x6dd   : > { %9804 = vmatprep.subr.bf16.mxu1 %v10896_v6  ;;  %6936 = vmatprep.subr.bf16.mxu0 %v10671_v25  ;;  %v10739_v25 = vld [vmem:[%s13573_s14 + $0x5ec] ss:$12 sps:$4 sm:$0xff]  }
 0x6e0   : > { %9805 = vmatpush3.bf16.msra.mxu1 %v10672_v29  ;;  %6937 = vmatpush1.bf16.msra.mxu0 %v10669_v28  ;;  %v10737_v28 = vld [vmem:[%s13573_s14 + $0x5e8] ss:$12 sps:$4 sm:$0xff]   ;;  %v10740_v29 = vld [vmem:[%s13573_s14 + $0x470] ss:$12 sps:$4 sm:$0xff]  }
 0x6e1   : > { %9806 = vmatprep.subr.bf16.mxu1 %v10896_v6  ;;  %6938 = vmatprep.subr.bf16.mxu0 %v10675_v30  ;;  %v10743_v30 = vld [vmem:[%s13573_s14 + $0x604] ss:$12 sps:$4 sm:$0xff]  }
 0x6e4   : > { %9807 = vmatpush3.bf16.msra.mxu1 %v10676_v32  ;;  %6939 = vmatpush1.bf16.msra.mxu0 %v10673_v31  ;;  %v10741_v31 = vld [vmem:[%s13573_s14 + $0x600] ss:$12 sps:$4 sm:$0xff]   ;;  %v10744_v32 = vld [vmem:[%s13573_s14 + $0x548] ss:$12 sps:$4 sm:$0xff]  }
 0x6e5   : > { %6940 = vmatprep.subr.bf16.mxu0 %v10679_v33  ;;  %6965 = vmatprep.subr.bf16.mxu1 %v10682_v34  ;;  %v10747_v33 = vld [vmem:[%s13573_s14 + $0x61c] ss:$12 sps:$4 sm:$0xff]   ;;  %v10745_v34 = vld [vmem:[%s13573_s14 + $0x618] ss:$12 sps:$4 sm:$0xff]  }
 0x6e7   : > { %9809 = vmatmul.mubr.msk.bf16.vlgmr.msra.gmra.mrb[64].mxu1 %vm4651_vm15, %v12843_v10  ;;  %v10774_v10 = vld [vmem:[%s13573_s14 + $0x754] ss:$12 sps:$4 sm:$0xff]  }
 0x6e8   : > { %6941 = vmatpush1.bf16.msra.mxu0 %v10677_v35  ;;  %6966 = vmatpush1.bf16.msra.mxu1 %v10680_v36  ;;  %v10748_v35 = vld [vmem:[%s13573_s14 + $0x560] ss:$12 sps:$4 sm:$0xff]  }
 0x6e9   : > { %6942 = vmatprep.subr.bf16.mxu0 %v10685_v37  ;;  %6967 = vmatprep.subr.bf16.mxu1 %v10688_v38  ;;  %v10751_v36 = vld [vmem:[%s13573_s14 + $0x634] ss:$12 sps:$4 sm:$0xff]   ;;  %v10749_v37 = vld [vmem:[%s13573_s14 + $0x630] ss:$12 sps:$4 sm:$0xff]   ;;  %v10752_v38 = vld [vmem:[%s13573_s14 + $0x578] ss:$12 sps:$4 sm:$0xff]  }
 0x6ea   : > { %6997 = vmatprep.mubr.bf16.mxu1 %v10899_v23 }
 0x6ec   : > { %6943 = vmatpush1.bf16.msra.mxu0 %v10683_v39  ;;  %6968 = vmatpush1.bf16.msra.mxu1 %v10686_v14  ;;  %v10755_v39 = vld [vmem:[%s13573_s14 + $0x64c] ss:$12 sps:$4 sm:$0xff]   ;;  %v10753_v14 = vld [vmem:[%s13573_s14 + $0x648] ss:$12 sps:$4 sm:$0xff]  }
 0x6ed   : > { %6944 = vmatprep.subr.bf16.mxu0 %v10691_v40  ;;  %6969 = vmatprep.subr.bf16.mxu1 %v10694_v41  ;;  %v10756_v40 = vld [vmem:[%s13573_s14 + $0x590] ss:$12 sps:$4 sm:$0xff]  }
 0x6ee   : > { %v10759_v41 = vld [vmem:[%s13573_s14 + $0x664] ss:$12 sps:$4 sm:$0xff]  }
 0x6f0   : > { %6945 = vmatpush1.bf16.msra.mxu0 %v10689_v42  ;;  %6970 = vmatpush1.bf16.msra.mxu1 %v10692_v44  ;;  %v10762_v42 = vld [vmem:[%s13573_s14 + $0x724] ss:$12 sps:$4 sm:$0xff]   ;;  %v10757_v44 = vld [vmem:[%s13573_s14 + $0x660] ss:$12 sps:$4 sm:$0xff]  }
 0x6f1   : > { %6946 = vmatprep.subr.bf16.mxu0 %v10697_v45  ;;  %6971 = vmatprep.subr.bf16.mxu1 %v10700_v48  ;;  %v10760_v45 = vld [vmem:[%s13573_s14 + $0x720] ss:$12 sps:$4 sm:$0xff]   ;;  %v10765_v48 = vld [vmem:[%s13573_s14 + $0x67c] ss:$12 sps:$4 sm:$0xff]  }
 0x6f4   : > { %6947 = vmatpush1.bf16.msra.mxu0 %v10695_v54  ;;  %6972 = vmatpush1.bf16.msra.mxu1 %v10698_v27  ;;  %v10768_v54 = vld [vmem:[%s13573_s14 + $0x73c] ss:$12 sps:$4 sm:$0xff]   ;;  %v10763_v27 = vld [vmem:[%s13573_s14 + $0x678] ss:$12 sps:$4 sm:$0xff]  }
 0x6f5   : > { %6948 = vmatprep.subr.bf16.mxu0 %v10703_v55  ;;  %9492 = vmatprep.subr.bf16.mxu1 %v10704_v57  ;;  %v10766_v55 = vld [vmem:[%s13573_s14 + $0x738] ss:$12 sps:$4 sm:$0xff]   ;;  %v10771_v57 = vld [vmem:[%s13573_s14 + $0x694] ss:$12 sps:$4 sm:$0xff]  }
 0x6f7   : > { %9168 = vmatmul.mubr.msk.bf16.vlgmr.msra.gmra.mrb[68].mxu1 %vm4651_vm15, %v6598_v47 }
 0x6f8   : > { %6949 = vmatpush1.bf16.msra.mxu0 %v10701_v58  ;;  %9493 = vmatpush3.bf16.msra.mxu1 %v10705_v59  ;;  %v10769_v58 = vld [vmem:[%s13573_s14 + $0x690] ss:$12 sps:$4 sm:$0xff]  }
 0x6f9   : > { %7038 = vmatprep.mubr.bf16.mxu1 %v6597_v5  ;;  %6950 = vmatprep.subr.bf16.mxu0 %v10708_v43  ;;  %v10719_v5 = vld [vmem:[%s13573_s14 + $0x4d0] ss:$12 sps:$4 sm:$0xff]   ;;  %v10775_v43 = vld [vmem:[%s13573_s14 + $0x6a8] ss:$12 sps:$4 sm:$0xff]  }
 0x6fa   : > { %9494 = vmatprep.subr.bf16.mxu1 %v10709_v46  ;;  %v10772_v59 = vld [vmem:[%s13573_s14 + $0x750] ss:$12 sps:$4 sm:$0xff]   ;;  %v10778_v46 = vld [vmem:[%s13573_s14 + $0x768] ss:$12 sps:$4 sm:$0xff]  }
 0x6fc   : > { %6951 = vmatpush1.bf16.msra.mxu0 %v10706_v61  ;;  %9495 = vmatpush3.bf16.msra.mxu1 %v10710_v63  ;;  %v10783_v61 = vld [vmem:[%s13573_s14 + $0x6c4] ss:$12 sps:$4 sm:$0xff]   ;;  %v10784_v63 = vld [vmem:[%s13573_s14 + $0x668] ss:$12 sps:$4 sm:$0xff]  }
 0x6fd   : > { %6952 = vmatprep.subr.bf16.mxu0 %v10713_v1  ;;  %9496 = vmatprep.subr.bf16.mxu1 %v10714_v2  ;;  %v10781_v1 = vld [vmem:[%s13573_s14 + $0x6c0] ss:$12 sps:$4 sm:$0xff]   ;;  %v10785_v2 = vld [vmem:[%s13573_s14 + $0x5a8] ss:$12 sps:$4 sm:$0xff]  }
 0x700   : > { %6953 = vmatpush1.bf16.msra.mxu0 %v10711_v3  ;;  %9497 = vmatpush3.bf16.msra.mxu1 %v10715_v52  ;;  %v7172_v3 = vrot.slane %v12855_v7, 1  ;;  %v10788_v52 = vld [vmem:[%s13573_s14 + $0x6dc] ss:$12 sps:$4 sm:$0xff]   ;;  %v10813_v7 = vld [vmem:[%s13575_s16 + $0x40] sm:$0xff]  }
 0x701   : > { %6954 = vmatprep.subr.bf16.mxu0 %v10718_v4  ;;  %9498 = vmatprep.subr.bf16.mxu1 %v10719_v5  ;;  %v10789_v4 = vld [vmem:[%s13573_s14 + $0x680] ss:$12 sps:$4 sm:$0xff]   ;;  %v10786_v5 = vld [vmem:[%s13573_s14 + $0x6d8] ss:$12 sps:$4 sm:$0xff]  }
 0x704   : > { %6955 = vmatpush1.bf16.msra.mxu0 %v10716_v8  ;;  %9499 = vmatpush3.bf16.msra.mxu1 %v10720_v26  ;;  %v10790_v8 = vld [vmem:[%s13573_s14 + $0x5c0] ss:$12 sps:$4 sm:$0xff]  }
 0x705   : > { %9500 = vmatprep.subr.bf16.mxu1 %v10721_v60  ;;  %7498 = vmatprep.subr.bf16.mxu0 %v10724_v50  ;;  %v10793_v26 = vld [vmem:[%s13573_s14 + $0x6f4] ss:$12 sps:$4 sm:$0xff]   ;;  %v10794_v60 = vld [vmem:[%s13573_s14 + $0x698] ss:$12 sps:$4 sm:$0xff]   ;;  %v10791_v50 = vld [vmem:[%s13573_s14 + $0x6f0] ss:$12 sps:$4 sm:$0xff]  }
 0x707   : > { %6957 = vmatmul.mubr.bf16.vlgmr.msra.gmra.mrb[56].mxu0 %v6596_v9 }
 0x708   : > { %9501 = vmatpush3.bf16.msra.mxu1 %v10725_v12  ;;  %7499 = vmatpush1.bf16.msra.mxu0 %v10722_v11  ;;  %v10798_v11 = vld [vmem:[%s13573_s14 + $0x70c] ss:$12 sps:$4 sm:$0xff]   ;;  %v10799_v12 = vld [vmem:[%s13573_s14 + $0x6b0] ss:$12 sps:$4 sm:$0xff]  }
 0x709   : > { %7530 = vmatprep.mubr.bf16.mxu0 %v7171_v16  ;;  %9502 = vmatprep.subr.bf16.mxu1 %v10726_v13  ;;  %v10800_v13 = vld [vmem:[%s13573_s14 + $0x5f0] ss:$12 sps:$4 sm:$0xff]  }
 0x70a   : > { %7500 = vmatprep.subr.bf16.mxu0 %v10729_v15  ;;  %v10801_v15 = vld [vmem:[%s13573_s14 + $0x6c8] ss:$12 sps:$4 sm:$0xff]  }
 0x70c   : > { %9503 = vmatpush3.bf16.msra.mxu1 %v10730_v49  ;;  %7501 = vmatpush1.bf16.msra.mxu0 %v10727_v18  ;;  %v7170_v18 = vrot.slane %v12799_v56, 1  ;;  %v10803_v49 = vld [vmem:[%s13573_s14 + $0x6e0] ss:$12 sps:$4 sm:$0xff]   ;;  %v10806_v56 = vld [vmem:[%s13573_s14 + $0x638] ss:$12 sps:$4 sm:$0xff]  }
 0x70d   : > { %9504 = vmatprep.subr.bf16.mxu1 %v10731_v19  ;;  %7502 = vmatprep.subr.bf16.mxu0 %v10734_v20  ;;  %v10804_v19 = vld [vmem:[%s13573_s14 + $0x620] ss:$12 sps:$4 sm:$0xff]   ;;  %v10805_v20 = vld [vmem:[%s13573_s14 + $0x6f8] ss:$12 sps:$4 sm:$0xff]  }
 0x710   : > { %9505 = vmatpush3.bf16.msra.mxu1 %v10735_v22  ;;  %7503 = vmatpush1.bf16.msra.mxu0 %v10732_v21  ;;  %v10807_v21 = vld [vmem:[%s13573_s14 + $0x710] ss:$12 sps:$4 sm:$0xff]  }
 0x711   : > { %9506 = vmatprep.subr.bf16.mxu1 %v10736_v24  ;;  %7504 = vmatprep.subr.bf16.mxu0 %v10739_v25  ;;  %v10808_v22 = vld [vmem:[%s13573_s14 + $0x650] ss:$12 sps:$4 sm:$0xff]   ;;  %v10809_v24 = vld [vmem:[%s13573_s14 + $0x728] ss:$12 sps:$4 sm:$0xff]   ;;  %v10810_v25 = vld [vmem:[%s13573_s14 + $0x740] ss:$12 sps:$4 sm:$0xff]  }
 0x714   : > { %9507 = vmatpush3.bf16.msra.mxu1 %v10740_v29  ;;  %7505 = vmatpush1.bf16.msra.mxu0 %v10737_v28 }
 0x715   : > { %9812 = vmatprep.subr.bf16.mxu1 %v10896_v6  ;;  %7506 = vmatprep.subr.bf16.mxu0 %v10743_v30 }
 0x717   : > { %7039 = vmatmul.mubr.bf16.vlgmr.msra.gmra.mrb[72].mxu1 %v6596_v9  ;;  %v10796_v9 = vld [vmem:[%s13573_s14 + $0x708] ss:$12 sps:$4 sm:$0xff]  }
 0x718   : > { %9813 = vmatpush3.bf16.msra.mxu1 %v10744_v32  ;;  %7507 = vmatpush1.bf16.msra.mxu0 %v10741_v31 }
 0x719   : > { %9814 = vmatprep.subr.bf16.mxu1 %v10896_v6  ;;  %7508 = vmatprep.subr.bf16.mxu0 %v10747_v33 }
 0x71a   : > { %9820 = vmatprep.mubr.msk.bf16.mxu1 %vm10897_vm2, %v10896_v6 }
 0x71c   : > { %9815 = vmatpush3.bf16.msra.mxu1 %v10748_v35  ;;  %7509 = vmatpush1.bf16.msra.mxu0 %v10745_v34  ;;  %v10811_v35 = vld [vmem:[%s13573_s14 + $0x758] ss:$12 sps:$4 sm:$0xff]  }
 0x71d   : > { %9816 = vmatprep.subr.bf16.mxu1 %v10896_v6  ;;  %7510 = vmatprep.subr.bf16.mxu0 %v10751_v36 }
 0x720   : > { %9817 = vmatpush3.bf16.msra.mxu1 %v10752_v38  ;;  %7511 = vmatpush1.bf16.msra.mxu0 %v10749_v37  ;;  %v10812_v38 = vld [vmem:[%s13573_s14 + $0x770] ss:$12 sps:$4 sm:$0xff]  }
 0x721   : > { %9818 = vmatprep.subr.bf16.mxu1 %v10896_v6  ;;  %7512 = vmatprep.subr.bf16.mxu0 %v10755_v39 }
 0x724   : > { %9819 = vmatpush3.bf16.msra.mxu1 %v10756_v40  ;;  %7513 = vmatpush1.bf16.msra.mxu0 %v10753_v14 }
 0x725   : > { %7514 = vmatprep.subr.bf16.mxu0 %v10759_v41  ;;  %7539 = vmatprep.subr.bf16.mxu1 %v10762_v42 }
 0x727   : > { %9821 = vmatmul.mubr.msk.bf16.vlgmr.msra.gmra.mrb[76].mxu1 %vm4651_vm15, %v6598_v47  ;;  %v10777_v47 = vld [vmem:[%s13573_s14 + $0x6ac] ss:$12 sps:$4 sm:$0xff]  }
 0x728   : > { %7515 = vmatpush1.bf16.msra.mxu0 %v10757_v44  ;;  %7540 = vmatpush1.bf16.msra.mxu1 %v10760_v45 }
 0x729   : > { %7516 = vmatprep.subr.bf16.mxu0 %v10765_v48  ;;  %7541 = vmatprep.subr.bf16.mxu1 %v10768_v54 }
 0x72a   : > { %7571 = vmatprep.mubr.bf16.mxu1 %v10899_v23  ;;  %v10780_v23 = vld [vmem:[%s13573_s14 + $0x76c] ss:$12 sps:$4 sm:$0xff]  }
 0x72c   : > { %7517 = vmatpush1.bf16.msra.mxu0 %v10763_v27  ;;  %7542 = vmatpush1.bf16.msra.mxu1 %v10766_v55 }
 0x72d   : > { %7518 = vmatprep.subr.bf16.mxu0 %v10771_v57  ;;  %7543 = vmatprep.subr.bf16.mxu1 %v10774_v10  ;;  %v10814_v57 = vld [vmem:[%s13575_s16] sm:$0xff]  }
 0x730   : > { %7519 = vmatpush1.bf16.msra.mxu0 %v10769_v58  ;;  %7544 = vmatpush1.bf16.msra.mxu1 %v10772_v59  ;;  %v10815_v58 = vld [vmem:[%s13575_s16 + $0x48] sm:$0xff]  }
 0x731   : > { %7520 = vmatprep.subr.bf16.mxu0 %v10777_v47  ;;  %7545 = vmatprep.subr.bf16.mxu1 %v10780_v23  ;;  %v10816_v47 = vld [vmem:[%s13575_s16 + $0x8] sm:$0xff]  }
 0x734   : > { %7521 = vmatpush1.bf16.msra.mxu0 %v10775_v43  ;;  %7546 = vmatpush1.bf16.msra.mxu1 %v10778_v46  ;;  %v10817_v46 = vld [vmem:[%s13575_s16 + $0x50] sm:$0xff]  }
 0x735   : > { %7522 = vmatprep.subr.bf16.mxu0 %v10783_v61  ;;  %9519 = vmatprep.subr.bf16.mxu1 %v10784_v63  ;;  %v10818_v61 = vld [vmem:[%s13575_s16 + $0x10] sm:$0xff]   ;;  %v10819_v63 = vld [vmem:[%s13575_s16 + $0x58] sm:$0xff]  }
 0x737   : > { %9310 = vmatmul.mubr.msk.bf16.vlgmr.msra.gmra.mrb[80].mxu1 %vm4651_vm15, %v7172_v3 }
 0x738   : > { %7523 = vmatpush1.bf16.msra.mxu0 %v10781_v1  ;;  %9520 = vmatpush3.bf16.msra.mxu1 %v10785_v2  ;;  %v10820_v1 = vld [vmem:[%s13575_s16 + $0x18] sm:$0xff]   ;;  %v10821_v2 = vld [vmem:[%s13575_s16 + $0x60] sm:$0xff]  }
 0x739   : > { %7612 = vmatprep.mubr.bf16.mxu1 %v7171_v16  ;;  %7524 = vmatprep.subr.bf16.mxu0 %v10788_v52  ;;  %v10802_v16 = vld [vmem:[%s13573_s14 + $0x608] ss:$12 sps:$4 sm:$0xff]  }
 0x73a   : > { %9521 = vmatprep.subr.bf16.mxu1 %v10789_v4  ;;  %v10823_v4 = vld [vmem:[%s13575_s16 + $0x68] sm:$0xff]  }
 0x73c   : > { %7525 = vmatpush1.bf16.msra.mxu0 %v10786_v5  ;;  %9522 = vmatpush3.bf16.msra.mxu1 %v10790_v8 }
 0x73d   : > { %7526 = vmatprep.subr.bf16.mxu0 %v10793_v26  ;;  %9523 = vmatprep.subr.bf16.mxu1 %v10794_v60  ;;  %v10824_v26 = vld [vmem:[%s13575_s16 + $0x28] sm:$0xff]  }
 0x740   : > { %7527 = vmatpush1.bf16.msra.mxu0 %v10791_v50  ;;  %9524 = vmatpush3.bf16.msra.mxu1 %v10795_v53 }
 0x741   : > { %7528 = vmatprep.subr.bf16.mxu0 %v10798_v11  ;;  %9525 = vmatprep.subr.bf16.mxu1 %v10799_v12 }
 0x744   : > { %7529 = vmatpush1.bf16.msra.mxu0 %v10796_v9  ;;  %9526 = vmatpush3.bf16.msra.mxu1 %v10800_v13  ;;  %v10825_v9 = vld [vmem:[%s13575_s16 + $0x70] sm:$0xff]  }
 0x745   : > { %9527 = vmatprep.subr.bf16.mxu1 %v10801_v15  ;;  %9546 = vmatprep.subr.bf16.mxu0 %v10813_v7  ;;  %v10826_v13 = vld [vmem:[%s13575_s16 + $0x30] sm:$0xff]   ;;  %v10827_v15 = vld [vmem:[%s13575_s16 + $0x78] sm:$0xff]  }
 0x747   : > { %7531 = vmatmul.mubr.bf16.vlgmr.msra.gmra.mrb[60].mxu0 %v7170_v18 }
 0x748   : > { %9528 = vmatpush3.bf16.msra.mxu1 %v10802_v16  ;;  %9547 = vmatpush3.bf16.msra.mxu0 %v10814_v57  ;;  %v10828_v16 = vld [vmem:[%s13575_s16 + $0x38] sm:$0xff]  }
 0x749   : > { %9529 = vmatprep.subr.bf16.mxu1 %v10803_v49  ;;  %9548 = vmatprep.subr.bf16.mxu0 %v10815_v58 }
 0x74c   : > { %9530 = vmatpush3.bf16.msra.mxu1 %v10804_v19  ;;  %9549 = vmatpush3.bf16.msra.mxu0 %v10816_v47 }
 0x74d   : > { %9531 = vmatprep.subr.bf16.mxu1 %v10805_v20  ;;  %9550 = vmatprep.subr.bf16.mxu0 %v10817_v46 }
 0x750   : > { %9532 = vmatpush3.bf16.msra.mxu1 %v10806_v56  ;;  %9551 = vmatpush3.bf16.msra.mxu0 %v10818_v61 }
 0x751   : > { %9533 = vmatprep.subr.bf16.mxu1 %v10807_v21  ;;  %9552 = vmatprep.subr.bf16.mxu0 %v10819_v63  ;;  %v7663_v63 = vld [vmem:[%s13574_s15] sm:$0x7] }
 0x754   : > { %9534 = vmatpush3.bf16.msra.mxu1 %v10808_v22  ;;  %9553 = vmatpush3.bf16.msra.mxu0 %v10820_v1  ;;  %v10829_v22 = vld [vmem:[%s13575_s16 + $0x80] sm:$0xff]  }
 0x755   : > { %9824 = vmatprep.subr.bf16.mxu1 %v10896_v6  ;;  %9554 = vmatprep.subr.bf16.mxu0 %v10821_v2 }
 0x757   : > { %7613 = vmatmul.mubr.bf16.vlgmr.msra.gmra.mrb[84].mxu1 %v7170_v18 }
 0x758   : > { %9825 = vmatpush3.bf16.msra.mxu1 %v10809_v24  ;;  %9832 = vmatprep.mubr.msk.bf16.mxu1 %vm10897_vm2, %v10896_v6 }
 0x759   : > { %9826 = vmatprep.subr.bf16.mxu1 %v10896_v6 }
 0x75a   : > { %v5900_v28 = vpop.f32.mrb[44].mxu1  ;;  %v9454_v29 = vpop.f32.mrb[48].mxu0 }
 0x75b   : > { %v5902_v30 = vpop.f32.mrb[45].mxu1  ;;  %v9455_v31 = vpop.f32.mrb[49].mxu0 }
 0x75c   : > { %v9456_v32 = vadd.f32 %v9455_v31, %v9454_v29  ;;  %9827 = vmatpush3.bf16.msra.mxu1 %v10810_v25  ;;  %v5904_v33 = vpop.f32.mrb[46].mxu1  ;;  %v9457_v34 = vpop.f32.mrb[50].mxu0  ;;  %v10830_v31 = vld [vmem:[%s13575_s16 + $0x88] sm:$0xff]  }
 0x75d   : > { %v5905_v36 = vpop.f32.mrb[47].mxu1  ;;  %v9458_v37 = vpop.f32.mrb[51].mxu0  ;;  %9828 = vmatprep.subr.bf16.mxu1 %v10896_v6 }
 0x760   : > { %9829 = vmatpush3.bf16.msra.mxu1 %v10811_v35 }
 0x761   : > { %9830 = vmatprep.subr.bf16.mxu1 %v10896_v6 }
 0x764   : > { %9831 = vmatpush3.bf16.msra.mxu1 %v10812_v38 }
 0x765   : > { %9836 = vmatprep.subr.bf16.mxu1 %v10896_v6 }
 0x767   : > { %9833 = vmatmul.mubr.msk.bf16.vlgmr.msra.gmra.mrb[88].mxu1 %vm4651_vm15, %v7172_v3  ;;  %v10822_v3 = vld [vmem:[%s13575_s16 + $0x20] sm:$0xff]  }
 0x768   : > { %9842 = vmatprep.mubr.msk.bf16.mxu1 %vm10897_vm2, %v10896_v6  ;;  %9555 = vmatpush3.bf16.msra.mxu0 %v10822_v3  ;;  %v7668_v3 = vrot.slane %v7663_v63, %v11819_v62 }
 0x769   : > { %9556 = vmatprep.subr.bf16.mxu0 %v10823_v4  ;;  %9837 = vmatpush3.bf16.msra.mxu1 %v10829_v22 }
 0x76a   : > { %v5941_v39 = vpop.f32.mrb[48].mxu1  ;;  %9838 = vmatprep.subr.bf16.mxu1 %v10896_v6 }
 0x76b   : > { %v5942_v14 = vadd.f32 %v5941_v39, %v5900_v28  ;;  %v5943_v40 = vpop.f32.mrb[49].mxu1 }
 0x76c   : > { %v5944_v41 = vadd.f32 %v5943_v40, %v5902_v30  ;;  %v5945_v42 = vpop.f32.mrb[50].mxu1  ;;  %9557 = vmatpush3.bf16.msra.mxu0 %v10824_v26 }
 0x76d   : > { %v5946_v44 = vpop.f32.mrb[51].mxu1  ;;  %9558 = vmatprep.subr.bf16.mxu0 %v10825_v9  ;;  %9839 = vmatpush3.bf16.msra.mxu1 %v10830_v31 }
 0x76e   : > { %9840 = vmatprep.subr.bf16.mxu1 %v10896_v6 }
 0x770   : > { %9559 = vmatpush3.bf16.msra.mxu0 %v10826_v13 }
 0x771   : > { %9560 = vmatprep.subr.bf16.mxu0 %v10827_v15 }
 0x774   : > { %9561 = vmatpush3.bf16.msra.mxu0 %v10828_v16 }
 0x77a   : > { %v6022_v45 = vpop.f32.mrb[52].mxu1 }
 0x77b   : > { %v6023_v48 = vadd.f32 %v9456_v32, %v6022_v45  ;;  %v9798_v54 = vpop.f32.mrb[53].mxu1  ;;  %v10831_v32 = vld [vmem:[%s13575_s16 + $0x90] sm:$0x3f]  }
 0x77c   : > { %v6025_v27 = vpop.f32.mrb[54].mxu1  ;;  %v7847_v33 = vsel %vm7845_vm0, %v10831_v32, 0 }
 0x77d   : > { %v9799_v55 = vpop.f32.mrb[55].mxu1  ;;  %9841 = vmatpush3.bf16.msra.mxu1 %v7847_v33 }
 0x78a   : > { %v6425_v10 = vpop.f32.mrb[56].mxu1 }
 0x78b   : > { %v6427_v59 = vpop.f32.mrb[57].mxu1 }
 0x78c   : > { %v6429_v23 = vpop.f32.mrb[58].mxu1 }
 0x78d   : > { %v6430_v43 = vpop.f32.mrb[59].mxu1 }
 0x79a   : > { %v6384_v52 = vpop.f32.mrb[52].mxu0 }
 0x79b   : > { %v6385_v5 = vadd.f32 %v6384_v52, %v5942_v14  ;;  %v6386_v8 = vpop.f32.mrb[53].mxu0 }
 0x79c   : > { %v6387_v60 = vadd.f32 %v6386_v8, %v5944_v41  ;;  %v6388_v50 = vpop.f32.mrb[54].mxu0 }
 0x79d   : > { %v6426_v53 = vadd.f32 %v6425_v10, %v6385_v5  ;;  %v6389_v11 = vpop.f32.mrb[55].mxu0  ;;  %v7672_v5 = vrot.slane %v7663_v63, %v11825_v0  ;;  %v7676_v0 = vrot.slane %v7663_v63, %v5357_v51 }
 0x79e   : > { %v6428_v12 = vadd.f32 %v6427_v59, %v6387_v60 }
 0x7aa   : > { %v9481_v18 = vpop.f32.mrb[60].mxu1 }
 0x7ab   : > { %v9482_v49 = vpop.f32.mrb[61].mxu1 }
 0x7ac   : > { %v9483_v19 = vadd.f32 %v9482_v49, %v9481_v18  ;;  %v9484_v20 = vpop.f32.mrb[62].mxu1 }
 0x7ad   : > { %v9485_v56 = vpop.f32.mrb[63].mxu1 }
 0x7ae   : > { %v6467_v21 = vadd.f32 %v9483_v19, %v6023_v48 }
 0x7ba   : > { %v6506_v24 = vpop.f32.mrb[64].mxu1 }
 0x7bb   : > { %v6507_v25 = vadd.f32 %v6506_v24, %v6467_v21  ;;  %v9810_v28 = vpop.f32.mrb[65].mxu1 }
 0x7bc   : > { %v6509_v29 = vpop.f32.mrb[66].mxu1 }
 0x7bd   : > { %v9811_v30 = vpop.f32.mrb[67].mxu1 }
 0x7ca   : > { %v6999_v34 = vpop.f32.mrb[68].mxu1 }
 0x7cb   : > { %v7001_v35 = vpop.f32.mrb[69].mxu1 }
 0x7cc   : > { %v7003_v36 = vpop.f32.mrb[70].mxu1 }
 0x7cd   : > { %v7004_v37 = vpop.f32.mrb[71].mxu1 }
 0x7da   : > { %v6958_v38 = vpop.f32.mrb[56].mxu0 }
 0x7db   : > { %v7000_v39 = vadd.f32 %v6999_v34, %v6958_v38  ;;  %v6960_v14 = vpop.f32.mrb[57].mxu0 }
 0x7dc   : > { %v7002_v40 = vadd.f32 %v7001_v35, %v6960_v14  ;;  %v6962_v41 = vpop.f32.mrb[58].mxu0 }
 0x7dd   : > { %v7086_v42 = vadd.f32 %v7000_v39, %v6426_v53  ;;  %v6963_v44 = vpop.f32.mrb[59].mxu0 }
 0x7de   : > { %v7087_v45 = vadd.f32 %v7002_v40, %v6428_v12 }
 0x7ea   : > { %v9508_v6 = vpop.f32.mrb[72].mxu1 }
 0x7eb   : > { %v9509_v48 = vpop.f32.mrb[73].mxu1 }
 0x7ec   : > { %v9510_v54 = vadd.f32 %v9509_v48, %v9508_v6  ;;  %v9511_v27 = vpop.f32.mrb[74].mxu1 }
 0x7ed   : > { %v9512_v55 = vpop.f32.mrb[75].mxu1 }
 0x7fa   : > { %v7080_v7 = vpop.f32.mrb[76].mxu1 }
 0x7fb   : > { %v7081_v57 = vadd.f32 %v9510_v54, %v7080_v7  ;;  %v9822_v10 = vpop.f32.mrb[77].mxu1 }
 0x7fc   : > { %v7083_v58 = vpop.f32.mrb[78].mxu1 }
 0x7fd   : > { %v7088_v59 = vadd.f32 %v7081_v57, %v6507_v25  ;;  %v9823_v47 = vpop.f32.mrb[79].mxu1 }
 0x80a   : > { %v7573_v23 = vpop.f32.mrb[80].mxu1 }
 0x80b   : > { %v7575_v43 = vpop.f32.mrb[81].mxu1 }
 0x80c   : > { %v7577_v46 = vpop.f32.mrb[82].mxu1 }
 0x80d   : > { %v7578_v61 = vpop.f32.mrb[83].mxu1 }
 0x81a   : > { %v7532_v1 = vpop.f32.mrb[60].mxu0 }
 0x81b   : > { %v7574_v2 = vadd.f32 %v7573_v23, %v7532_v1  ;;  %v7534_v52 = vpop.f32.mrb[61].mxu0 }
 0x81c   : > { %v7576_v4 = vadd.f32 %v7575_v43, %v7534_v52  ;;  %v7536_v8 = vpop.f32.mrb[62].mxu0 }
 0x81d   : > { %v7660_v26 = vadd.f32 %v7574_v2, %v7086_v42  ;;  %v7537_v60 = vpop.f32.mrb[63].mxu0 }
 0x81e   : > { %v7661_v50 = vadd.f32 %v7576_v4, %v7087_v45 }
 0x81f   : > { %v7680_v53 = vadd.f32 %v7668_v3, %v7660_v26 }
 0x820   : > { %v7681_v11 = vadd.f32 %v7672_v5, %v7661_v50 }
 0x821   : > { %v7683_v12 = vmax.f32 %v7680_v53, 0.0 }
 0x822   : > { %v7684_v9 = vmax.f32 %v7681_v11, 0.0 }
 0x823   : > { %v7686_v15 = vpack.c.bf16 %v7683_v12, %v7683_v12 }
 0x824   : > { %v7687_v13 = vpack.c.bf16 %v7684_v9, %v7684_v9 }
 0x826   : > { %7881 = vmatprep.mubr.bf16.mxu0 %v7687_v13 }
 0x827   : > { %7882 = vmatmul.mubr.bf16.vlgmr.msra.gmra.mrb[64].mxu0 %v7686_v15 }
 0x82a   : > { %v9535_v16 = vpop.f32.mrb[84].mxu1 }
 0x82b   : > { %v9536_v18 = vpop.f32.mrb[85].mxu1 }
 0x82c   : > { %v9537_v49 = vadd.f32 %v9536_v18, %v9535_v16  ;;  %v9538_v62 = vpop.f32.mrb[86].mxu1 }
 0x82d   : > { %v9539_v19 = vpop.f32.mrb[87].mxu1 }
 0x83a   : > { %v7654_v20 = vpop.f32.mrb[88].mxu1 }
 0x83b   : > { %v7655_v56 = vadd.f32 %v9537_v49, %v7654_v20  ;;  %v9834_v21 = vpop.f32.mrb[89].mxu1 }
 0x83c   : > { %v7657_v22 = vpop.f32.mrb[90].mxu1 }
 0x83d   : > { %v7662_v24 = vadd.f32 %v7655_v56, %v7088_v59  ;;  %v9835_v25 = vpop.f32.mrb[91].mxu1 }
 0x83f   : > { %v7682_v28 = vadd.f32 %v7676_v0, %v7662_v24 }
 0x841   : > { %v7685_v29 = vmax.f32 %v7682_v28, 0.0 }
 0x843   : > { %v7688_v30 = vpack.c.bf16 %v7685_v29, %v7685_v29 }
 0x845   : > { %9843 = vmatmul.mubr.msk.bf16.vlgmr.msra.gmra.mrb[92].mxu1 %vm7841_vm1, %v7688_v30 }
 0x8fa   : > { %v9562_v31 = vpop.f32.mrb[64].mxu0 }
 0x8fb   : > { %v9563_v32 = vpop.f32.mrb[65].mxu0 }
 0x8fc   : > { %v9564_v33 = vadd.f32 %v9563_v32, %v9562_v31  ;;  %v9565_v34 = vpop.f32.mrb[66].mxu0 }
 0x8fd   : > { %v9566_v35 = vpop.f32.mrb[67].mxu0 }
 0x8fe   : > { %v7884_v51 = vadd.f32 %v9564_v33, %v7727_v17 }
 0x918   : > { %v7923_v36 = vpop.f32.mrb[92].mxu1 }
 0x919   : > { %v7924_v37 = vadd.f32 %v7923_v36, %v7884_v51  ;;  %v9844_v38 = vpop.f32.mrb[93].mxu1 }
 0x91a   : > { %v7926_v39 = vpop.f32.mrb[94].mxu1 }
 0x91b   : > { %7929 = vst [vmem:[%s567_s1] sm:$0x1] %v7924_v37  ;;  %v9845_v14 = vpop.f32.mrb[95].mxu1 }
 0x91c   : > { %10845 = shalt.err (!%p10842_p3)
}
 0x91d   : > { %s10846_s22 = scalar_lea.hbm %s13517_s20, 16  ;;  %s10850_s25 = scalar_lea.hbm %s13602_s19, 32 }
 0x91e   : > { %p10847_p4 = scmp.ne.s32.totalorder %s13517_s20, %s10846_s22  ;;  %p10851_p9 = scmp.lt.u32.totalorder %s13517_s20, %s13602_s19 }
 0x91f   : > { %p10852_p10 = scmp.lt.u32.totalorder %s10850_s25, %s10846_s22  ;;  %p10854_p12 = scmp.lt.u32.totalorder %s10846_s22, %s13517_s20 }
 0x920   : > { %p10848_p7 = pnand %p10847_p4, %p11034_p5 }
 0x921   : > { %p10853_p11 = por %p10852_p10, %p10851_p9 }
 0x922   : > { %p10849_p8 = pneg %p10848_p7 }
 0x923   : > { %p10855_p13 = por %p10854_p12, %p10853_p11 }
 0x925   : > { %p10856_p0 = pnand %p10855_p13, %p10849_p8 }
 0x927   : > { %10859 = shalt.err (!%p10856_p0)
}
 0x928   : > { %9862 = dma.vmem_to_hbm [thread:$0]  (%p11034_p5), %s13519_s23, 16, %s13517_s20, %s7931_s0  }
 0x929 PF: > { %s13603_s27 = sld [smem:[#allocation12_spill]]  ;;  %s13604_s24 = sld [smem:[#allocation10_spill]] }
 0x92f   : > { %p9868_p1 = scmp.ge.s32.totalorder %s13603_s27, 2  ;;  %s7955_s1 = sand.u32 1, %s13604_s24  }
 0x930   : > { %s7956_s18 = scalar_lea.sflag [#allocation8], %s7955_s1 }
 0x931   : > { %p9865_p2 = pnand %p9868_p1, %p11038_p6 }
 0x933   : > { %10877 = dma.done.wait (!%p9865_p2), %s7956_s18, 16  }
 0x934   : > { %10879 = vsyncadd (!%p9865_p2), %s7956_s18, 4294967280  ;;  %s13606_s30 = sld [smem:[#allocation13_spill]]  ;;  %s13607_s22 = sld [smem:[#allocation11_spill]] }
 0x935   : > { %s13608_s29 = sld [smem:[#allocation14_spill]]  ;;  %s13609_s27 = smov %s10886_s28 }
 0x93a   : > { %p28_p3 = scmp.ge.s32.totalorder %s13606_s30, 4   ;;  %s13610_s28 = smov %s13607_s22 }
 0x93c   :  { %30 = sbr.rel (!%p28_p3) target bundleno = 8 (0x8), region = 148 }
 0x943   :  { %7960 = vsyncpa [#allocation8], 1 }
 0x944   :  { %7962 = vsyncpa [#allocation8 + $0x1], 1 }

</bundles_post_ra>
